<compile_context>
chip_gen: v7x
topology: tpu7x:2x2x1
jax: 0.10.0
libtpu: 0.0.40
codegen_flags: <defaults>
</compile_context>

<pallas_src>
import jax
import jax.numpy as jnp
from jax.experimental import pallas as pl
from jax.experimental.pallas import tpu as pltpu

CONFIG = {"batch_size": 10, "d_model": 512, "n_heads": 8, "context_window": 16}


# ------------------------------- kernel -------------------------------------


def _swiglu_kernel(x_ref, wg_ref, wl_ref, bg_ref, bl_ref, beta_ref, o_ref):
    """One M-tile of the fused SwiGLU.

    x:    (tm, D)   activation tile              (VMEM)
    wg:   (D, D)    gate weight (in, out)        (VMEM, resident)
    wl:   (D, D)    linear weight (in, out)      (VMEM, resident)
    bg:   (1, D)    gate bias                    (VMEM, resident)
    bl:   (1, D)    linear bias                  (VMEM, resident)
    beta: (1, 1)    scalar                       (SMEM)
    out:  (tm, D)
    """
    x = x_ref[...]

    # Two MXU matmuls feeding the gate and linear branches (f32 accumulation).
    g = jnp.dot(x, wg_ref[...], preferred_element_type=jnp.float32) + bg_ref[...]
    lin = jnp.dot(x, wl_ref[...], preferred_element_type=jnp.float32) + bl_ref[...]

    beta = beta_ref[0, 0]                         # SMEM scalar read
    swish_gate = g * jax.nn.sigmoid(beta * g)     # EUP sigmoid + VPU muls (f32)
    o_ref[...] = (swish_gate * lin).astype(o_ref.dtype)


# ------------------------------ wrapper --------------------------------------


def _pick_tile_m(m, target=128):
    """Largest multiple-of-8 divisor of m that is <= target (fallback: m)."""
    best = None
    for tm in range(8, min(m, target) + 1, 8):
        if m % tm == 0:
            best = tm
    return best if best is not None else m


def swiglu(x, params):
    """Fused SwiGLU forward.

    x: (..., D) float32.
    params: wg/wl stored as (in, out) so y = x @ W (== x @ W_torch.T),
            bg/bl of shape (D,), beta of shape (1,).
    """
    orig_shape = x.shape
    D = orig_shape[-1]
    x2d = x.reshape(-1, D)
    M = x2d.shape[0]

    bg = params["bg"].reshape(1, D)
    bl = params["bl"].reshape(1, D)
    beta = params["beta"].reshape(1, 1).astype(jnp.float32)  # SMEM scalar

    tm = _pick_tile_m(M)
    grid = (M // tm,)

    out = pl.pallas_call(
        _swiglu_kernel,
        grid=grid,
        out_shape=jax.ShapeDtypeStruct((M, D), x.dtype),
        in_specs=[
            pl.BlockSpec((tm, D), lambda i: (i, 0)),            # activation tile
            pl.BlockSpec((D, D), lambda i: (0, 0)),              # gate weight (resident)
            pl.BlockSpec((D, D), lambda i: (0, 0)),              # linear weight (resident)
            pl.BlockSpec((1, D), lambda i: (0, 0)),              # gate bias
            pl.BlockSpec((1, D), lambda i: (0, 0)),              # linear bias
            pl.BlockSpec(memory_space=pltpu.MemorySpace.SMEM),   # beta scalar
        ],
        out_specs=pl.BlockSpec((tm, D), lambda i: (i, 0)),
        compiler_params=pltpu.CompilerParams(
            dimension_semantics=("parallel",)),
    )(x2d, params["wg"], params["wl"], bg, bl, beta)

    return out.reshape(orig_shape)


# -------------------------------- main ---------------------------------------


if __name__ == "__main__":
    key = jax.random.PRNGKey(0)
    kx, kg, kbg, kl, kbl = jax.random.split(key, 5)

    B = CONFIG["batch_size"]       # 10
    S = CONFIG["context_window"]   # 16
    D = CONFIG["d_model"]          # 512

    x = jax.random.normal(kx, (B, S, D), jnp.float32)

    bound = 1.0 / (D ** 0.5)       # nn.Linear default init range
    params = {
        "wg": jax.random.uniform(kg, (D, D), jnp.float32, -bound, bound),
        "bg": jax.random.uniform(kbg, (D,), jnp.float32, -bound, bound),
        "wl": jax.random.uniform(kl, (D, D), jnp.float32, -bound, bound),
        "bl": jax.random.uniform(kbl, (D,), jnp.float32, -bound, bound),
        "beta": jnp.ones((1,), jnp.float32),   # nn.Parameter(torch.ones(1))
    }

    fwd = jax.jit(lambda xx: swiglu(xx, params))
    out = fwd(x)
    jax.block_until_ready(out)

    # Pure-JAX reference for numerical verification (same eval semantics).
    g_ref = x @ params["wg"] + params["bg"]
    lin_ref = x @ params["wl"] + params["bl"]
    ref = (g_ref * jax.nn.sigmoid(params["beta"] * g_ref)) * lin_ref

    assert out.shape == (B, S, D), (out.shape, (B, S, D))
    assert bool(jnp.all(jnp.isfinite(out)))
    max_err = float(jnp.max(jnp.abs(out - ref)))
    assert bool(jnp.allclose(out, ref, atol=1e-4, rtol=1e-4)), max_err
    print("KERNEL_OK")
</pallas_src>

<mosaic_0001>
module attributes {stable_mosaic.version = 11 : i64} {
  func.func @_swiglu_kernel(%arg0: i32, %arg1: memref<80x512xf32, #tpu.memory_space<vmem>>, %arg2: memref<512x512xf32, #tpu.memory_space<vmem>>, %arg3: memref<512x512xf32, #tpu.memory_space<vmem>>, %arg4: memref<1x512xf32, #tpu.memory_space<vmem>>, %arg5: memref<1x512xf32, #tpu.memory_space<vmem>>, %arg6: memref<1x1xf32, #tpu.memory_space<smem>>, %arg7: memref<80x512xf32, #tpu.memory_space<vmem>>) attributes {dimension_semantics = [#tpu.dimension_semantics<parallel>], iteration_bounds = array<i64: 2>, scalar_prefetch = 0 : i64, scratch_operands = 0 : i64, tpu.core_type = #tpu.core_type<tc>, window_params = [{transform_indices = @transform_0, window_bounds = array<i64: 80, 512>}, {pipeline_mode = #tpu.pipeline_mode<synchronous>, transform_indices = @transform_1, window_bounds = array<i64: 512, 512>}, {pipeline_mode = #tpu.pipeline_mode<synchronous>, transform_indices = @transform_2, window_bounds = array<i64: 512, 512>}, {pipeline_mode = #tpu.pipeline_mode<synchronous>, transform_indices = @transform_3, window_bounds = array<i64: 1, 512>}, {pipeline_mode = #tpu.pipeline_mode<synchronous>, transform_indices = @transform_4, window_bounds = array<i64: 1, 512>}, {transform_indices = @transform_5, window_bounds = array<i64: 1, 1>}, {transform_indices = @transform_6, window_bounds = array<i64: 80, 512>}]} {
    %c0 = arith.constant 0 : index
    %c0_0 = arith.constant 0 : index
    %0 = vector.load %arg1[%c0, %c0_0] : memref<80x512xf32, #tpu.memory_space<vmem>>, vector<80x512xf32>
    %c0_1 = arith.constant 0 : index
    %c0_2 = arith.constant 0 : index
    %1 = vector.load %arg2[%c0_1, %c0_2] : memref<512x512xf32, #tpu.memory_space<vmem>>, vector<512x512xf32>
    %cst = arith.constant dense<0.000000e+00> : vector<80x512xf32>
    %2 = tpu.matmul %0, %1, %cst {dimension_numbers = #tpu.dot_dimension_numbers<[1], [0], [0], [1], [0, 0, 1, 1], [], []>} : vector<80x512xf32>, vector<512x512xf32>, vector<80x512xf32> -> vector<80x512xf32>
    %c0_3 = arith.constant 0 : index
    %c0_4 = arith.constant 0 : index
    %3 = vector.load %arg4[%c0_3, %c0_4] : memref<1x512xf32, #tpu.memory_space<vmem>>, vector<1x512xf32>
    %4 = vector.broadcast %3 : vector<1x512xf32> to vector<80x512xf32>
    %5 = arith.addf %2, %4 : vector<80x512xf32>
    %c0_5 = arith.constant 0 : index
    %c0_6 = arith.constant 0 : index
    %6 = vector.load %arg3[%c0_5, %c0_6] : memref<512x512xf32, #tpu.memory_space<vmem>>, vector<512x512xf32>
    %cst_7 = arith.constant dense<0.000000e+00> : vector<80x512xf32>
    %7 = tpu.matmul %0, %6, %cst_7 {dimension_numbers = #tpu.dot_dimension_numbers<[1], [0], [0], [1], [0, 0, 1, 1], [], []>} : vector<80x512xf32>, vector<512x512xf32>, vector<80x512xf32> -> vector<80x512xf32>
    %c0_8 = arith.constant 0 : index
    %c0_9 = arith.constant 0 : index
    %8 = vector.load %arg5[%c0_8, %c0_9] : memref<1x512xf32, #tpu.memory_space<vmem>>, vector<1x512xf32>
    %9 = vector.broadcast %8 : vector<1x512xf32> to vector<80x512xf32>
    %10 = arith.addf %7, %9 : vector<80x512xf32>
    %c0_10 = arith.constant 0 : index
    %c0_11 = arith.constant 0 : index
    %11 = memref.load %arg6[%c0_10, %c0_11] : memref<1x1xf32, #tpu.memory_space<smem>>
    %12 = vector.broadcast %11 : f32 to vector<80x512xf32>
    %13 = arith.mulf %12, %5 : vector<80x512xf32>
    %14 = arith.negf %13 : vector<80x512xf32>
    %15 = math.exp %14 : vector<80x512xf32>
    %cst_12 = arith.constant 1.000000e+00 : f32
    %16 = vector.broadcast %cst_12 : f32 to vector<80x512xf32>
    %17 = arith.addf %16, %15 : vector<80x512xf32>
    %18 = arith.divf %16, %17 : vector<80x512xf32>
    %19 = arith.mulf %5, %18 : vector<80x512xf32>
    %20 = arith.mulf %19, %10 : vector<80x512xf32>
    %c0_13 = arith.constant 0 : index
    %c0_14 = arith.constant 0 : index
    %21 = vector.load %arg7[%c0_13, %c0_14] : memref<80x512xf32, #tpu.memory_space<vmem>>, vector<80x512xf32>
    tpu.vector_store %arg7[%c0_13, %c0_14], %20 {strides = array<i32>} : memref<80x512xf32, #tpu.memory_space<vmem>>, vector<80x512xf32>,
    return
  }
  func.func @transform_0(%arg0: i32) -> (i32, i32) {
    %c0_i32 = arith.constant 0 : i32
    %c0_i32_0 = arith.constant 0 : i32
    return %arg0, %c0_i32 : i32, i32
  }
  func.func @transform_1(%arg0: i32) -> (i32, i32) {
    %c0_i32 = arith.constant 0 : i32
    %c0_i32_0 = arith.constant 0 : i32
    %c0_i32_1 = arith.constant 0 : i32
    return %c0_i32, %c0_i32_0 : i32, i32
  }
  func.func @transform_2(%arg0: i32) -> (i32, i32) {
    %c0_i32 = arith.constant 0 : i32
    %c0_i32_0 = arith.constant 0 : i32
    %c0_i32_1 = arith.constant 0 : i32
    return %c0_i32, %c0_i32_0 : i32, i32
  }
  func.func @transform_3(%arg0: i32) -> (i32, i32) {
    %c0_i32 = arith.constant 0 : i32
    %c0_i32_0 = arith.constant 0 : i32
    %c0_i32_1 = arith.constant 0 : i32
    return %c0_i32, %c0_i32_0 : i32, i32
  }
  func.func @transform_4(%arg0: i32) -> (i32, i32) {
    %c0_i32 = arith.constant 0 : i32
    %c0_i32_0 = arith.constant 0 : i32
    %c0_i32_1 = arith.constant 0 : i32
    return %c0_i32, %c0_i32_0 : i32, i32
  }
  func.func @transform_5(%arg0: i32) -> (i32, i32) {
    %c0_i32 = arith.constant 0 : i32
    %c0_i32_0 = arith.constant 0 : i32
    %c0_i32_1 = arith.constant 0 : i32
    return %c0_i32, %c0_i32_0 : i32, i32
  }
  func.func @transform_6(%arg0: i32) -> (i32, i32) {
    %c0_i32 = arith.constant 0 : i32
    %c0_i32_0 = arith.constant 0 : i32
    return %arg0, %c0_i32 : i32, i32
  }
}

</mosaic_0001>

<bundles_post_ra>
// kernel: _lambda_.1
= control target key start
LH: loop header
LB: loop body
LE: loop exit
PB: predicated region body
PF: predicated region fallthrough
CT: control target
= control target key end

     0   :  { %s4617_s0 = inlined_call_operand.hbm [shape: f32[160,512], index: 0, kind: input, shape index: {}]   ;;  %s4618_s1 = inlined_call_operand.hbm [shape: f32[512,512], index: 1, kind: input, shape index: {}]   ;;  %s4619_s2 = inlined_call_operand.hbm [shape: f32[512,512], index: 2, kind: input, shape index: {}]   ;;  %s4620_s3 = inlined_call_operand.vmem [shape: f32[1,512], index: 3, kind: input, shape index: {}]   ;;  %s4621_s4 = inlined_call_operand.hbm [shape: f32[1,512], index: 4, kind: input, shape index: {}]   ;;  %s4622_s5 = inlined_call_operand.<no memory space> [shape: f32[1,1], index: 5, kind: input, shape index: {}]   ;;  %s4623_s6 = inlined_call_operand.hbm [shape: f32[160,512], index: 6, kind: output, shape index: {}]  }
   0x1   :  { %11 = sst [smem:[#allocation2]] %s4622_s5 }
   0x2   :  { %12 = vsyncpa [#allocation4], 0 }
   0x3   :  { %14 = vsyncpa [#allocation4 + $0x1], 0 }
   0x4   :  { %15 = vsyncpa [#allocation7], 0 }
   0x5   :  { %16 = vsyncpa [#allocation10], 0 }
   0x6   :  { %17 = vsyncpa [#allocation5], 0 }
   0x7   :  { %19 = vsyncpa [#allocation5 + $0x1], 0  ;;  %s3677_s23 = smov 0   ;;  %s3679_s24 = smov 0  }
   0x8   :  { %s3681_s25 = smov 0   ;;  %s3683_s26 = smov 0  }
   0x9 LB: > { %s3698_s5 = sadd.s32 4294967295, %s3628_s26   ;;  %s2431_s27 = sadd.s32 4294967294, %s3628_s26   ;;  %s3628_s26 = sphi %s3683_s26, %s4692_s26   ;;  %s3624_s25 = sphi %s3681_s25, %s4691_s25   ;;  %s3620_s24 = sphi %s3679_s24, %s4690_s24   ;;  %s3616_s23 = sphi %s3677_s23, %s4689_s23  }
   0xa   : > { %p45_p0 = scmp.ne.s32.totalorder %s3620_s24, %s3616_s23  ;;  %p4624_p1 = scmp.eq.s32.totalorder %s3698_s5, 0 }
   0xb   : > { %p180_p3 = scmp.eq.s32.totalorder %s2431_s27, 1  ;;  %p2432_p5 = scmp.ge.s32.totalorder %s3628_s26, 1 }
   0xc   : > { %p3707_p4 = por %p4624_p1, %p45_p0  ;;  %p187_p7 = scmp.lt.s32.totalorder %s3628_s26, 3 }
   0xd   : > { %p3712_p6 = por %p180_p3, %p45_p0  ;;  %s3630_s7 = smov [#allocation6]  }
   0xe   : > { %s4644_s28 = scalar_select %p3707_p4, 1, 0 }
   0xf   : > { %s4645_s29 = scalar_select %p3712_p6, 1, 0 }
  0x10   : > { %p3717_p8 = pnand %p2432_p5, %p187_p7  ;;  %s199_s8 = sshll.u32 %s3630_s7, 4  ;;  %s3721_s8 = int_to_ptr.vmem [resolvable:$true] %s199_s8 }
  0x11   : > { %s3631_s10 = smov [#allocation8]   ;;  %s3632_s12 = smov [#allocation9]  }
  0x12   : > { %s4646_s30 = scalar_select %p3717_p8, 1, 0 }
  0x13   : > { %p3183_p9 = pneg %p3717_p8  ;;  %s212_s11 = sshll.u32 %s3631_s10, 4  ;;  %s3732_s11 = int_to_ptr.vmem [resolvable:$true] %s212_s11 }
  0x14   : > { %s3734_s13 = sshll.u32 %s3632_s12, 4  ;;  %s3440_s16 = scalar_lea.hbm %s4618_s1, 32768  ;;  %s230_s13 = int_to_ptr.vmem [resolvable:$true] %s3734_s13 }
  0x15   : > { %p3728_p11 = pnand %p3183_p9, %p4624_p1  ;;  %p3441_p12 = scmp.ne.s32.totalorder %s4618_s1, %s3440_s16 }
  0x16   : > { %p3447_p5 = scmp.lt.u32.totalorder %s3440_s16, %s4618_s1 }
  0x17   : > { %p3744_p13 = pneg %p3728_p11 }
  0x19   : > { %p3443_p0 = pnand %p3744_p13, %p3441_p12 }
  0x1b   : > { %p3444_p3 = pneg %p3443_p0 }
  0x1d   : > { %p3449_p7 = pnand %p3447_p5, %p3444_p3 }
  0x1f   : > { %3452 = shalt.err (!%p3449_p7)
}
  0x20   : > { %s3453_s22 = scalar_lea.vmem %s3721_s8, 32768  ;;  %p3461_p2 = scmp.lt.s32.totalorder %s3721_s8, %s3721_s8 }
  0x21   : > { %p3454_p9 = scmp.ne.s32.totalorder %s3721_s8, %s3453_s22  ;;  %p3462_p6 = scmp.lt.s32.totalorder %s3453_s22, %s3453_s22 }
  0x23   : > { %p3456_p10 = pnand %p3454_p9, %p3744_p13  ;;  %p3463_p12 = por %p3462_p6, %p3461_p2 }
  0x25   : > { %p3457_p1 = pneg %p3456_p10 }
  0x27   : > { %p3464_p0 = pnand %p3463_p12, %p3457_p1 }
  0x29   : > { %3467 = shalt.err (!%p3464_p0)
}
  0x2a   : > { %s4627_s27 = smov 512   ;;  %s3634_s7 = smov 32  }
  0x2b   : > { %3186 = dma.hbm_to_vmem [thread:$0]  (!%p3728_p11), %s4618_s1, 32768, %s3721_s8, [#allocation7], %s4627_s27, %s4627_s27, %s3634_s7  }
  0x2c   : > { %s3468_s16 = scalar_lea.hbm %s4619_s2, 32768 }
  0x2d   : > { %p3469_p1 = scmp.ne.s32.totalorder %s4619_s2, %s3468_s16  ;;  %p3475_p10 = scmp.lt.u32.totalorder %s3468_s16, %s4619_s2 }
  0x2f   : > { %p3471_p2 = pnand %p3469_p1, %p3744_p13 }
  0x31   : > { %p3472_p6 = pneg %p3471_p2 }
  0x33   : > { %p3477_p3 = pnand %p3475_p10, %p3472_p6 }
  0x35   : > { %3480 = shalt.err (!%p3477_p3)
}
  0x36   : > { %s3481_s8 = scalar_lea.vmem %s3732_s11, 32768  ;;  %p3489_p12 = scmp.lt.s32.totalorder %s3732_s11, %s3732_s11 }
  0x37   : > { %p3482_p5 = scmp.ne.s32.totalorder %s3732_s11, %s3481_s8  ;;  %p3490_p0 = scmp.lt.s32.totalorder %s3481_s8, %s3481_s8 }
  0x39   : > { %p3484_p7 = pnand %p3482_p5, %p3744_p13  ;;  %p3491_p1 = por %p3490_p0, %p3489_p12 }
  0x3b   : > { %p3485_p9 = pneg %p3484_p7 }
  0x3d   : > { %p3492_p2 = pnand %p3491_p1, %p3485_p9 }
  0x3f   : > { %3495 = shalt.err (!%p3492_p2)
}
  0x40   : > { %3189 = dma.hbm_to_vmem [thread:$0]  (!%p3728_p11), %s4619_s2, 32768, %s3732_s11, [#allocation7], %s4627_s27, %s4627_s27, %s3634_s7  }
  0x41   : > { %s3496_s15 = scalar_lea.hbm %s4621_s4, 64 }
  0x42   : > { %p3497_p6 = scmp.ne.s32.totalorder %s4621_s4, %s3496_s15  ;;  %p3503_p5 = scmp.lt.u32.totalorder %s3496_s15, %s4621_s4 }
  0x44   : > { %p3499_p10 = pnand %p3497_p6, %p3744_p13 }
  0x46   : > { %p3500_p3 = pneg %p3499_p10 }
  0x48   : > { %p3505_p7 = pnand %p3503_p5, %p3500_p3 }
  0x4a   : > { %3508 = shalt.err (!%p3505_p7)
}
  0x4b   : > { %s3509_s21 = scalar_lea.vmem %s230_s13, 64  ;;  %p3517_p1 = scmp.lt.s32.totalorder %s230_s13, %s230_s13 }
  0x4c   : > { %p3510_p9 = scmp.ne.s32.totalorder %s230_s13, %s3509_s21  ;;  %p3518_p2 = scmp.lt.s32.totalorder %s3509_s21, %s3509_s21 }
  0x4e   : > { %p3512_p12 = pnand %p3510_p9, %p3744_p13  ;;  %p3519_p4 = por %p3518_p2, %p3517_p1 }
  0x50   : > { %p3513_p0 = pneg %p3512_p12 }
  0x52   : > { %p3520_p8 = pnand %p3519_p4, %p3513_p0 }
  0x54   : > { %3523 = shalt.err (!%p3520_p8)
}
  0x55   : > { %3192 = dma.hbm_to_vmem [thread:$0]  (!%p3728_p11), %s4621_s4, 64, %s230_s13, [#allocation10]  }
  0x56   : > { %s3814_s19 = sadd.s32 1, %s3628_s26   ;;  %s32_s9 = sadd.s32 1, %s3624_s25 }
  0x57   : > { %s29_s22 = ssub.s32 %s3628_s26, %s3814_s19  ;;  %p39_p8 = scmp.ne.s32.totalorder %s3624_s25, %s3620_s24 }
  0x58   : > { %p30_p4 = scmp.eq.s32.totalorder %s29_s22, 0  ;;  %p40_p13 = scmp.eq.s32.totalorder %s3628_s26, 0 }
  0x59   : > { %p3204_p6 = scmp.lt.s32.totalorder %s3628_s26, 2  ;;  %p4649_p3 = scmp.eq.s32.totalorder %s3698_s5, 1 }
  0x5a   : > { %s3824_s10 = scalar_select %p30_p4, %s3624_s25, %s32_s9  }
  0x5b   : > { %p41_p10 = por %p40_p13, %p39_p8  ;;  %p3828_p5 = por %p4649_p3, %p39_p8 }
  0x5c   : > { %s243_s14 = sand.u32 1, %s3624_s25   ;;  %s2491_s15 = smul.u32 5120, %s3628_s26 }
  0x5d   : > { %s3165_s13 = smul.u32 320, %s243_s14  ;;  %p3834_p11 = pnand %p3204_p6, %p41_p10 }
  0x5e   : > { %s3841_s20 = scalar_lea.hbm %s4617_s0, %s2491_s15  ;;  %s3845_s8 = scalar_lea.sflag [#allocation4], %s243_s14 }
  0x5f   : > { %s247_s21 = scalar_lea.vmem [#allocation3], %s3165_s13  ;;  %s3524_s22 = scalar_lea.hbm %s3841_s20, 5120 }
  0x60   : > { %s255_s11 = sshll.u32 %s247_s21, 4  ;;  %p3525_p7 = scmp.ne.s32.totalorder %s3841_s20, %s3524_s22  ;;  %s3843_s11 = int_to_ptr.vmem [resolvable:$true] %s255_s11 }
  0x61   : > { %p3526_p9 = pneg %p3834_p11  ;;  %s3529_s17 = scalar_lea.hbm %s4617_s0, 10240 }
  0x62   : > { %p3530_p1 = scmp.lt.u32.totalorder %s3841_s20, %s4617_s0  ;;  %p3531_p2 = scmp.lt.u32.totalorder %s3529_s17, %s3524_s22 }
  0x63   : > { %p3527_p12 = pnand %p3526_p9, %p3525_p7  ;;  %p3533_p8 = scmp.lt.u32.totalorder %s3524_s22, %s3841_s20 }
  0x64   : > { %p3532_p4 = por %p3531_p2, %p3530_p1 }
  0x65   : > { %p3528_p0 = pneg %p3527_p12 }
  0x66   : > { %p3534_p13 = por %p3533_p8, %p3532_p4 }
  0x68   : > { %p3535_p6 = pnand %p3534_p13, %p3528_p0 }
  0x6a   : > { %3538 = shalt.err (!%p3535_p6)
}
  0x6b   : > { %s3539_s14 = scalar_lea.vmem %s3843_s11, 5120  ;;  %s3635_s13 = smov [#allocation3]  }
  0x6c   : > { %p3540_p10 = scmp.ne.s32.totalorder %s3843_s11, %s3539_s14  ;;  %s3544_s21 = sshll.u32 %s3635_s13, 4  ;;  %s3545_s21 = int_to_ptr.vmem [resolvable:$false] %s3544_s21 }
  0x6d   : > { %s3546_s27 = scalar_lea.vmem %s3545_s21, 10240  ;;  %p3547_p12 = scmp.lt.s32.totalorder %s3843_s11, %s3545_s21 }
  0x6e   : > { %p3542_p3 = pnand %p3540_p10, %p3526_p9  ;;  %p3548_p1 = scmp.lt.s32.totalorder %s3546_s27, %s3539_s14 }
  0x70   : > { %p3543_p7 = pneg %p3542_p3  ;;  %p3549_p2 = por %p3548_p1, %p3547_p12 }
  0x72   : > { %p3550_p4 = pnand %p3549_p2, %p3543_p7 }
  0x74   : > { %3553 = shalt.err (!%p3550_p4)
}
  0x75   : > { %s4652_s22 = smov 512   ;;  %p4653_p9 = scmp.ne.s32.totalorder %s4646_s30, 0 }
  0x76   : > { %3196 = dma.hbm_to_vmem [thread:$0]  (!%p3834_p11), %s3841_s20, 5120, %s3843_s11, %s3845_s8, %s4652_s22, %s4652_s22, %s3634_s7  }
  0x77   : > { %267 = sbr.rel (%p4653_p9) target bundleno = 667 (0x29b), region = 44 }
  0x7e   : > { %s3879_s9 = sand.u32 1, %s3620_s24   ;;  %p4654_p0 = scmp.ne.s32.totalorder %s4644_s28, 0 }
  0x7f   : > { %s3166_s15 = smul.u32 320, %s3879_s9  ;;  %s270_s17 = scalar_lea.sflag [#allocation4], %s3879_s9 }
  0x81   : > { %s3885_s16 = scalar_lea.vmem [#allocation3], %s3166_s15 }
  0x82   : > { %3599 = dma.done.wait (%p4654_p0), %s270_s17, 5120  }
  0x83   : > { %3601 = vsyncadd (%p4654_p0), %s270_s17, 4294962176  ;;  %p4655_p11 = scmp.eq.s32.totalorder %s3698_s5, 0 }
  0x85   : > { %3603 = dma.done.wait (%p4655_p11), [#allocation7], 65536   ;;  %p4656_p8 = pmov %p4655_p11 }
  0x87   : > { %3605 = vsyncadd (%p4656_p8), [#allocation7], 4294901760  ;;  %p4657_p13 = pmov %p4656_p8 }
  0x88   : > { %p4658_p6 = pmov %p4656_p8 }
  0x89   : > { %3607 = dma.done.wait (%p4657_p13), [#allocation10], 64  }
  0x8a   : > { %3609 = vsyncadd (%p4658_p6), [#allocation10], 4294967232  ;;  %v357_v0 = vld [vmem:[#allocation6 + $0x8] sm:$0xff]  ;;  %v359_v2 = vld [vmem:[#allocation6 + $0x18] sm:$0xff]  ;;  %s1912_s7 = sld [smem:[#allocation2]]  ;;  %s4427_s20 = scalar_lea.vmem [#allocation11], %s3166_s15 }
  0x8b   : > { %v361_v1 = vld [vmem:[#allocation6 + $0x28] sm:$0xff]  ;;  %v363_v4 = vld [vmem:[#allocation6 + $0x38] sm:$0xff]  ;;  %v356_v5 = vld [vmem:[#allocation6] sm:$0xff]  ;;  %s2492_s11 = smul.u32 5120, %s3698_s5  ;;  %s2329_s5 = sshll.u32 %s4427_s20, 4  ;;  %s4570_s5 = int_to_ptr.vmem [resolvable:$true] %s2329_s5 }
  0x8c   : > { %v2493_v3 = vpack.c.bf16 %v361_v1, %v357_v0  ;;  %v360_v6 = vld [vmem:[#allocation6 + $0x20] sm:$0xff]  ;;  %v2621_v7 = vpack.c.bf16 %v363_v4, %v359_v2  ;;  %v358_v9 = vld [vmem:[#allocation6 + $0x10] sm:$0xff]  ;;  %v365_v11 = vld [vmem:[#allocation6 + $0x48] sm:$0xff]  ;;  %s2315_s13 = scalar_lea.sflag [#allocation5], %s3879_s9  ;;  %s3554_s21 = scalar_lea.vmem %s4570_s5, 5120 }
  0x8d   : > { %v2495_v8 = vpack.c.bf16 %v360_v6, %v356_v5  ;;  %v362_v10 = vld [vmem:[#allocation6 + $0x30] sm:$0xff]  ;;  %v369_v13 = vld [vmem:[#allocation6 + $0x68] sm:$0xff]  ;;  %v367_v14 = vld [vmem:[#allocation6 + $0x58] sm:$0xff]  ;;  %s4567_s14 = scalar_lea.hbm %s4623_s6, %s2492_s11  ;;  %p3555_p10 = scmp.ne.s32.totalorder %s4570_s5, %s3554_s21 }
  0x8e   : > { %2494 = vmatprep.subr.bf16.mxu0 %v2493_v3  ;;  %v2623_v12 = vpack.c.bf16 %v362_v10, %v358_v9  ;;  %v371_v15 = vld [vmem:[#allocation6 + $0x78] sm:$0xff]  ;;  %2622 = vmatprep.subr.bf16.mxu1 %v2621_v7  ;;  %v2497_v16 = vpack.c.bf16 %v369_v13, %v365_v11  ;;  %v364_v18 = vld [vmem:[#allocation6 + $0x40] sm:$0xff]  ;;  %v366_v20 = vld [vmem:[#allocation6 + $0x50] sm:$0xff]  ;;  %s3636_s27 = smov [#allocation11]  }
  0x8f   : > { %2496 = vmatpush1.bf16.msra.mxu0 %v2495_v8  ;;  %v2625_v17 = vpack.c.bf16 %v371_v15, %v367_v14  ;;  %v368_v19 = vld [vmem:[#allocation6 + $0x60] sm:$0xff]  ;;  %v370_v22 = vld [vmem:[#allocation6 + $0x70] sm:$0xff]  ;;  %v373_v23 = vld [vmem:[#allocation6 + $0x88] sm:$0xff]  ;;  %p3556_p3 = pnand %p3555_p10, %p3828_p5  ;;  %s3558_s22 = sshll.u32 %s3636_s27, 4  ;;  %s3559_s22 = int_to_ptr.vmem [resolvable:$false] %s3558_s22 }
  0x90   : > { %2624 = vmatpush1.bf16.msra.mxu1 %v2623_v12  ;;  %v2499_v21 = vpack.c.bf16 %v368_v19, %v364_v18  ;;  %v377_v24 = vld [vmem:[#allocation6 + $0xa8] sm:$0xff]  ;;  %2498 = vmatprep.subr.bf16.mxu0 %v2497_v16  ;;  %v2627_v25 = vpack.c.bf16 %v370_v22, %v366_v20  ;;  %v375_v27 = vld [vmem:[#allocation6 + $0x98] sm:$0xff]  ;;  %v372_v29 = vld [vmem:[#allocation6 + $0x80] sm:$0xff]  ;;  %s3560_s15 = scalar_lea.vmem %s3559_s22, 10240  ;;  %p3561_p12 = scmp.lt.s32.totalorder %s4570_s5, %s3559_s22 }
  0x91   : > { %2626 = vmatprep.subr.bf16.mxu1 %v2625_v17  ;;  %v2501_v26 = vpack.c.bf16 %v377_v24, %v373_v23  ;;  %v379_v28 = vld [vmem:[#allocation6 + $0xb8] sm:$0xff]  ;;  %v376_v31 = vld [vmem:[#allocation6 + $0xa0] sm:$0xff]  ;;  %v374_v32 = vld [vmem:[#allocation6 + $0x90] sm:$0xff]  ;;  %p3557_p7 = pneg %p3556_p3  ;;  %p3562_p1 = scmp.lt.s32.totalorder %s3560_s15, %s3554_s21 }
  0x92   : > { %v2629_v30 = vpack.c.bf16 %v379_v28, %v375_v27  ;;  %v378_v33 = vld [vmem:[#allocation6 + $0xb0] sm:$0xff]  ;;  %v2503_v34 = vpack.c.bf16 %v376_v31, %v372_v29  ;;  %v381_v35 = vld [vmem:[#allocation6 + $0xc8] sm:$0xff]  ;;  %v383_v37 = vld [vmem:[#allocation6 + $0xd8] sm:$0xff] }
  0x93   : > { %2500 = vmatpush1.bf16.msra.mxu0 %v2499_v21  ;;  %v385_v36 = vld [vmem:[#allocation6 + $0xe8] sm:$0xff]  ;;  %v2631_v38 = vpack.c.bf16 %v378_v33, %v374_v32  ;;  %v387_v40 = vld [vmem:[#allocation6 + $0xf8] sm:$0xff]  ;;  %v380_v41 = vld [vmem:[#allocation6 + $0xc0] sm:$0xff]  ;;  %p3563_p2 = por %p3562_p1, %p3561_p12 }
  0x94   : > { %2628 = vmatpush1.bf16.msra.mxu1 %v2627_v25  ;;  %2502 = vmatprep.subr.bf16.mxu0 %v2501_v26  ;;  %v2505_v39 = vpack.c.bf16 %v385_v36, %v381_v35  ;;  %v384_v42 = vld [vmem:[#allocation6 + $0xe0] sm:$0xff]  ;;  %v2633_v43 = vpack.c.bf16 %v387_v40, %v383_v37  ;;  %v382_v44 = vld [vmem:[#allocation6 + $0xd0] sm:$0xff]  ;;  %v389_v46 = vld [vmem:[#allocation6 + $0x108] sm:$0xff] }
  0x95   : > { %2630 = vmatprep.subr.bf16.mxu1 %v2629_v30  ;;  %v386_v45 = vld [vmem:[#allocation6 + $0xf0] sm:$0xff]  ;;  %v393_v47 = vld [vmem:[#allocation6 + $0x128] sm:$0xff]  ;;  %v391_v48 = vld [vmem:[#allocation6 + $0x118] sm:$0xff]  ;;  %v2507_v50 = vpack.c.bf16 %v384_v42, %v380_v41  ;;  %p3564_p4 = pnand %p3563_p2, %p3557_p7 }
  0x96   : > { %v395_v49 = vld [vmem:[#allocation6 + $0x138] sm:$0xff]  ;;  %v2635_v51 = vpack.c.bf16 %v386_v45, %v382_v44  ;;  %v2509_v52 = vpack.c.bf16 %v393_v47, %v389_v46  ;;  %v388_v53 = vld [vmem:[#allocation6 + $0x100] sm:$0xff]  ;;  %v390_v55 = vld [vmem:[#allocation6 + $0x110] sm:$0xff] }
  0x97   : > { %2504 = vmatpush1.bf16.msra.mxu0 %v2503_v34  ;;  %v392_v54 = vld [vmem:[#allocation6 + $0x120] sm:$0xff]  ;;  %v2637_v56 = vpack.c.bf16 %v395_v49, %v391_v48  ;;  %v394_v57 = vld [vmem:[#allocation6 + $0x130] sm:$0xff]  ;;  %v397_v58 = vld [vmem:[#allocation6 + $0x148] sm:$0xff] }
  0x98   : > { %2632 = vmatpush1.bf16.msra.mxu1 %v2631_v38  ;;  %2506 = vmatprep.subr.bf16.mxu0 %v2505_v39  ;;  %v401_v59 = vld [vmem:[#allocation6 + $0x168] sm:$0xff]  ;;  %v399_v60 = vld [vmem:[#allocation6 + $0x158] sm:$0xff]  ;;  %v2511_v62 = vpack.c.bf16 %v392_v54, %v388_v53  ;;  %v2639_v63 = vpack.c.bf16 %v394_v57, %v390_v55  ;;  %v396_v1 = vld [vmem:[#allocation6 + $0x140] sm:$0xff] }
  0x99   : > { %2634 = vmatprep.subr.bf16.mxu1 %v2633_v43  ;;  %v403_v61 = vld [vmem:[#allocation6 + $0x178] sm:$0xff]  ;;  %v2513_v0 = vpack.c.bf16 %v401_v59, %v397_v58  ;;  %v400_v2 = vld [vmem:[#allocation6 + $0x160] sm:$0xff]  ;;  %v398_v3 = vld [vmem:[#allocation6 + $0x150] sm:$0xff] }
  0x9a   : > { %v2641_v4 = vpack.c.bf16 %v403_v61, %v399_v60  ;;  %v402_v5 = vld [vmem:[#allocation6 + $0x170] sm:$0xff]  ;;  %v405_v6 = vld [vmem:[#allocation6 + $0x188] sm:$0xff]  ;;  %v407_v8 = vld [vmem:[#allocation6 + $0x198] sm:$0xff]  ;;  %v2515_v10 = vpack.c.bf16 %v400_v2, %v396_v1 }
  0x9b   : > { %2508 = vmatpush1.bf16.msra.mxu0 %v2507_v50  ;;  %v409_v7 = vld [vmem:[#allocation6 + $0x1a8] sm:$0xff]  ;;  %v411_v9 = vld [vmem:[#allocation6 + $0x1b8] sm:$0xff]  ;;  %v2643_v11 = vpack.c.bf16 %v402_v5, %v398_v3  ;;  %v404_v13 = vld [vmem:[#allocation6 + $0x180] sm:$0xff] }
  0x9c   : > { %2636 = vmatpush1.bf16.msra.mxu1 %v2635_v51  ;;  %2510 = vmatprep.subr.bf16.mxu0 %v2509_v52  ;;  %v2517_v12 = vpack.c.bf16 %v409_v7, %v405_v6  ;;  %v408_v14 = vld [vmem:[#allocation6 + $0x1a0] sm:$0xff]  ;;  %v406_v15 = vld [vmem:[#allocation6 + $0x190] sm:$0xff]  ;;  %v2645_v16 = vpack.c.bf16 %v411_v9, %v407_v8  ;;  %v413_v18 = vld [vmem:[#allocation6 + $0x1c8] sm:$0xff] }
  0x9d   : > { %2638 = vmatprep.subr.bf16.mxu1 %v2637_v56  ;;  %v410_v17 = vld [vmem:[#allocation6 + $0x1b0] sm:$0xff]  ;;  %v417_v19 = vld [vmem:[#allocation6 + $0x1e8] sm:$0xff]  ;;  %v415_v20 = vld [vmem:[#allocation6 + $0x1d8] sm:$0xff]  ;;  %v2519_v22 = vpack.c.bf16 %v408_v14, %v404_v13 }
  0x9e   : > { %v419_v21 = vld [vmem:[#allocation6 + $0x1f8] sm:$0xff]  ;;  %v2647_v23 = vpack.c.bf16 %v410_v17, %v406_v15  ;;  %v2521_v24 = vpack.c.bf16 %v417_v19, %v413_v18  ;;  %v412_v25 = vld [vmem:[#allocation6 + $0x1c0] sm:$0xff]  ;;  %v414_v27 = vld [vmem:[#allocation6 + $0x1d0] sm:$0xff] }
  0x9f   : > { %2512 = vmatpush1.bf16.msra.mxu0 %v2511_v62  ;;  %v416_v26 = vld [vmem:[#allocation6 + $0x1e0] sm:$0xff]  ;;  %v2649_v28 = vpack.c.bf16 %v419_v21, %v415_v20  ;;  %v418_v29 = vld [vmem:[#allocation6 + $0x1f0] sm:$0xff]  ;;  %v421_v30 = vld [vmem:[#allocation6 + $0x208] sm:$0xff] }
  0xa0   : > { %2640 = vmatpush1.bf16.msra.mxu1 %v2639_v63  ;;  %2514 = vmatprep.subr.bf16.mxu0 %v2513_v0  ;;  %v425_v31 = vld [vmem:[#allocation6 + $0x228] sm:$0xff]  ;;  %v423_v32 = vld [vmem:[#allocation6 + $0x218] sm:$0xff]  ;;  %v2523_v34 = vpack.c.bf16 %v416_v26, %v412_v25  ;;  %v2651_v35 = vpack.c.bf16 %v418_v29, %v414_v27  ;;  %v420_v37 = vld [vmem:[#allocation6 + $0x200] sm:$0xff] }
  0xa1   : > { %2642 = vmatprep.subr.bf16.mxu1 %v2641_v4  ;;  %v427_v33 = vld [vmem:[#allocation6 + $0x238] sm:$0xff]  ;;  %v2525_v36 = vpack.c.bf16 %v425_v31, %v421_v30  ;;  %v424_v38 = vld [vmem:[#allocation6 + $0x220] sm:$0xff]  ;;  %v422_v39 = vld [vmem:[#allocation6 + $0x210] sm:$0xff] }
  0xa2   : > { %v2653_v40 = vpack.c.bf16 %v427_v33, %v423_v32  ;;  %v426_v41 = vld [vmem:[#allocation6 + $0x230] sm:$0xff]  ;;  %v429_v42 = vld [vmem:[#allocation6 + $0x248] sm:$0xff]  ;;  %v431_v44 = vld [vmem:[#allocation6 + $0x258] sm:$0xff]  ;;  %v2527_v46 = vpack.c.bf16 %v424_v38, %v420_v37 }
  0xa3   : > { %2516 = vmatpush1.bf16.msra.mxu0 %v2515_v10  ;;  %v433_v43 = vld [vmem:[#allocation6 + $0x268] sm:$0xff]  ;;  %v435_v45 = vld [vmem:[#allocation6 + $0x278] sm:$0xff]  ;;  %v2655_v47 = vpack.c.bf16 %v426_v41, %v422_v39  ;;  %v428_v49 = vld [vmem:[#allocation6 + $0x240] sm:$0xff] }
  0xa4   : > { %2644 = vmatpush1.bf16.msra.mxu1 %v2643_v11  ;;  %2518 = vmatprep.subr.bf16.mxu0 %v2517_v12  ;;  %v2529_v48 = vpack.c.bf16 %v433_v43, %v429_v42  ;;  %v432_v50 = vld [vmem:[#allocation6 + $0x260] sm:$0xff]  ;;  %v430_v51 = vld [vmem:[#allocation6 + $0x250] sm:$0xff]  ;;  %v2657_v52 = vpack.c.bf16 %v435_v45, %v431_v44  ;;  %v437_v54 = vld [vmem:[#allocation6 + $0x288] sm:$0xff] }
  0xa5   : > { %2646 = vmatprep.subr.bf16.mxu1 %v2645_v16  ;;  %v434_v53 = vld [vmem:[#allocation6 + $0x270] sm:$0xff]  ;;  %v441_v55 = vld [vmem:[#allocation6 + $0x2a8] sm:$0xff]  ;;  %v439_v56 = vld [vmem:[#allocation6 + $0x298] sm:$0xff]  ;;  %v2531_v58 = vpack.c.bf16 %v432_v50, %v428_v49 }
  0xa6   : > { %v443_v57 = vld [vmem:[#allocation6 + $0x2b8] sm:$0xff]  ;;  %v2659_v59 = vpack.c.bf16 %v434_v53, %v430_v51  ;;  %v2533_v60 = vpack.c.bf16 %v441_v55, %v437_v54  ;;  %v436_v61 = vld [vmem:[#allocation6 + $0x280] sm:$0xff]  ;;  %v438_v63 = vld [vmem:[#allocation6 + $0x290] sm:$0xff] }
  0xa7   : > { %2520 = vmatpush1.bf16.msra.mxu0 %v2519_v22  ;;  %v440_v62 = vld [vmem:[#allocation6 + $0x2a0] sm:$0xff]  ;;  %v2661_v0 = vpack.c.bf16 %v443_v57, %v439_v56  ;;  %v442_v1 = vld [vmem:[#allocation6 + $0x2b0] sm:$0xff]  ;;  %v445_v2 = vld [vmem:[#allocation6 + $0x2c8] sm:$0xff] }
  0xa8   : > { %2648 = vmatpush1.bf16.msra.mxu1 %v2647_v23  ;;  %2522 = vmatprep.subr.bf16.mxu0 %v2521_v24  ;;  %v449_v3 = vld [vmem:[#allocation6 + $0x2e8] sm:$0xff]  ;;  %v447_v4 = vld [vmem:[#allocation6 + $0x2d8] sm:$0xff]  ;;  %v2535_v6 = vpack.c.bf16 %v440_v62, %v436_v61  ;;  %v444_v7 = vld [vmem:[#allocation6 + $0x2c0] sm:$0xff]  ;;  %v2663_v8 = vpack.c.bf16 %v442_v1, %v438_v63 }
  0xa9   : > { %2650 = vmatprep.subr.bf16.mxu1 %v2649_v28  ;;  %v451_v5 = vld [vmem:[#allocation6 + $0x2f8] sm:$0xff]  ;;  %v2537_v9 = vpack.c.bf16 %v449_v3, %v445_v2  ;;  %v448_v10 = vld [vmem:[#allocation6 + $0x2e0] sm:$0xff]  ;;  %v446_v11 = vld [vmem:[#allocation6 + $0x2d0] sm:$0xff] }
  0xaa   : > { %v450_v12 = vld [vmem:[#allocation6 + $0x2f0] sm:$0xff]  ;;  %v2665_v13 = vpack.c.bf16 %v451_v5, %v447_v4  ;;  %v453_v14 = vld [vmem:[#allocation6 + $0x308] sm:$0xff]  ;;  %v455_v17 = vld [vmem:[#allocation6 + $0x318] sm:$0xff]  ;;  %v2539_v19 = vpack.c.bf16 %v448_v10, %v444_v7 }
  0xab   : > { %2524 = vmatpush1.bf16.msra.mxu0 %v2523_v34  ;;  %v457_v15 = vld [vmem:[#allocation6 + $0x328] sm:$0xff]  ;;  %v459_v18 = vld [vmem:[#allocation6 + $0x338] sm:$0xff]  ;;  %v2667_v20 = vpack.c.bf16 %v450_v12, %v446_v11  ;;  %v452_v22 = vld [vmem:[#allocation6 + $0x300] sm:$0xff] }
  0xac   : > { %2652 = vmatpush1.bf16.msra.mxu1 %v2651_v35  ;;  %2526 = vmatprep.subr.bf16.mxu0 %v2525_v36  ;;  %v317_v16 = vld [vmem:[%s3885_s16 + $0x8] sm:$0xff]  ;;  %v2541_v21 = vpack.c.bf16 %v457_v15, %v453_v14  ;;  %v456_v23 = vld [vmem:[#allocation6 + $0x320] sm:$0xff]  ;;  %v454_v24 = vld [vmem:[#allocation6 + $0x310] sm:$0xff]  ;;  %v2669_v25 = vpack.c.bf16 %v459_v18, %v455_v17 }
  0xad   : > { %2654 = vmatprep.subr.bf16.mxu1 %v2653_v40  ;;  %698 = vmatprep.mubr.f32.mxu0 %v317_v16  ;;  %v458_v26 = vld [vmem:[#allocation6 + $0x330] sm:$0xff]  ;;  %v461_v27 = vld [vmem:[#allocation6 + $0x348] sm:$0xff]  ;;  %v463_v29 = vld [vmem:[#allocation6 + $0x358] sm:$0xff]  ;;  %v2543_v31 = vpack.c.bf16 %v456_v23, %v452_v22 }
  0xae   : > { %948 = vmatprep.mubr.f32.mxu1 %v317_v16  ;;  %v465_v28 = vld [vmem:[#allocation6 + $0x368] sm:$0xff]  ;;  %v467_v30 = vld [vmem:[#allocation6 + $0x378] sm:$0xff]  ;;  %v2671_v32 = vpack.c.bf16 %v458_v26, %v454_v24  ;;  %v460_v34 = vld [vmem:[#allocation6 + $0x340] sm:$0xff] }
  0xaf   : > { %2528 = vmatpush1.bf16.msra.mxu0 %v2527_v46  ;;  %v2545_v33 = vpack.c.bf16 %v465_v28, %v461_v27  ;;  %v464_v35 = vld [vmem:[#allocation6 + $0x360] sm:$0xff]  ;;  %v462_v36 = vld [vmem:[#allocation6 + $0x350] sm:$0xff]  ;;  %v2673_v37 = vpack.c.bf16 %v467_v30, %v463_v29  ;;  %v469_v39 = vld [vmem:[#allocation6 + $0x388] sm:$0xff] }
  0xb0   : > { %2656 = vmatpush1.bf16.msra.mxu1 %v2655_v47  ;;  %2530 = vmatprep.subr.bf16.mxu0 %v2529_v48  ;;  %v466_v38 = vld [vmem:[#allocation6 + $0x370] sm:$0xff]  ;;  %v473_v40 = vld [vmem:[#allocation6 + $0x3a8] sm:$0xff]  ;;  %v471_v41 = vld [vmem:[#allocation6 + $0x398] sm:$0xff]  ;;  %v2547_v43 = vpack.c.bf16 %v464_v35, %v460_v34 }
  0xb1   : > { %2658 = vmatprep.subr.bf16.mxu1 %v2657_v52  ;;  %v475_v42 = vld [vmem:[#allocation6 + $0x3b8] sm:$0xff]  ;;  %v2675_v44 = vpack.c.bf16 %v466_v38, %v462_v36  ;;  %v2549_v45 = vpack.c.bf16 %v473_v40, %v469_v39  ;;  %v468_v46 = vld [vmem:[#allocation6 + $0x380] sm:$0xff]  ;;  %v470_v48 = vld [vmem:[#allocation6 + $0x390] sm:$0xff] }
  0xb2   : > { %v472_v47 = vld [vmem:[#allocation6 + $0x3a0] sm:$0xff]  ;;  %v2677_v49 = vpack.c.bf16 %v475_v42, %v471_v41  ;;  %v474_v50 = vld [vmem:[#allocation6 + $0x3b0] sm:$0xff]  ;;  %v477_v51 = vld [vmem:[#allocation6 + $0x3c8] sm:$0xff] }
  0xb3   : > { %2532 = vmatpush1.bf16.msra.mxu0 %v2531_v58  ;;  %v481_v52 = vld [vmem:[#allocation6 + $0x3e8] sm:$0xff]  ;;  %v479_v53 = vld [vmem:[#allocation6 + $0x3d8] sm:$0xff]  ;;  %v2551_v55 = vpack.c.bf16 %v472_v47, %v468_v46  ;;  %v2679_v56 = vpack.c.bf16 %v474_v50, %v470_v48  ;;  %v476_v58 = vld [vmem:[#allocation6 + $0x3c0] sm:$0xff] }
  0xb4   : > { %2660 = vmatpush1.bf16.msra.mxu1 %v2659_v59  ;;  %2534 = vmatprep.subr.bf16.mxu0 %v2533_v60  ;;  %v483_v54 = vld [vmem:[#allocation6 + $0x3f8] sm:$0xff]  ;;  %v2553_v57 = vpack.c.bf16 %v481_v52, %v477_v51  ;;  %v480_v59 = vld [vmem:[#allocation6 + $0x3e0] sm:$0xff]  ;;  %v478_v60 = vld [vmem:[#allocation6 + $0x3d0] sm:$0xff] }
  0xb5   : > { %2662 = vmatprep.subr.bf16.mxu1 %v2661_v0  ;;  %v2681_v61 = vpack.c.bf16 %v483_v54, %v479_v53  ;;  %v482_v62 = vld [vmem:[#allocation6 + $0x3f0] sm:$0xff]  ;;  %v485_v63 = vld [vmem:[#allocation6 + $0x408] sm:$0xff]  ;;  %v487_v1 = vld [vmem:[#allocation6 + $0x418] sm:$0xff]  ;;  %v2555_v3 = vpack.c.bf16 %v480_v59, %v476_v58 }
  0xb6   : > { %v489_v0 = vld [vmem:[#allocation6 + $0x428] sm:$0xff]  ;;  %v491_v2 = vld [vmem:[#allocation6 + $0x438] sm:$0xff]  ;;  %v2683_v4 = vpack.c.bf16 %v482_v62, %v478_v60  ;;  %v488_v7 = vld [vmem:[#allocation6 + $0x420] sm:$0xff] }
  0xb7   : > { %2536 = vmatpush1.bf16.msra.mxu0 %v2535_v6  ;;  %v2557_v5 = vpack.c.bf16 %v489_v0, %v485_v63  ;;  %v484_v6 = vld [vmem:[#allocation6 + $0x400] sm:$0xff]  ;;  %v490_v10 = vld [vmem:[#allocation6 + $0x430] sm:$0xff]  ;;  %v493_v11 = vld [vmem:[#allocation6 + $0x448] sm:$0xff] }
  0xb8   : > { %2664 = vmatpush1.bf16.msra.mxu1 %v2663_v8  ;;  %2538 = vmatprep.subr.bf16.mxu0 %v2537_v9  ;;  %v486_v8 = vld [vmem:[#allocation6 + $0x410] sm:$0xff]  ;;  %v2685_v9 = vpack.c.bf16 %v491_v2, %v487_v1  ;;  %v497_v12 = vld [vmem:[#allocation6 + $0x468] sm:$0xff]  ;;  %v499_v14 = vld [vmem:[#allocation6 + $0x478] sm:$0xff]  ;;  %v2559_v16 = vpack.c.bf16 %v488_v7, %v484_v6 }
  0xb9   : > { %2666 = vmatprep.subr.bf16.mxu1 %v2665_v13  ;;  %v495_v13 = vld [vmem:[#allocation6 + $0x458] sm:$0xff]  ;;  %v316_v15 = vld [vmem:[%s3885_s16] sm:$0xff]  ;;  %v2687_v17 = vpack.c.bf16 %v490_v10, %v486_v8  ;;  %v2561_v18 = vpack.c.bf16 %v497_v12, %v493_v11  ;;  %v498_v23 = vld [vmem:[#allocation6 + $0x470] sm:$0xff] }
  0xba   : > { %v2689_v22 = vpack.c.bf16 %v499_v14, %v495_v13  ;;  %v501_v24 = vld [vmem:[#allocation6 + $0x488] sm:$0xff]  ;;  %v503_v26 = vld [vmem:[#allocation6 + $0x498] sm:$0xff]  ;;  %v320_v30 = vld [vmem:[%s3885_s16 + $0x20] sm:$0xff] }
  0xbb   : > { %2540 = vmatpush1.bf16.msra.mxu0 %v2539_v19  ;;  %v492_v19 = vld [vmem:[#allocation6 + $0x440] sm:$0xff]  ;;  %v507_v27 = vld [vmem:[#allocation6 + $0x4b8] sm:$0xff]  ;;  %v321_v28 = vld [vmem:[%s3885_s16 + $0x28] sm:$0xff] }
  0xbc   : > { %2668 = vmatpush1.bf16.msra.mxu1 %v2667_v20  ;;  %2542 = vmatprep.subr.bf16.mxu0 %v2541_v21  ;;  %v496_v20 = vld [vmem:[#allocation6 + $0x460] sm:$0xff]  ;;  %v494_v21 = vld [vmem:[#allocation6 + $0x450] sm:$0xff]  ;;  %v2693_v36 = vpack.c.bf16 %v507_v27, %v503_v26  ;;  %v509_v38 = vld [vmem:[#allocation6 + $0x4c8] sm:$0xff] }
  0xbd   : > { %2670 = vmatprep.subr.bf16.mxu1 %v2669_v25  ;;  %v505_v25 = vld [vmem:[#allocation6 + $0x4a8] sm:$0xff]  ;;  %v2563_v29 = vpack.c.bf16 %v496_v20, %v492_v19  ;;  %v504_v34 = vld [vmem:[#allocation6 + $0x4a0] sm:$0xff]  ;;  %v502_v35 = vld [vmem:[#allocation6 + $0x490] sm:$0xff] }
  0xbe   : > { %v513_v39 = vld [vmem:[#allocation6 + $0x4e8] sm:$0xff]  ;;  %v511_v40 = vld [vmem:[#allocation6 + $0x4d8] sm:$0xff]  ;;  %v508_v47 = vld [vmem:[#allocation6 + $0x4c0] sm:$0xff] }
  0xbf   : > { %2544 = vmatpush1.bf16.msra.mxu0 %v2543_v31  ;;  %v2691_v31 = vpack.c.bf16 %v498_v23, %v494_v21  ;;  %v515_v41 = vld [vmem:[#allocation6 + $0x4f8] sm:$0xff]  ;;  %v325_v42 = vld [vmem:[%s3885_s16 + $0x48] sm:$0xff]  ;;  %v2569_v46 = vpack.c.bf16 %v513_v39, %v509_v38  ;;  %v512_v48 = vld [vmem:[#allocation6 + $0x4e0] sm:$0xff] }
  0xc0   : > { %2672 = vmatpush1.bf16.msra.mxu1 %v2671_v32  ;;  %2546 = vmatprep.subr.bf16.mxu0 %v2545_v33  ;;  %v2565_v32 = vpack.c.bf16 %v505_v25, %v501_v24  ;;  %v500_v33 = vld [vmem:[#allocation6 + $0x480] sm:$0xff]  ;;  %v2697_v50 = vpack.c.bf16 %v515_v41, %v511_v40  ;;  %v514_v51 = vld [vmem:[#allocation6 + $0x4f0] sm:$0xff]  ;;  %v517_v52 = vld [vmem:[#allocation6 + $0x508] sm:$0xff] }
  0xc1   : > { %2674 = vmatprep.subr.bf16.mxu1 %v2673_v37  ;;  %v506_v37 = vld [vmem:[#allocation6 + $0x4b0] sm:$0xff]  ;;  %v521_v53 = vld [vmem:[#allocation6 + $0x528] sm:$0xff]  ;;  %v519_v54 = vld [vmem:[#allocation6 + $0x518] sm:$0xff] }
  0xc2   : > { %v328_v58 = vld [vmem:[%s3885_s16 + $0x60] sm:$0xff]  ;;  %v2573_v60 = vpack.c.bf16 %v521_v53, %v517_v52  ;;  %v518_v63 = vld [vmem:[#allocation6 + $0x510] sm:$0xff]  ;;  %v525_v2 = vld [vmem:[#allocation6 + $0x548] sm:$0xff] }
  0xc3   : > { %2548 = vmatpush1.bf16.msra.mxu0 %v2547_v43  ;;  %v2567_v43 = vpack.c.bf16 %v504_v34, %v500_v33  ;;  %v520_v62 = vld [vmem:[#allocation6 + $0x520] sm:$0xff]  ;;  %v522_v1 = vld [vmem:[#allocation6 + $0x530] sm:$0xff]  ;;  %v333_v6 = vld [vmem:[%s3885_s16 + $0x88] sm:$0xff] }
  0xc4   : > { %2676 = vmatpush1.bf16.msra.mxu1 %v2675_v44  ;;  %2550 = vmatprep.subr.bf16.mxu0 %v2549_v45  ;;  %v324_v44 = vld [vmem:[%s3885_s16 + $0x40] sm:$0xff]  ;;  %v2695_v45 = vpack.c.bf16 %v506_v37, %v502_v35  ;;  %v526_v13 = vld [vmem:[#allocation6 + $0x550] sm:$0xff]  ;;  %v539_v19 = vld [vmem:[#allocation6 + $0x5b8] sm:$0xff] }
  0xc5   : > { %2678 = vmatprep.subr.bf16.mxu1 %v2677_v49  ;;  %v510_v49 = vld [vmem:[#allocation6 + $0x4d0] sm:$0xff]  ;;  %v332_v8 = vld [vmem:[%s3885_s16 + $0x80] sm:$0xff]  ;;  %v337_v20 = vld [vmem:[%s3885_s16 + $0xa8] sm:$0xff] }
  0xc6   : > { %v2699_v59 = vpack.c.bf16 %v514_v51, %v510_v49  ;;  %v524_v11 = vld [vmem:[#allocation6 + $0x540] sm:$0xff]  ;;  %v534_v27 = vld [vmem:[#allocation6 + $0x590] sm:$0xff]  ;;  %v547_v33 = vld [vmem:[#allocation6 + $0x5f8] sm:$0xff] }
  0xc7   : > { %2552 = vmatpush1.bf16.msra.mxu0 %v2551_v55  ;;  %v523_v55 = vld [vmem:[#allocation6 + $0x538] sm:$0xff]  ;;  %v528_v12 = vld [vmem:[#allocation6 + $0x560] sm:$0xff]  ;;  %v341_v34 = vld [vmem:[%s3885_s16 + $0xc8] sm:$0xff] }
  0xc8   : > { %2680 = vmatpush1.bf16.msra.mxu1 %v2679_v56  ;;  %2554 = vmatprep.subr.bf16.mxu0 %v2553_v57  ;;  %v329_v56 = vld [vmem:[%s3885_s16 + $0x68] sm:$0xff]  ;;  %v2571_v57 = vpack.c.bf16 %v512_v48, %v508_v47  ;;  %v2701_v0 = vpack.c.bf16 %v523_v55, %v519_v54  ;;  %v2579_v21 = vpack.c.bf16 %v528_v12, %v524_v11  ;;  %v532_v25 = vld [vmem:[#allocation6 + $0x580] sm:$0xff]  ;;  %v542_v41 = vld [vmem:[#allocation6 + $0x5d0] sm:$0xff] }
  0xc9   : > { %2682 = vmatprep.subr.bf16.mxu1 %v2681_v61  ;;  %v516_v61 = vld [vmem:[#allocation6 + $0x500] sm:$0xff]  ;;  %v555_v47 = vld [vmem:[#allocation6 + $0x638] sm:$0xff]  ;;  %v345_v48 = vld [vmem:[%s3885_s16 + $0xe8] sm:$0xff] }
  0xca   : > { %v2575_v7 = vpack.c.bf16 %v520_v62, %v516_v61  ;;  %v536_v26 = vld [vmem:[#allocation6 + $0x5a0] sm:$0xff]  ;;  %v550_v55 = vld [vmem:[#allocation6 + $0x610] sm:$0xff]  ;;  %v563_v61 = vld [vmem:[#allocation6 + $0x678] sm:$0xff] }
  0xcb   : > { %2556 = vmatpush1.bf16.msra.mxu0 %v2555_v3  ;;  %v529_v3 = vld [vmem:[#allocation6 + $0x568] sm:$0xff]  ;;  %v2583_v35 = vpack.c.bf16 %v536_v26, %v532_v25  ;;  %v540_v39 = vld [vmem:[#allocation6 + $0x5c0] sm:$0xff]  ;;  %v571_v11 = vld [vmem:[#allocation6 + $0x6b8] sm:$0xff] }
  0xcc   : > { %2684 = vmatpush1.bf16.msra.mxu1 %v2683_v4  ;;  %2558 = vmatprep.subr.bf16.mxu0 %v2557_v5  ;;  %v527_v4 = vld [vmem:[#allocation6 + $0x558] sm:$0xff]  ;;  %v2577_v10 = vpack.c.bf16 %v529_v3, %v525_v2  ;;  %v544_v40 = vld [vmem:[#allocation6 + $0x5e0] sm:$0xff]  ;;  %v349_v62 = vld [vmem:[%s3885_s16 + $0x108] sm:$0xff] }
  0xcd   : > { %2686 = vmatprep.subr.bf16.mxu1 %v2685_v9  ;;  %v531_v5 = vld [vmem:[#allocation6 + $0x578] sm:$0xff]  ;;  %v2703_v9 = vpack.c.bf16 %v522_v1, %v518_v63  ;;  %v2587_v49 = vpack.c.bf16 %v544_v40, %v540_v39  ;;  %v548_v53 = vld [vmem:[#allocation6 + $0x600] sm:$0xff]  ;;  %v353_v12 = vld [vmem:[%s3885_s16 + $0x128] sm:$0xff] }
  0xce   : > { %699 = vmatmul.mubr.f32.vlgmr.msra.gmra.mrb[0].mxu0 %v316_v15  ;;  %v2705_v14 = vpack.c.bf16 %v531_v5, %v527_v4  ;;  %v552_v54 = vld [vmem:[#allocation6 + $0x620] sm:$0xff]  ;;  %v558_v5 = vld [vmem:[#allocation6 + $0x650] sm:$0xff]  ;;  %v579_v25 = vld [vmem:[#allocation6 + $0x6f8] sm:$0xff] }
  0xcf   : > { %2560 = vmatpush1.bf16.msra.mxu0 %v2559_v16  ;;  %949 = vmatmul.mubr.f32.vlgmr.msra.gmra.mrb[0].mxu1 %v316_v15  ;;  %v530_v15 = vld [vmem:[#allocation6 + $0x570] sm:$0xff]  ;;  %v533_v16 = vld [vmem:[#allocation6 + $0x588] sm:$0xff]  ;;  %v2591_v63 = vpack.c.bf16 %v552_v54, %v548_v53  ;;  %v556_v3 = vld [vmem:[#allocation6 + $0x640] sm:$0xff] }
  0xd0   : > { %2688 = vmatpush1.bf16.msra.mxu1 %v2687_v17  ;;  %2562 = vmatprep.subr.bf16.mxu0 %v2561_v18  ;;  %v537_v17 = vld [vmem:[#allocation6 + $0x5a8] sm:$0xff]  ;;  %v535_v18 = vld [vmem:[#allocation6 + $0x598] sm:$0xff]  ;;  %v2707_v23 = vpack.c.bf16 %v530_v15, %v526_v13  ;;  %v560_v4 = vld [vmem:[#allocation6 + $0x660] sm:$0xff] }
  0xd1   : > { %2690 = vmatprep.subr.bf16.mxu1 %v2689_v22  ;;  %704 = vmatprep.mubr.f32.mxu0 %v321_v28  ;;  %v336_v22 = vld [vmem:[%s3885_s16 + $0xa0] sm:$0xff]  ;;  %v2581_v24 = vpack.c.bf16 %v537_v17, %v533_v16  ;;  %v2595_v13 = vpack.c.bf16 %v560_v4, %v556_v3  ;;  %v319_v26 = vld [vmem:[%s3885_s16 + $0x18] sm:$0xff]  ;;  %v598_v4 = vld [vmem:[#allocation6 + $0x790] sm:$0xff] }
  0xd2   : > { %954 = vmatprep.mubr.f32.mxu1 %v321_v28  ;;  %705 = vmatmul.mubr.f32.gmra.mrb[2].mxu0 %v320_v30  ;;  %v2709_v28 = vpack.c.bf16 %v539_v19, %v535_v18  ;;  %v564_v17 = vld [vmem:[#allocation6 + $0x680] sm:$0xff]  ;;  %v566_v19 = vld [vmem:[#allocation6 + $0x690] sm:$0xff] }
  0xd3   : > { %2564 = vmatpush1.bf16.msra.mxu0 %v2563_v29  ;;  %955 = vmatmul.mubr.f32.gmra.mrb[2].mxu1 %v320_v30  ;;  %v538_v29 = vld [vmem:[#allocation6 + $0x5b0] sm:$0xff]  ;;  %v541_v30 = vld [vmem:[#allocation6 + $0x5c8] sm:$0xff]  ;;  %v568_v18 = vld [vmem:[#allocation6 + $0x6a0] sm:$0xff] }
  0xd4   : > { %2692 = vmatpush1.bf16.msra.mxu1 %v2691_v31  ;;  %2566 = vmatprep.subr.bf16.mxu0 %v2565_v32  ;;  %v545_v31 = vld [vmem:[#allocation6 + $0x5e8] sm:$0xff]  ;;  %v543_v32 = vld [vmem:[#allocation6 + $0x5d8] sm:$0xff]  ;;  %v2711_v37 = vpack.c.bf16 %v538_v29, %v534_v27  ;;  %v2599_v27 = vpack.c.bf16 %v568_v18, %v564_v17  ;;  %v588_v54 = vld [vmem:[#allocation6 + $0x740] sm:$0xff] }
  0xd5   : > { %2694 = vmatprep.subr.bf16.mxu1 %v2693_v36  ;;  %710 = vmatprep.mubr.f32.mxu0 %v325_v42  ;;  %v340_v36 = vld [vmem:[%s3885_s16 + $0xc0] sm:$0xff]  ;;  %v2585_v38 = vpack.c.bf16 %v545_v31, %v541_v30  ;;  %v610_v18 = vld [vmem:[#allocation6 + $0x7f0] sm:$0xff] }
  0xd6   : > { %960 = vmatprep.mubr.f32.mxu1 %v325_v42  ;;  %711 = vmatmul.mubr.f32.gmra.mrb[4].mxu0 %v324_v44  ;;  %v2713_v42 = vpack.c.bf16 %v547_v33, %v543_v32  ;;  %v572_v30 = vld [vmem:[#allocation6 + $0x6c0] sm:$0xff]  ;;  %v574_v32 = vld [vmem:[#allocation6 + $0x6d0] sm:$0xff] }
  0xd7   : > { %2568 = vmatpush1.bf16.msra.mxu0 %v2567_v43  ;;  %961 = vmatmul.mubr.f32.gmra.mrb[4].mxu1 %v324_v44  ;;  %v546_v43 = vld [vmem:[#allocation6 + $0x5f0] sm:$0xff]  ;;  %v549_v44 = vld [vmem:[#allocation6 + $0x608] sm:$0xff]  ;;  %v576_v31 = vld [vmem:[#allocation6 + $0x6e0] sm:$0xff] }
  0xd8   : > { %2696 = vmatpush1.bf16.msra.mxu1 %v2695_v45  ;;  %2570 = vmatprep.subr.bf16.mxu0 %v2569_v46  ;;  %v553_v45 = vld [vmem:[#allocation6 + $0x628] sm:$0xff]  ;;  %v551_v46 = vld [vmem:[#allocation6 + $0x618] sm:$0xff]  ;;  %v2715_v51 = vpack.c.bf16 %v546_v43, %v542_v41  ;;  %v2603_v39 = vpack.c.bf16 %v576_v31, %v572_v30  ;;  %v584_v43 = vld [vmem:[#allocation6 + $0x720] sm:$0xff] }
  0xd9   : > { %2698 = vmatprep.subr.bf16.mxu1 %v2697_v50  ;;  %716 = vmatprep.mubr.f32.mxu0 %v329_v56  ;;  %v344_v50 = vld [vmem:[%s3885_s16 + $0xe0] sm:$0xff]  ;;  %v2589_v52 = vpack.c.bf16 %v553_v45, %v549_v44  ;;  %v582_v44 = vld [vmem:[#allocation6 + $0x710] sm:$0xff]  ;;  %v1143_v31 = vld [vmem:[#allocation8 + $0x48] sm:$0xff] }
  0xda   : > { %966 = vmatprep.mubr.f32.mxu1 %v329_v56  ;;  %717 = vmatmul.mubr.f32.gmra.mrb[6].mxu0 %v328_v58  ;;  %v2717_v56 = vpack.c.bf16 %v555_v47, %v551_v46  ;;  %v586_v46 = vld [vmem:[#allocation6 + $0x730] sm:$0xff]  ;;  %v589_v47 = vld [vmem:[#allocation6 + $0x748] sm:$0xff]  ;;  %v600_v3 = vld [vmem:[#allocation6 + $0x7a0] sm:$0xff] }
  0xdb   : > { %2572 = vmatpush1.bf16.msra.mxu0 %v2571_v57  ;;  %967 = vmatmul.mubr.f32.gmra.mrb[6].mxu1 %v328_v58  ;;  %v554_v57 = vld [vmem:[#allocation6 + $0x630] sm:$0xff]  ;;  %v557_v58 = vld [vmem:[#allocation6 + $0x648] sm:$0xff] }
  0xdc   : > { %2700 = vmatpush1.bf16.msra.mxu1 %v2699_v59  ;;  %2574 = vmatprep.subr.bf16.mxu0 %v2573_v60  ;;  %v561_v59 = vld [vmem:[#allocation6 + $0x668] sm:$0xff]  ;;  %v559_v60 = vld [vmem:[#allocation6 + $0x658] sm:$0xff]  ;;  %v2719_v1 = vpack.c.bf16 %v554_v57, %v550_v55  ;;  %v592_v55 = vld [vmem:[#allocation6 + $0x760] sm:$0xff] }
  0xdd   : > { %2702 = vmatprep.subr.bf16.mxu1 %v2701_v0  ;;  %722 = vmatprep.mubr.f32.mxu0 %v333_v6  ;;  %v348_v0 = vld [vmem:[%s3885_s16 + $0x100] sm:$0xff]  ;;  %v2593_v2 = vpack.c.bf16 %v561_v59, %v557_v58  ;;  %v594_v58 = vld [vmem:[#allocation6 + $0x770] sm:$0xff]  ;;  %v597_v59 = vld [vmem:[#allocation6 + $0x788] sm:$0xff] }
  0xde   : > { %972 = vmatprep.mubr.f32.mxu1 %v333_v6  ;;  %723 = vmatmul.mubr.f32.gmra.mrb[8].mxu0 %v332_v8  ;;  %v2721_v6 = vpack.c.bf16 %v563_v61, %v559_v60  ;;  %v601_v60 = vld [vmem:[#allocation6 + $0x7a8] sm:$0xff]  ;;  %v599_v61 = vld [vmem:[#allocation6 + $0x798] sm:$0xff]  ;;  %v1140_v30 = vld [vmem:[#allocation8 + $0x30] sm:$0xff] }
  0xdf   : > { %2576 = vmatpush1.bf16.msra.mxu0 %v2575_v7  ;;  %973 = vmatmul.mubr.f32.gmra.mrb[8].mxu1 %v332_v8  ;;  %v562_v7 = vld [vmem:[#allocation6 + $0x670] sm:$0xff]  ;;  %v565_v8 = vld [vmem:[#allocation6 + $0x688] sm:$0xff] }
  0xe0   : > { %2704 = vmatpush1.bf16.msra.mxu1 %v2703_v9  ;;  %2578 = vmatprep.subr.bf16.mxu0 %v2577_v10  ;;  %v569_v9 = vld [vmem:[#allocation6 + $0x6a8] sm:$0xff]  ;;  %v567_v10 = vld [vmem:[#allocation6 + $0x698] sm:$0xff]  ;;  %v2723_v15 = vpack.c.bf16 %v562_v7, %v558_v5 }
  0xe1   : > { %2706 = vmatprep.subr.bf16.mxu1 %v2705_v14  ;;  %728 = vmatprep.mubr.f32.mxu0 %v337_v20  ;;  %v352_v14 = vld [vmem:[%s3885_s16 + $0x120] sm:$0xff]  ;;  %v2597_v16 = vpack.c.bf16 %v569_v9, %v565_v8  ;;  %v605_v7 = vld [vmem:[#allocation6 + $0x7c8] sm:$0xff]  ;;  %v607_v9 = vld [vmem:[#allocation6 + $0x7d8] sm:$0xff] }
  0xe2   : > { %978 = vmatprep.mubr.f32.mxu1 %v337_v20  ;;  %729 = vmatmul.mubr.f32.gmra.mrb[10].mxu0 %v336_v22  ;;  %v2725_v20 = vpack.c.bf16 %v571_v11, %v567_v10  ;;  %v609_v8 = vld [vmem:[#allocation6 + $0x7e8] sm:$0xff]  ;;  %v611_v10 = vld [vmem:[#allocation6 + $0x7f8] sm:$0xff] }
  0xe3   : > { %2580 = vmatpush1.bf16.msra.mxu0 %v2579_v21  ;;  %979 = vmatmul.mubr.f32.gmra.mrb[10].mxu1 %v336_v22  ;;  %v570_v21 = vld [vmem:[#allocation6 + $0x6b0] sm:$0xff]  ;;  %v573_v22 = vld [vmem:[#allocation6 + $0x6c8] sm:$0xff]  ;;  %v2745_v17 = vpack.c.bf16 %v611_v10, %v607_v9 }
  0xe4   : > { %2708 = vmatpush1.bf16.msra.mxu1 %v2707_v23  ;;  %2582 = vmatprep.subr.bf16.mxu0 %v2581_v24  ;;  %v577_v23 = vld [vmem:[#allocation6 + $0x6e8] sm:$0xff]  ;;  %v575_v24 = vld [vmem:[#allocation6 + $0x6d8] sm:$0xff] }
  0xe5   : > { %2710 = vmatprep.subr.bf16.mxu1 %v2709_v28  ;;  %734 = vmatprep.mubr.f32.mxu0 %v341_v34  ;;  %v2727_v28 = vpack.c.bf16 %v570_v21, %v566_v19  ;;  %v2601_v29 = vpack.c.bf16 %v577_v23, %v573_v22  ;;  %v2729_v33 = vpack.c.bf16 %v579_v25, %v575_v24  ;;  %v1135_v19 = vld [vmem:[#allocation8 + $0x8] sm:$0xff]  ;;  %v1137_v21 = vld [vmem:[#allocation8 + $0x18] sm:$0xff] }
  0xe6   : > { %984 = vmatprep.mubr.f32.mxu1 %v341_v34  ;;  %735 = vmatmul.mubr.f32.gmra.mrb[12].mxu0 %v340_v36  ;;  %v578_v34 = vld [vmem:[#allocation6 + $0x6f0] sm:$0xff]  ;;  %v1141_v22 = vld [vmem:[#allocation8 + $0x38] sm:$0xff]  ;;  %v1167_v9 = vld [vmem:[#allocation8 + $0x108] sm:$0xff] }
  0xe7   : > { %2584 = vmatpush1.bf16.msra.mxu0 %v2583_v35  ;;  %985 = vmatmul.mubr.f32.gmra.mrb[12].mxu1 %v340_v36  ;;  %v581_v35 = vld [vmem:[#allocation6 + $0x708] sm:$0xff]  ;;  %v2731_v40 = vpack.c.bf16 %v578_v34, %v574_v32 }
  0xe8   : > { %2712 = vmatpush1.bf16.msra.mxu1 %v2711_v37  ;;  %2586 = vmatprep.subr.bf16.mxu0 %v2585_v38  ;;  %v585_v36 = vld [vmem:[#allocation6 + $0x728] sm:$0xff]  ;;  %v583_v37 = vld [vmem:[#allocation6 + $0x718] sm:$0xff] }
  0xe9   : > { %2714 = vmatprep.subr.bf16.mxu1 %v2713_v42  ;;  %740 = vmatprep.mubr.f32.mxu0 %v345_v48  ;;  %v587_v38 = vld [vmem:[#allocation6 + $0x738] sm:$0xff]  ;;  %v2605_v41 = vpack.c.bf16 %v585_v36, %v581_v35  ;;  %v580_v42 = vld [vmem:[#allocation6 + $0x700] sm:$0xff]  ;;  %v1147_v32 = vld [vmem:[#allocation8 + $0x68] sm:$0xff] }
  0xea   : > { %990 = vmatprep.mubr.f32.mxu1 %v345_v48  ;;  %741 = vmatmul.mubr.f32.gmra.mrb[14].mxu0 %v344_v50  ;;  %v2733_v45 = vpack.c.bf16 %v587_v38, %v583_v37  ;;  %v593_v48 = vld [vmem:[#allocation6 + $0x768] sm:$0xff]  ;;  %v1145_v35 = vld [vmem:[#allocation8 + $0x58] sm:$0xff]  ;;  %v1142_v38 = vld [vmem:[#allocation8 + $0x40] sm:$0xff] }
  0xeb   : > { %2588 = vmatpush1.bf16.msra.mxu0 %v2587_v49  ;;  %991 = vmatmul.mubr.f32.gmra.mrb[14].mxu1 %v344_v50  ;;  %v591_v49 = vld [vmem:[#allocation6 + $0x758] sm:$0xff]  ;;  %v2609_v53 = vpack.c.bf16 %v593_v48, %v589_v47  ;;  %v322_v47 = vld [vmem:[%s3885_s16 + $0x30] sm:$0xff]  ;;  %v1171_v10 = vld [vmem:[#allocation8 + $0x128] sm:$0xff] }
  0xec   : > { %2716 = vmatpush1.bf16.msra.mxu1 %v2715_v51  ;;  %2590 = vmatprep.subr.bf16.mxu0 %v2589_v52  ;;  %v595_v50 = vld [vmem:[#allocation6 + $0x778] sm:$0xff]  ;;  %v2607_v51 = vpack.c.bf16 %v584_v43, %v580_v42  ;;  %v2735_v52 = vpack.c.bf16 %v586_v46, %v582_v44  ;;  %v1144_v42 = vld [vmem:[#allocation8 + $0x50] sm:$0xff]  ;;  %v1155_v46 = vld [vmem:[#allocation8 + $0xa8] sm:$0xff] }
  0xed   : > { %2718 = vmatprep.subr.bf16.mxu1 %v2717_v56  ;;  %746 = vmatprep.mubr.f32.mxu0 %v349_v62  ;;  %v590_v56 = vld [vmem:[#allocation6 + $0x750] sm:$0xff]  ;;  %v2737_v57 = vpack.c.bf16 %v595_v50, %v591_v49  ;;  %v1149_v36 = vld [vmem:[#allocation8 + $0x78] sm:$0xff] }
  0xee   : > { %996 = vmatprep.mubr.f32.mxu1 %v349_v62  ;;  %747 = vmatmul.mubr.f32.gmra.mrb[16].mxu0 %v348_v0  ;;  %v603_v62 = vld [vmem:[#allocation6 + $0x7b8] sm:$0xff]  ;;  %v1148_v43 = vld [vmem:[#allocation8 + $0x70] sm:$0xff]  ;;  %v2881_v44 = vpack.c.bf16 %v1149_v36, %v1145_v35 }
  0xef   : > { %2592 = vmatpush1.bf16.msra.mxu0 %v2591_v63  ;;  %997 = vmatmul.mubr.f32.gmra.mrb[16].mxu1 %v348_v0  ;;  %v2611_v63 = vpack.c.bf16 %v592_v55, %v588_v54  ;;  %v2739_v0 = vpack.c.bf16 %v594_v58, %v590_v56  ;;  %v2741_v5 = vpack.c.bf16 %v603_v62, %v599_v61  ;;  %v1153_v49 = vld [vmem:[#allocation8 + $0x98] sm:$0xff]  ;;  %v1152_v56 = vld [vmem:[#allocation8 + $0x90] sm:$0xff] }
  0xf0   : > { %2720 = vmatpush1.bf16.msra.mxu1 %v2719_v1  ;;  %2594 = vmatprep.subr.bf16.mxu0 %v2593_v2  ;;  %v2613_v1 = vpack.c.bf16 %v601_v60, %v597_v59  ;;  %v596_v2 = vld [vmem:[#allocation6 + $0x780] sm:$0xff]  ;;  %v1157_v50 = vld [vmem:[#allocation8 + $0xb8] sm:$0xff]  ;;  %v1159_v59 = vld [vmem:[#allocation8 + $0xc8] sm:$0xff] }
  0xf1   : > { %2722 = vmatprep.subr.bf16.mxu1 %v2721_v6  ;;  %752 = vmatprep.mubr.f32.mxu0 %v353_v12  ;;  %v602_v6 = vld [vmem:[#allocation6 + $0x7b0] sm:$0xff]  ;;  %v2615_v11 = vpack.c.bf16 %v600_v3, %v596_v2  ;;  %v327_v54 = vld [vmem:[%s3885_s16 + $0x58] sm:$0xff]  ;;  %v2885_v58 = vpack.c.bf16 %v1157_v50, %v1153_v49  ;;  %v1163_v60 = vld [vmem:[#allocation8 + $0xe8] sm:$0xff] }
  0xf2   : > { %1002 = vmatprep.mubr.f32.mxu1 %v353_v12  ;;  %753 = vmatmul.mubr.f32.gmra.mrb[18].mxu0 %v352_v14  ;;  %v2743_v12 = vpack.c.bf16 %v602_v6, %v598_v4  ;;  %v326_v61 = vld [vmem:[%s3885_s16 + $0x50] sm:$0xff]  ;;  %v1158_v2 = vld [vmem:[#allocation8 + $0xc0] sm:$0xff]  ;;  %v331_v4 = vld [vmem:[%s3885_s16 + $0x78] sm:$0xff] }
  0xf3   : > { %2596 = vmatpush1.bf16.msra.mxu0 %v2595_v13  ;;  %1003 = vmatmul.mubr.f32.gmra.mrb[18].mxu1 %v352_v14  ;;  %v2617_v13 = vpack.c.bf16 %v609_v8, %v605_v7  ;;  %v604_v14 = vld [vmem:[#allocation6 + $0x7c0] sm:$0xff]  ;;  %v1160_v6 = vld [vmem:[#allocation8 + $0xd0] sm:$0xff] }
  0xf4   : > { %2724 = vmatpush1.bf16.msra.mxu1 %v2723_v15  ;;  %2598 = vmatprep.subr.bf16.mxu0 %v2597_v16  ;;  %v608_v15 = vld [vmem:[#allocation6 + $0x7e0] sm:$0xff]  ;;  %v606_v16 = vld [vmem:[#allocation6 + $0x7d0] sm:$0xff] }
  0xf5   : > { %2726 = vmatprep.subr.bf16.mxu1 %v2725_v20  ;;  %823 = vmatprep.mubr.f32.mxu0 %v319_v26  ;;  %v1139_v20 = vld [vmem:[#allocation8 + $0x28] sm:$0xff]  ;;  %v2619_v23 = vpack.c.bf16 %v608_v15, %v604_v14  ;;  %v2747_v24 = vpack.c.bf16 %v610_v18, %v606_v16  ;;  %v1162_v3 = vld [vmem:[#allocation8 + $0xe0] sm:$0xff]  ;;  %v1164_v7 = vld [vmem:[#allocation8 + $0xf0] sm:$0xff] }
  0xf6   : > { %1073 = vmatprep.mubr.f32.mxu1 %v319_v26  ;;  %v2749_v25 = vpack.c.bf16 %v1139_v20, %v1135_v19  ;;  %v1134_v26 = vld [vmem:[#allocation8] sm:$0xff]  ;;  %v1173_v14 = vld [vmem:[#allocation8 + $0x138] sm:$0xff]  ;;  %v2891_v15 = vpack.c.bf16 %v1164_v7, %v1160_v6  ;;  %v2765_v19 = vpack.c.bf16 %v1171_v10, %v1167_v9  ;;  %v1168_v20 = vld [vmem:[#allocation8 + $0x110] sm:$0xff] }
  0xf7   : > { %2600 = vmatpush1.bf16.msra.mxu0 %v2599_v27  ;;  %v1138_v27 = vld [vmem:[#allocation8 + $0x20] sm:$0xff]  ;;  %v335_v18 = vld [vmem:[%s3885_s16 + $0x98] sm:$0xff]  ;;  %v1180_v35 = vld [vmem:[#allocation8 + $0x170] sm:$0xff] }
  0xf8   : > { %2728 = vmatpush1.bf16.msra.mxu1 %v2727_v28  ;;  %2602 = vmatprep.subr.bf16.mxu0 %v2601_v29  ;;  %v2877_v28 = vpack.c.bf16 %v1141_v22, %v1137_v21  ;;  %v1136_v29 = vld [vmem:[#allocation8 + $0x10] sm:$0xff]  ;;  %v2751_v34 = vpack.c.bf16 %v1138_v27, %v1134_v26  ;;  %v1166_v16 = vld [vmem:[#allocation8 + $0x100] sm:$0xff]  ;;  %v1177_v27 = vld [vmem:[#allocation8 + $0x158] sm:$0xff] }
  0xf9   : > { %2730 = vmatprep.subr.bf16.mxu1 %v2729_v33  ;;  %v318_v33 = vld [vmem:[%s3885_s16 + $0x10] sm:$0xff]  ;;  %v2879_v37 = vpack.c.bf16 %v1140_v30, %v1136_v29  ;;  %v1174_v30 = vld [vmem:[#allocation8 + $0x140] sm:$0xff]  ;;  %v1205_v6 = vld [vmem:[#allocation8 + $0x238] sm:$0xff] }
  0xfa   : > { %v1172_v21 = vld [vmem:[#allocation8 + $0x130] sm:$0xff]  ;;  %v1202_v9 = vld [vmem:[#allocation8 + $0x220] sm:$0xff]  ;;  %v3950_v10 = vld [vmem:[%s3885_s16 + $0x118] sm:$0xff] }
  0xfb   : > { %2604 = vmatpush1.bf16.msra.mxu0 %v2603_v39  ;;  %v1146_v39 = vld [vmem:[#allocation8 + $0x60] sm:$0xff]  ;;  %v2895_v29 = vpack.c.bf16 %v1172_v21, %v1168_v20  ;;  %v1188_v49 = vld [vmem:[#allocation8 + $0x1b0] sm:$0xff]  ;;  %v1209_v20 = vld [vmem:[#allocation8 + $0x258] sm:$0xff] }
  0xfc   : > { %2732 = vmatpush1.bf16.msra.mxu1 %v2731_v40  ;;  %2606 = vmatprep.subr.bf16.mxu0 %v2605_v41  ;;  %v323_v40 = vld [vmem:[%s3885_s16 + $0x38] sm:$0xff]  ;;  %v2753_v41 = vpack.c.bf16 %v1147_v32, %v1143_v31  ;;  %v2755_v48 = vpack.c.bf16 %v1146_v39, %v1142_v38  ;;  %v1178_v31 = vld [vmem:[#allocation8 + $0x160] sm:$0xff]  ;;  %v1187_v38 = vld [vmem:[#allocation8 + $0x1a8] sm:$0xff] }
  0xfd   : > { %2734 = vmatprep.subr.bf16.mxu1 %v2733_v45  ;;  %v1151_v45 = vld [vmem:[#allocation8 + $0x88] sm:$0xff]  ;;  %v339_v32 = vld [vmem:[%s3885_s16 + $0xb8] sm:$0xff]  ;;  %v338_v39 = vld [vmem:[%s3885_s16 + $0xb0] sm:$0xff] }
  0xfe   : > { %v2757_v55 = vpack.c.bf16 %v1155_v46, %v1151_v45  ;;  %v1186_v45 = vld [vmem:[#allocation8 + $0x1a0] sm:$0xff]  ;;  %v3932_v46 = vld [vmem:[%s3885_s16 + $0xd8] sm:$0xff] }
  0xff   : > { %2608 = vmatpush1.bf16.msra.mxu0 %v2607_v51  ;;  %v2883_v51 = vpack.c.bf16 %v1148_v43, %v1144_v42  ;;  %v1189_v42 = vld [vmem:[#allocation8 + $0x1b8] sm:$0xff] }
 0x100   : > { %2736 = vmatpush1.bf16.msra.mxu1 %v2735_v52  ;;  %2610 = vmatprep.subr.bf16.mxu0 %v2609_v53  ;;  %v1150_v52 = vld [vmem:[#allocation8 + $0x80] sm:$0xff]  ;;  %v1213_v21 = vld [vmem:[#allocation8 + $0x278] sm:$0xff] }
 0x101   : > { %2738 = vmatprep.subr.bf16.mxu1 %v2737_v57  ;;  %v1154_v53 = vld [vmem:[#allocation8 + $0xa0] sm:$0xff]  ;;  %v1156_v57 = vld [vmem:[#allocation8 + $0xb0] sm:$0xff] }
 0x102   : > { %v2759_v62 = vpack.c.bf16 %v1154_v53, %v1150_v52  ;;  %v1195_v52 = vld [vmem:[#allocation8 + $0x1e8] sm:$0xff]  ;;  %v3935_v53 = vld [vmem:[%s3885_s16 + $0xd0] sm:$0xff] }
 0x103   : > { %2612 = vmatpush1.bf16.msra.mxu0 %v2611_v63  ;;  %v1161_v63 = vld [vmem:[#allocation8 + $0xd8] sm:$0xff] }
 0x104   : > { %2740 = vmatpush1.bf16.msra.mxu1 %v2739_v0  ;;  %2614 = vmatprep.subr.bf16.mxu0 %v2613_v1  ;;  %v1165_v0 = vld [vmem:[#allocation8 + $0xf8] sm:$0xff]  ;;  %v2887_v1 = vpack.c.bf16 %v1156_v57, %v1152_v56 }
 0x105   : > { %2742 = vmatprep.subr.bf16.mxu1 %v2741_v5  ;;  %v2761_v5 = vpack.c.bf16 %v1163_v60, %v1159_v59  ;;  %v2889_v8 = vpack.c.bf16 %v1165_v0, %v1161_v63  ;;  %v1197_v56 = vld [vmem:[#allocation8 + $0x1f8] sm:$0xff]  ;;  %v1194_v59 = vld [vmem:[#allocation8 + $0x1e0] sm:$0xff]  ;;  %v1196_v63 = vld [vmem:[#allocation8 + $0x1f0] sm:$0xff] }
 0x106   : > { %v3940_v60 = vld [vmem:[%s3885_s16 + $0xf8] sm:$0xff] }
 0x107   : > { %2616 = vmatpush1.bf16.msra.mxu0 %v2615_v11  ;;  %v330_v11 = vld [vmem:[%s3885_s16 + $0x70] sm:$0xff] }
 0x108   : > { %2744 = vmatpush1.bf16.msra.mxu1 %v2743_v12  ;;  %2618 = vmatprep.subr.bf16.mxu0 %v2617_v13  ;;  %v2763_v12 = vpack.c.bf16 %v1162_v3, %v1158_v2  ;;  %v1169_v13 = vld [vmem:[#allocation8 + $0x118] sm:$0xff]  ;;  %v1203_v2 = vld [vmem:[#allocation8 + $0x228] sm:$0xff]  ;;  %v3945_v3 = vld [vmem:[%s3885_s16 + $0xf0] sm:$0xff] }
 0x109   : > { %2746 = vmatprep.subr.bf16.mxu1 %v2745_v17  ;;  %v1170_v17 = vld [vmem:[#allocation8 + $0x120] sm:$0xff]  ;;  %v2893_v22 = vpack.c.bf16 %v1173_v14, %v1169_v13  ;;  %v1204_v13 = vld [vmem:[#allocation8 + $0x230] sm:$0xff] }
 0x10a   : > { %v2767_v26 = vpack.c.bf16 %v1170_v17, %v1166_v16  ;;  %v3954_v14 = vld [vmem:[%s3885_s16 + $0x110] sm:$0xff]  ;;  %v1207_v16 = vld [vmem:[#allocation8 + $0x248] sm:$0xff] }
 0x10b   : > { %2620 = vmatpush1.bf16.msra.mxu0 %v2619_v23  ;;  %v1175_v23 = vld [vmem:[#allocation8 + $0x148] sm:$0xff] }
 0x10c   : > { %2748 = vmatpush1.bf16.msra.mxu1 %v2747_v24  ;;  %2750 = vmatprep.subr.bf16.mxu0 %v2749_v25  ;;  %v1179_v24 = vld [vmem:[#allocation8 + $0x168] sm:$0xff]  ;;  %v334_v25 = vld [vmem:[%s3885_s16 + $0x90] sm:$0xff] }
 0x10d   : > { %2878 = vmatprep.subr.bf16.mxu1 %v2877_v28  ;;  %v1181_v28 = vld [vmem:[#allocation8 + $0x178] sm:$0xff]  ;;  %v1211_v17 = vld [vmem:[#allocation8 + $0x268] sm:$0xff] }
 0x10e   : > { %824 = vmatmul.mubr.f32.vlgmr.msra.gmra.mrb[0].mxu0 %v318_v33  ;;  %v2897_v36 = vpack.c.bf16 %v1181_v28, %v1177_v27  ;;  %v1212_v27 = vld [vmem:[#allocation8 + $0x270] sm:$0xff]  ;;  %v1215_v28 = vld [vmem:[#allocation8 + $0x288] sm:$0xff] }
 0x10f   : > { %1074 = vmatmul.mubr.f32.vlgmr.msra.gmra.mrb[0].mxu1 %v318_v33  ;;  %2752 = vmatpush1.bf16.msra.mxu0 %v2751_v34  ;;  %v2769_v33 = vpack.c.bf16 %v1179_v24, %v1175_v23  ;;  %v1176_v34 = vld [vmem:[#allocation8 + $0x150] sm:$0xff]  ;;  %v1206_v23 = vld [vmem:[#allocation8 + $0x240] sm:$0xff] }
 0x110   : > { %2880 = vmatpush1.bf16.msra.mxu1 %v2879_v37  ;;  %829 = vmatprep.mubr.f32.mxu0 %v323_v40  ;;  %v1183_v37 = vld [vmem:[#allocation8 + $0x188] sm:$0xff]  ;;  %v2899_v43 = vpack.c.bf16 %v1180_v35, %v1176_v34  ;;  %v1210_v24 = vld [vmem:[#allocation8 + $0x260] sm:$0xff] }
 0x111   : > { %1079 = vmatprep.mubr.f32.mxu1 %v323_v40  ;;  %2754 = vmatprep.subr.bf16.mxu0 %v2753_v41  ;;  %v2771_v40 = vpack.c.bf16 %v1178_v31, %v1174_v30  ;;  %v1185_v41 = vld [vmem:[#allocation8 + $0x198] sm:$0xff]  ;;  %v2913_v30 = vpack.c.bf16 %v1213_v21, %v1209_v20  ;;  %v2787_v34 = vpack.c.bf16 %v1210_v24, %v1206_v23  ;;  %v1244_v21 = vld [vmem:[#allocation8 + $0x370] sm:$0xff]  ;;  %v1251_v23 = vld [vmem:[#allocation8 + $0x3a8] sm:$0xff] }
 0x112   : > { %830 = vmatmul.mubr.f32.gmra.mrb[2].mxu0 %v322_v47  ;;  %2882 = vmatprep.subr.bf16.mxu1 %v2881_v44  ;;  %v1182_v44 = vld [vmem:[#allocation8 + $0x180] sm:$0xff]  ;;  %v2901_v50 = vpack.c.bf16 %v1189_v42, %v1185_v41  ;;  %v1217_v31 = vld [vmem:[#allocation8 + $0x298] sm:$0xff]  ;;  %v1220_v41 = vld [vmem:[#allocation8 + $0x2b0] sm:$0xff] }
 0x113   : > { %1080 = vmatmul.mubr.f32.gmra.mrb[2].mxu1 %v322_v47  ;;  %2756 = vmatpush1.bf16.msra.mxu0 %v2755_v48  ;;  %v2773_v47 = vpack.c.bf16 %v1187_v38, %v1183_v37  ;;  %v1184_v48 = vld [vmem:[#allocation8 + $0x190] sm:$0xff]  ;;  %v1214_v37 = vld [vmem:[#allocation8 + $0x280] sm:$0xff]  ;;  %v1223_v42 = vld [vmem:[#allocation8 + $0x2c8] sm:$0xff] }
 0x114   : > { %2884 = vmatpush1.bf16.msra.mxu1 %v2883_v51  ;;  %835 = vmatprep.mubr.f32.mxu0 %v327_v54  ;;  %v1191_v51 = vld [vmem:[#allocation8 + $0x1c8] sm:$0xff]  ;;  %v2903_v57 = vpack.c.bf16 %v1188_v49, %v1184_v48  ;;  %v1218_v38 = vld [vmem:[#allocation8 + $0x2a0] sm:$0xff]  ;;  %v1249_v24 = vld [vmem:[#allocation8 + $0x398] sm:$0xff] }
 0x115   : > { %1085 = vmatprep.mubr.f32.mxu1 %v327_v54  ;;  %2758 = vmatprep.subr.bf16.mxu0 %v2757_v55  ;;  %v2775_v54 = vpack.c.bf16 %v1186_v45, %v1182_v44  ;;  %v1193_v55 = vld [vmem:[#allocation8 + $0x1d8] sm:$0xff] }
 0x116   : > { %836 = vmatmul.mubr.f32.gmra.mrb[4].mxu0 %v326_v61  ;;  %2886 = vmatprep.subr.bf16.mxu1 %v2885_v58  ;;  %v1190_v58 = vld [vmem:[#allocation8 + $0x1c0] sm:$0xff]  ;;  %v2905_v0 = vpack.c.bf16 %v1197_v56, %v1193_v55  ;;  %v1225_v44 = vld [vmem:[#allocation8 + $0x2d8] sm:$0xff]  ;;  %v1228_v55 = vld [vmem:[#allocation8 + $0x2f0] sm:$0xff] }
 0x117   : > { %1086 = vmatmul.mubr.f32.gmra.mrb[4].mxu1 %v326_v61  ;;  %2760 = vmatpush1.bf16.msra.mxu0 %v2759_v62  ;;  %v2777_v61 = vpack.c.bf16 %v1195_v52, %v1191_v51  ;;  %v1192_v62 = vld [vmem:[#allocation8 + $0x1d0] sm:$0xff]  ;;  %v1229_v45 = vld [vmem:[#allocation8 + $0x2f8] sm:$0xff]  ;;  %v1226_v51 = vld [vmem:[#allocation8 + $0x2e0] sm:$0xff] }
 0x118   : > { %2888 = vmatpush1.bf16.msra.mxu1 %v2887_v1  ;;  %841 = vmatprep.mubr.f32.mxu0 %v331_v4  ;;  %v1199_v1 = vld [vmem:[#allocation8 + $0x208] sm:$0xff]  ;;  %v2907_v7 = vpack.c.bf16 %v1196_v63, %v1192_v62  ;;  %v1224_v52 = vld [vmem:[#allocation8 + $0x2d0] sm:$0xff] }
 0x119   : > { %1091 = vmatprep.mubr.f32.mxu1 %v331_v4  ;;  %2762 = vmatprep.subr.bf16.mxu0 %v2761_v5  ;;  %v2779_v4 = vpack.c.bf16 %v1194_v59, %v1190_v58  ;;  %v1201_v5 = vld [vmem:[#allocation8 + $0x218] sm:$0xff]  ;;  %v1231_v56 = vld [vmem:[#allocation8 + $0x308] sm:$0xff]  ;;  %v2923_v63 = vpack.c.bf16 %v1228_v55, %v1224_v52 }
 0x11a   : > { %842 = vmatmul.mubr.f32.gmra.mrb[6].mxu0 %v330_v11  ;;  %2890 = vmatprep.subr.bf16.mxu1 %v2889_v8  ;;  %v1198_v8 = vld [vmem:[#allocation8 + $0x200] sm:$0xff]  ;;  %v3408_v58 = vld [vmem:[%s3885_s16 + $0x8] sm:$0xff]  ;;  %v1233_v59 = vld [vmem:[#allocation8 + $0x318] sm:$0xff] }
 0x11b   : > { %1092 = vmatmul.mubr.f32.gmra.mrb[6].mxu1 %v330_v11  ;;  %2764 = vmatpush1.bf16.msra.mxu0 %v2763_v12  ;;  %v2781_v11 = vpack.c.bf16 %v1203_v2, %v1199_v1  ;;  %v1200_v12 = vld [vmem:[#allocation8 + $0x210] sm:$0xff]  ;;  %v1230_v1 = vld [vmem:[#allocation8 + $0x300] sm:$0xff] }
 0x11c   : > { %2892 = vmatpush1.bf16.msra.mxu1 %v2891_v15  ;;  %847 = vmatprep.mubr.f32.mxu0 %v335_v18  ;;  %v2909_v15 = vpack.c.bf16 %v1205_v6, %v1201_v5  ;;  %v1234_v2 = vld [vmem:[#allocation8 + $0x320] sm:$0xff]  ;;  %v1236_v6 = vld [vmem:[#allocation8 + $0x330] sm:$0xff] }
 0x11d   : > { %1097 = vmatprep.mubr.f32.mxu1 %v335_v18  ;;  %2766 = vmatprep.subr.bf16.mxu0 %v2765_v19  ;;  %v2783_v18 = vpack.c.bf16 %v1202_v9, %v1198_v8  ;;  %v3958_v19 = vld [vmem:[%s3885_s16 + $0x138] sm:$0xff]  ;;  %v1243_v8 = vld [vmem:[#allocation8 + $0x368] sm:$0xff] }
 0x11e   : > { %848 = vmatmul.mubr.f32.gmra.mrb[8].mxu0 %v334_v25  ;;  %2894 = vmatprep.subr.bf16.mxu1 %v2893_v22  ;;  %v2911_v22 = vpack.c.bf16 %v1204_v13, %v1200_v12  ;;  %v1241_v9 = vld [vmem:[#allocation8 + $0x358] sm:$0xff]  ;;  %v2799_v12 = vpack.c.bf16 %v1234_v2, %v1230_v1 }
 0x11f   : > { %1098 = vmatmul.mubr.f32.gmra.mrb[8].mxu1 %v334_v25  ;;  %2768 = vmatpush1.bf16.msra.mxu0 %v2767_v26  ;;  %v1208_v25 = vld [vmem:[#allocation8 + $0x250] sm:$0xff]  ;;  %v2785_v26 = vpack.c.bf16 %v1211_v17, %v1207_v16  ;;  %v1238_v16 = vld [vmem:[#allocation8 + $0x340] sm:$0xff]  ;;  %v1277_v1 = vld [vmem:[#allocation8 + $0x478] sm:$0xff] }
 0x120   : > { %2896 = vmatpush1.bf16.msra.mxu1 %v2895_v29  ;;  %853 = vmatprep.mubr.f32.mxu0 %v339_v32  ;;  %v1219_v29 = vld [vmem:[#allocation8 + $0x2a8] sm:$0xff]  ;;  %v2915_v35 = vpack.c.bf16 %v1212_v27, %v1208_v25  ;;  %v1242_v17 = vld [vmem:[#allocation8 + $0x360] sm:$0xff]  ;;  %v1253_v25 = vld [vmem:[#allocation8 + $0x3b8] sm:$0xff] }
 0x121   : > { %1103 = vmatprep.mubr.f32.mxu1 %v339_v32  ;;  %2770 = vmatprep.subr.bf16.mxu0 %v2769_v33  ;;  %v1221_v32 = vld [vmem:[#allocation8 + $0x2b8] sm:$0xff]  ;;  %v3965_v33 = vld [vmem:[%s3885_s16 + $0x130] sm:$0xff] }
 0x122   : > { %854 = vmatmul.mubr.f32.gmra.mrb[10].mxu0 %v338_v39  ;;  %2898 = vmatprep.subr.bf16.mxu1 %v2897_v36  ;;  %v2789_v36 = vpack.c.bf16 %v1219_v29, %v1215_v28  ;;  %v1246_v29 = vld [vmem:[#allocation8 + $0x380] sm:$0xff] }
 0x123   : > { %1104 = vmatmul.mubr.f32.gmra.mrb[10].mxu1 %v338_v39  ;;  %2772 = vmatpush1.bf16.msra.mxu0 %v2771_v40  ;;  %v1216_v39 = vld [vmem:[#allocation8 + $0x290] sm:$0xff]  ;;  %v2917_v40 = vpack.c.bf16 %v1221_v32, %v1217_v31  ;;  %v2933_v32 = vpack.c.bf16 %v1253_v25, %v1249_v24 }
 0x124   : > { %2900 = vmatpush1.bf16.msra.mxu1 %v2899_v43  ;;  %859 = vmatprep.mubr.f32.mxu0 %v3932_v46  ;;  %v1227_v43 = vld [vmem:[#allocation8 + $0x2e8] sm:$0xff]  ;;  %v2919_v48 = vpack.c.bf16 %v1220_v41, %v1216_v39  ;;  %v1248_v31 = vld [vmem:[#allocation8 + $0x390] sm:$0xff] }
 0x125   : > { %1109 = vmatprep.mubr.f32.mxu1 %v3932_v46  ;;  %2774 = vmatprep.subr.bf16.mxu0 %v2773_v47  ;;  %v2791_v47 = vpack.c.bf16 %v1218_v38, %v1214_v37  ;;  %v2793_v49 = vpack.c.bf16 %v1227_v43, %v1223_v42  ;;  %v1257_v37 = vld [vmem:[#allocation8 + $0x3d8] sm:$0xff]  ;;  %v1254_v42 = vld [vmem:[#allocation8 + $0x3c0] sm:$0xff]  ;;  %v1280_v24 = vld [vmem:[#allocation8 + $0x490] sm:$0xff] }
 0x126   : > { %860 = vmatmul.mubr.f32.gmra.mrb[12].mxu0 %v3935_v53  ;;  %2902 = vmatprep.subr.bf16.mxu1 %v2901_v50  ;;  %v1222_v50 = vld [vmem:[#allocation8 + $0x2c0] sm:$0xff]  ;;  %v1261_v38 = vld [vmem:[#allocation8 + $0x3f8] sm:$0xff] }
 0x127   : > { %1110 = vmatmul.mubr.f32.gmra.mrb[12].mxu1 %v3935_v53  ;;  %2776 = vmatpush1.bf16.msra.mxu0 %v2775_v54  ;;  %v2921_v54 = vpack.c.bf16 %v1229_v45, %v1225_v44  ;;  %v2795_v62 = vpack.c.bf16 %v1226_v51, %v1222_v50  ;;  %v1258_v43 = vld [vmem:[#allocation8 + $0x3e0] sm:$0xff]  ;;  %v1256_v44 = vld [vmem:[#allocation8 + $0x3d0] sm:$0xff]  ;;  %v2937_v45 = vpack.c.bf16 %v1261_v38, %v1257_v37  ;;  %v1265_v50 = vld [vmem:[#allocation8 + $0x418] sm:$0xff] }
 0x128   : > { %2904 = vmatpush1.bf16.msra.mxu1 %v2903_v57  ;;  %865 = vmatprep.mubr.f32.mxu0 %v3940_v60  ;;  %v1235_v57 = vld [vmem:[#allocation8 + $0x328] sm:$0xff]  ;;  %v1269_v51 = vld [vmem:[#allocation8 + $0x438] sm:$0xff]  ;;  %v2811_v52 = vpack.c.bf16 %v1258_v43, %v1254_v42  ;;  %v1286_v37 = vld [vmem:[#allocation8 + $0x4c0] sm:$0xff] }
 0x129   : > { %1115 = vmatprep.mubr.f32.mxu1 %v3940_v60  ;;  %2778 = vmatprep.subr.bf16.mxu0 %v2777_v61  ;;  %v1237_v61 = vld [vmem:[#allocation8 + $0x338] sm:$0xff]  ;;  %v1290_v38 = vld [vmem:[#allocation8 + $0x4e0] sm:$0xff]  ;;  %v1295_v42 = vld [vmem:[#allocation8 + $0x508] sm:$0xff] }
 0x12a   : > { %866 = vmatmul.mubr.f32.gmra.mrb[14].mxu0 %v3945_v3  ;;  %2906 = vmatprep.subr.bf16.mxu1 %v2905_v0  ;;  %v2797_v0 = vpack.c.bf16 %v1235_v57, %v1231_v56  ;;  %v2925_v5 = vpack.c.bf16 %v1237_v61, %v1233_v59  ;;  %v1262_v56 = vld [vmem:[#allocation8 + $0x400] sm:$0xff]  ;;  %v2941_v59 = vpack.c.bf16 %v1269_v51, %v1265_v50  ;;  %v1268_v61 = vld [vmem:[#allocation8 + $0x430] sm:$0xff]  ;;  %v1299_v43 = vld [vmem:[#allocation8 + $0x528] sm:$0xff] }
 0x12b   : > { %1116 = vmatmul.mubr.f32.gmra.mrb[14].mxu1 %v3945_v3  ;;  %2780 = vmatpush1.bf16.msra.mxu0 %v2779_v4  ;;  %v1232_v4 = vld [vmem:[#allocation8 + $0x310] sm:$0xff]  ;;  %v1266_v57 = vld [vmem:[#allocation8 + $0x420] sm:$0xff]  ;;  %v2829_v51 = vpack.c.bf16 %v1299_v43, %v1295_v42  ;;  %v1327_v42 = vld [vmem:[#allocation8 + $0x608] sm:$0xff] }
 0x12c   : > { %2908 = vmatpush1.bf16.msra.mxu1 %v2907_v7  ;;  %871 = vmatprep.mubr.f32.mxu0 %v3950_v10  ;;  %v1239_v7 = vld [vmem:[#allocation8 + $0x348] sm:$0xff]  ;;  %v2927_v13 = vpack.c.bf16 %v1236_v6, %v1232_v4  ;;  %v2815_v2 = vpack.c.bf16 %v1266_v57, %v1262_v56  ;;  %v1270_v6 = vld [vmem:[#allocation8 + $0x440] sm:$0xff]  ;;  %v1300_v57 = vld [vmem:[#allocation8 + $0x530] sm:$0xff] }
 0x12d   : > { %1121 = vmatprep.mubr.f32.mxu1 %v3950_v10  ;;  %2782 = vmatprep.subr.bf16.mxu0 %v2781_v11  ;;  %v1245_v11 = vld [vmem:[#allocation8 + $0x378] sm:$0xff]  ;;  %v1331_v43 = vld [vmem:[#allocation8 + $0x628] sm:$0xff] }
 0x12e   : > { %872 = vmatmul.mubr.f32.gmra.mrb[16].mxu0 %v3954_v14  ;;  %2910 = vmatprep.subr.bf16.mxu1 %v2909_v15  ;;  %v2801_v15 = vpack.c.bf16 %v1243_v8, %v1239_v7  ;;  %v2929_v20 = vpack.c.bf16 %v1245_v11, %v1241_v9  ;;  %v1274_v7 = vld [vmem:[#allocation8 + $0x460] sm:$0xff]  ;;  %v1272_v8 = vld [vmem:[#allocation8 + $0x450] sm:$0xff] }
 0x12f   : > { %1122 = vmatmul.mubr.f32.gmra.mrb[16].mxu1 %v3954_v14  ;;  %2784 = vmatpush1.bf16.msra.mxu0 %v2783_v18  ;;  %v1240_v18 = vld [vmem:[#allocation8 + $0x350] sm:$0xff] }
 0x130   : > { %2912 = vmatpush1.bf16.msra.mxu1 %v2911_v22  ;;  %877 = vmatprep.mubr.f32.mxu0 %v3958_v19  ;;  %v1247_v22 = vld [vmem:[#allocation8 + $0x388] sm:$0xff]  ;;  %v2931_v27 = vpack.c.bf16 %v1244_v21, %v1240_v18  ;;  %v1276_v11 = vld [vmem:[#allocation8 + $0x470] sm:$0xff]  ;;  %v2819_v18 = vpack.c.bf16 %v1274_v7, %v1270_v6  ;;  %v1306_v6 = vld [vmem:[#allocation8 + $0x560] sm:$0xff] }
 0x131   : > { %1127 = vmatprep.mubr.f32.mxu1 %v3958_v19  ;;  %2786 = vmatprep.subr.bf16.mxu0 %v2785_v26  ;;  %v2803_v26 = vpack.c.bf16 %v1242_v17, %v1238_v16  ;;  %v2805_v28 = vpack.c.bf16 %v1251_v23, %v1247_v22  ;;  %v1281_v16 = vld [vmem:[#allocation8 + $0x498] sm:$0xff]  ;;  %v1278_v22 = vld [vmem:[#allocation8 + $0x480] sm:$0xff]  ;;  %v1304_v7 = vld [vmem:[#allocation8 + $0x550] sm:$0xff] }
 0x132   : > { %878 = vmatmul.mubr.f32.gmra.mrb[18].mxu0 %v3965_v33  ;;  %2914 = vmatprep.subr.bf16.mxu1 %v2913_v30  ;;  %v1250_v30 = vld [vmem:[#allocation8 + $0x3a0] sm:$0xff]  ;;  %v1285_v17 = vld [vmem:[#allocation8 + $0x4b8] sm:$0xff] }
 0x133   : > { %1128 = vmatmul.mubr.f32.gmra.mrb[18].mxu1 %v3965_v33  ;;  %2788 = vmatpush1.bf16.msra.mxu0 %v2787_v34  ;;  %v1252_v34 = vld [vmem:[#allocation8 + $0x3b0] sm:$0xff]  ;;  %v2807_v39 = vpack.c.bf16 %v1250_v30, %v1246_v29  ;;  %v1282_v23 = vld [vmem:[#allocation8 + $0x4a0] sm:$0xff]  ;;  %v2949_v25 = vpack.c.bf16 %v1285_v17, %v1281_v16  ;;  %v3410_v29 = vld [vmem:[%s3885_s16 + $0x28] sm:$0xff] }
 0x134   : > { %2916 = vmatpush1.bf16.msra.mxu1 %v2915_v35  ;;  %2790 = vmatprep.subr.bf16.mxu0 %v2789_v36  ;;  %v1255_v35 = vld [vmem:[#allocation8 + $0x3c8] sm:$0xff]  ;;  %v1289_v30 = vld [vmem:[#allocation8 + $0x4d8] sm:$0xff]  ;;  %v3417_v17 = vld [vmem:[%s3885_s16 + $0x80] sm:$0xff] }
 0x135   : > { %2918 = vmatprep.subr.bf16.mxu1 %v2917_v40  ;;  %1476 = vmatprep.mubr.f32.mxu0 %v3408_v58  ;;  %v1259_v36 = vld [vmem:[#allocation8 + $0x3e8] sm:$0xff]  ;;  %v2935_v40 = vpack.c.bf16 %v1252_v34, %v1248_v31  ;;  %v1293_v31 = vld [vmem:[#allocation8 + $0x4f8] sm:$0xff]  ;;  %v2823_v34 = vpack.c.bf16 %v1282_v23, %v1278_v22  ;;  %v1310_v22 = vld [vmem:[#allocation8 + $0x580] sm:$0xff] }
 0x136   : > { %1726 = vmatprep.mubr.f32.mxu1 %v3408_v58  ;;  %v2809_v41 = vpack.c.bf16 %v1259_v36, %v1255_v35  ;;  %v1264_v58 = vld [vmem:[#allocation8 + $0x410] sm:$0xff]  ;;  %v1317_v16 = vld [vmem:[#allocation8 + $0x5b8] sm:$0xff]  ;;  %v1314_v23 = vld [vmem:[#allocation8 + $0x5a0] sm:$0xff] }
 0x137   : > { %2792 = vmatpush1.bf16.msra.mxu0 %v2791_v47  ;;  %v1260_v47 = vld [vmem:[#allocation8 + $0x3f0] sm:$0xff]  ;;  %v2943_v4 = vpack.c.bf16 %v1268_v61, %v1264_v58  ;;  %v1303_v58 = vld [vmem:[#allocation8 + $0x548] sm:$0xff] }
 0x138   : > { %2920 = vmatpush1.bf16.msra.mxu1 %v2919_v48  ;;  %2794 = vmatprep.subr.bf16.mxu0 %v2793_v49  ;;  %v1263_v48 = vld [vmem:[#allocation8 + $0x408] sm:$0xff] }
 0x139   : > { %2922 = vmatprep.subr.bf16.mxu1 %v2921_v54  ;;  %v1267_v49 = vld [vmem:[#allocation8 + $0x428] sm:$0xff]  ;;  %v2939_v54 = vpack.c.bf16 %v1260_v47, %v1256_v44  ;;  %v1301_v47 = vld [vmem:[#allocation8 + $0x538] sm:$0xff] }
 0x13a   : > { %v2813_v55 = vpack.c.bf16 %v1267_v49, %v1263_v48  ;;  %v3412_v44 = vld [vmem:[%s3885_s16 + $0x48] sm:$0xff]  ;;  %v3413_v48 = vld [vmem:[%s3885_s16 + $0x40] sm:$0xff]  ;;  %v2827_v49 = vpack.c.bf16 %v1290_v38, %v1286_v37 }
 0x13b   : > { %2796 = vmatpush1.bf16.msra.mxu0 %v2795_v62  ;;  %v1271_v62 = vld [vmem:[#allocation8 + $0x448] sm:$0xff]  ;;  %v1318_v37 = vld [vmem:[#allocation8 + $0x5c0] sm:$0xff] }
 0x13c   : > { %2924 = vmatpush1.bf16.msra.mxu1 %v2923_v63  ;;  %2798 = vmatprep.subr.bf16.mxu0 %v2797_v0  ;;  %v1275_v63 = vld [vmem:[#allocation8 + $0x468] sm:$0xff]  ;;  %v1273_v0 = vld [vmem:[#allocation8 + $0x458] sm:$0xff]  ;;  %v1322_v38 = vld [vmem:[#allocation8 + $0x5e0] sm:$0xff] }
 0x13d   : > { %2926 = vmatprep.subr.bf16.mxu1 %v2925_v5  ;;  %v2817_v5 = vpack.c.bf16 %v1275_v63, %v1271_v62  ;;  %v2945_v9 = vpack.c.bf16 %v1277_v1, %v1273_v0  ;;  %v3414_v61 = vld [vmem:[%s3885_s16 + $0x68] sm:$0xff]  ;;  %v1305_v62 = vld [vmem:[#allocation8 + $0x558] sm:$0xff]  ;;  %v3415_v0 = vld [vmem:[%s3885_s16 + $0x60] sm:$0xff] }
 0x13e   : > { %v1309_v63 = vld [vmem:[#allocation8 + $0x578] sm:$0xff] }
 0x13f   : > { %2800 = vmatpush1.bf16.msra.mxu0 %v2799_v12  ;;  %v1279_v12 = vld [vmem:[#allocation8 + $0x488] sm:$0xff] }
 0x140   : > { %2928 = vmatpush1.bf16.msra.mxu1 %v2927_v13  ;;  %2802 = vmatprep.subr.bf16.mxu0 %v2801_v15  ;;  %v1283_v13 = vld [vmem:[#allocation8 + $0x4a8] sm:$0xff]  ;;  %v3409_v15 = vld [vmem:[%s3885_s16] sm:$0xff] }
 0x141   : > { %2930 = vmatprep.subr.bf16.mxu1 %v2929_v20  ;;  %v2947_v20 = vpack.c.bf16 %v1276_v11, %v1272_v8  ;;  %v2821_v21 = vpack.c.bf16 %v1283_v13, %v1279_v12  ;;  %v2961_v8 = vpack.c.bf16 %v1309_v63, %v1305_v62  ;;  %v1311_v11 = vld [vmem:[#allocation8 + $0x588] sm:$0xff]  ;;  %v1337_v62 = vld [vmem:[#allocation8 + $0x658] sm:$0xff] }
 0x142   : > { %v1315_v12 = vld [vmem:[#allocation8 + $0x5a8] sm:$0xff]  ;;  %v1341_v63 = vld [vmem:[#allocation8 + $0x678] sm:$0xff] }
 0x143   : > { %2804 = vmatpush1.bf16.msra.mxu0 %v2803_v26  ;;  %v1284_v26 = vld [vmem:[#allocation8 + $0x4b0] sm:$0xff]  ;;  %v3416_v13 = vld [vmem:[%s3885_s16 + $0x88] sm:$0xff] }
 0x144   : > { %2932 = vmatpush1.bf16.msra.mxu1 %v2931_v27  ;;  %2806 = vmatprep.subr.bf16.mxu0 %v2805_v28  ;;  %v1287_v27 = vld [vmem:[#allocation8 + $0x4c8] sm:$0xff]  ;;  %v2951_v35 = vpack.c.bf16 %v1284_v26, %v1280_v24  ;;  %v1312_v24 = vld [vmem:[#allocation8 + $0x590] sm:$0xff] }
 0x145   : > { %2934 = vmatprep.subr.bf16.mxu1 %v2933_v32  ;;  %v1291_v28 = vld [vmem:[#allocation8 + $0x4e8] sm:$0xff]  ;;  %v3411_v32 = vld [vmem:[%s3885_s16 + $0x20] sm:$0xff]  ;;  %v1316_v26 = vld [vmem:[#allocation8 + $0x5b0] sm:$0xff] }
 0x146   : > { %v2825_v36 = vpack.c.bf16 %v1291_v28, %v1287_v27  ;;  %v1319_v27 = vld [vmem:[#allocation8 + $0x5c8] sm:$0xff] }
 0x147   : > { %2808 = vmatpush1.bf16.msra.mxu0 %v2807_v39  ;;  %v1288_v39 = vld [vmem:[#allocation8 + $0x4d0] sm:$0xff]  ;;  %v1323_v28 = vld [vmem:[#allocation8 + $0x5e8] sm:$0xff] }
 0x148   : > { %2936 = vmatpush1.bf16.msra.mxu1 %v2935_v40  ;;  %2810 = vmatprep.subr.bf16.mxu0 %v2809_v41  ;;  %v2953_v40 = vpack.c.bf16 %v1293_v31, %v1289_v30  ;;  %v1292_v41 = vld [vmem:[#allocation8 + $0x4f0] sm:$0xff]  ;;  %v1321_v30 = vld [vmem:[#allocation8 + $0x5d8] sm:$0xff] }
 0x149   : > { %2938 = vmatprep.subr.bf16.mxu1 %v2937_v45  ;;  %v1297_v45 = vld [vmem:[#allocation8 + $0x518] sm:$0xff]  ;;  %v2955_v50 = vpack.c.bf16 %v1292_v41, %v1288_v39  ;;  %v1320_v39 = vld [vmem:[#allocation8 + $0x5d0] sm:$0xff] }
 0x14a   : > { %v2957_v56 = vpack.c.bf16 %v1301_v47, %v1297_v45  ;;  %v1325_v31 = vld [vmem:[#allocation8 + $0x5f8] sm:$0xff]  ;;  %v1324_v41 = vld [vmem:[#allocation8 + $0x5f0] sm:$0xff] }
 0x14b   : > { %2812 = vmatpush1.bf16.msra.mxu0 %v2811_v52  ;;  %v1294_v52 = vld [vmem:[#allocation8 + $0x500] sm:$0xff]  ;;  %v1329_v45 = vld [vmem:[#allocation8 + $0x618] sm:$0xff] }
 0x14c   : > { %2940 = vmatpush1.bf16.msra.mxu1 %v2939_v54  ;;  %2814 = vmatprep.subr.bf16.mxu0 %v2813_v55  ;;  %v1298_v54 = vld [vmem:[#allocation8 + $0x520] sm:$0xff]  ;;  %v1296_v55 = vld [vmem:[#allocation8 + $0x510] sm:$0xff]  ;;  %v1333_v47 = vld [vmem:[#allocation8 + $0x638] sm:$0xff] }
 0x14d   : > { %2942 = vmatprep.subr.bf16.mxu1 %v2941_v59  ;;  %v1307_v59 = vld [vmem:[#allocation8 + $0x568] sm:$0xff]  ;;  %v2831_v1 = vpack.c.bf16 %v1298_v54, %v1294_v52  ;;  %v1326_v52 = vld [vmem:[#allocation8 + $0x600] sm:$0xff] }
 0x14e   : > { %1477 = vmatmul.mubr.f32.vlgmr.msra.gmra.mrb[20].mxu0 %v3409_v15  ;;  %v1330_v54 = vld [vmem:[#allocation8 + $0x620] sm:$0xff] }
 0x14f   : > { %2816 = vmatpush1.bf16.msra.mxu0 %v2815_v2  ;;  %1727 = vmatmul.mubr.f32.vlgmr.msra.gmra.mrb[20].mxu1 %v3409_v15  ;;  %v2959_v2 = vpack.c.bf16 %v1300_v57, %v1296_v55  ;;  %v1313_v15 = vld [vmem:[#allocation8 + $0x598] sm:$0xff]  ;;  %v1328_v55 = vld [vmem:[#allocation8 + $0x610] sm:$0xff] }
 0x150   : > { %2944 = vmatpush1.bf16.msra.mxu1 %v2943_v4  ;;  %2818 = vmatprep.subr.bf16.mxu0 %v2817_v5  ;;  %v2833_v4 = vpack.c.bf16 %v1307_v59, %v1303_v58  ;;  %v1302_v5 = vld [vmem:[#allocation8 + $0x540] sm:$0xff]  ;;  %v1332_v57 = vld [vmem:[#allocation8 + $0x630] sm:$0xff]  ;;  %v1335_v58 = vld [vmem:[#allocation8 + $0x648] sm:$0xff] }
 0x151   : > { %2946 = vmatprep.subr.bf16.mxu1 %v2945_v9  ;;  %1482 = vmatprep.mubr.f32.mxu0 %v3410_v29  ;;  %v1308_v9 = vld [vmem:[#allocation8 + $0x570] sm:$0xff]  ;;  %v1339_v59 = vld [vmem:[#allocation8 + $0x668] sm:$0xff] }
 0x152   : > { %1732 = vmatprep.mubr.f32.mxu1 %v3410_v29  ;;  %1483 = vmatmul.mubr.f32.gmra.mrb[22].mxu0 %v3411_v32  ;;  %v3418_v29 = vld [vmem:[%s3885_s16 + $0xa8] sm:$0xff] }
 0x153   : > { %2820 = vmatpush1.bf16.msra.mxu0 %v2819_v18  ;;  %1733 = vmatmul.mubr.f32.gmra.mrb[22].mxu1 %v3411_v32  ;;  %v2835_v18 = vpack.c.bf16 %v1306_v6, %v1302_v5  ;;  %v3419_v32 = vld [vmem:[%s3885_s16 + $0xa0] sm:$0xff] }
 0x154   : > { %2948 = vmatpush1.bf16.msra.mxu1 %v2947_v20  ;;  %2822 = vmatprep.subr.bf16.mxu0 %v2821_v21  ;;  %v2963_v20 = vpack.c.bf16 %v1308_v9, %v1304_v7  ;;  %v2837_v21 = vpack.c.bf16 %v1315_v12, %v1311_v11  ;;  %v1334_v5 = vld [vmem:[#allocation8 + $0x640] sm:$0xff]  ;;  %v1336_v7 = vld [vmem:[#allocation8 + $0x650] sm:$0xff]  ;;  %v1343_v11 = vld [vmem:[#allocation8 + $0x688] sm:$0xff] }
 0x155   : > { %2950 = vmatprep.subr.bf16.mxu1 %v2949_v25  ;;  %1488 = vmatprep.mubr.f32.mxu0 %v3412_v44  ;;  %v2965_v25 = vpack.c.bf16 %v1317_v16, %v1313_v15  ;;  %v1338_v6 = vld [vmem:[#allocation8 + $0x660] sm:$0xff]  ;;  %v1340_v9 = vld [vmem:[#allocation8 + $0x670] sm:$0xff]  ;;  %v1347_v12 = vld [vmem:[#allocation8 + $0x6a8] sm:$0xff] }
 0x156   : > { %1738 = vmatprep.mubr.f32.mxu1 %v3412_v44  ;;  %1489 = vmatmul.mubr.f32.gmra.mrb[24].mxu0 %v3413_v48  ;;  %v3420_v44 = vld [vmem:[%s3885_s16 + $0xc8] sm:$0xff]  ;;  %v1345_v15 = vld [vmem:[#allocation8 + $0x698] sm:$0xff] }
 0x157   : > { %2824 = vmatpush1.bf16.msra.mxu0 %v2823_v34  ;;  %1739 = vmatmul.mubr.f32.gmra.mrb[24].mxu1 %v3413_v48  ;;  %v2839_v34 = vpack.c.bf16 %v1314_v23, %v1310_v22  ;;  %v3421_v48 = vld [vmem:[%s3885_s16 + $0xc0] sm:$0xff]  ;;  %v1349_v16 = vld [vmem:[#allocation8 + $0x6b8] sm:$0xff] }
 0x158   : > { %2952 = vmatpush1.bf16.msra.mxu1 %v2951_v35  ;;  %2826 = vmatprep.subr.bf16.mxu0 %v2825_v36  ;;  %v2967_v35 = vpack.c.bf16 %v1316_v26, %v1312_v24  ;;  %v2841_v36 = vpack.c.bf16 %v1323_v28, %v1319_v27  ;;  %v1342_v22 = vld [vmem:[#allocation8 + $0x680] sm:$0xff]  ;;  %v1344_v24 = vld [vmem:[#allocation8 + $0x690] sm:$0xff]  ;;  %v1351_v27 = vld [vmem:[#allocation8 + $0x6c8] sm:$0xff] }
 0x159   : > { %2954 = vmatprep.subr.bf16.mxu1 %v2953_v40  ;;  %1494 = vmatprep.mubr.f32.mxu0 %v3414_v61  ;;  %v2969_v40 = vpack.c.bf16 %v1325_v31, %v1321_v30  ;;  %v1346_v23 = vld [vmem:[#allocation8 + $0x6a0] sm:$0xff]  ;;  %v1348_v26 = vld [vmem:[#allocation8 + $0x6b0] sm:$0xff]  ;;  %v1355_v28 = vld [vmem:[#allocation8 + $0x6e8] sm:$0xff] }
 0x15a   : > { %1744 = vmatprep.mubr.f32.mxu1 %v3414_v61  ;;  %1495 = vmatmul.mubr.f32.gmra.mrb[26].mxu0 %v3415_v0  ;;  %v3422_v61 = vld [vmem:[%s3885_s16 + $0xe8] sm:$0xff]  ;;  %v1353_v30 = vld [vmem:[#allocation8 + $0x6d8] sm:$0xff] }
 0x15b   : > { %2828 = vmatpush1.bf16.msra.mxu0 %v2827_v49  ;;  %1745 = vmatmul.mubr.f32.gmra.mrb[26].mxu1 %v3415_v0  ;;  %v2843_v49 = vpack.c.bf16 %v1322_v38, %v1318_v37  ;;  %v3423_v0 = vld [vmem:[%s3885_s16 + $0xe0] sm:$0xff]  ;;  %v1357_v31 = vld [vmem:[#allocation8 + $0x6f8] sm:$0xff] }
 0x15c   : > { %2956 = vmatpush1.bf16.msra.mxu1 %v2955_v50  ;;  %2830 = vmatprep.subr.bf16.mxu0 %v2829_v51  ;;  %v2971_v50 = vpack.c.bf16 %v1324_v41, %v1320_v39  ;;  %v2845_v51 = vpack.c.bf16 %v1331_v43, %v1327_v42  ;;  %v1350_v37 = vld [vmem:[#allocation8 + $0x6c0] sm:$0xff]  ;;  %v1352_v39 = vld [vmem:[#allocation8 + $0x6d0] sm:$0xff]  ;;  %v1359_v42 = vld [vmem:[#allocation8 + $0x708] sm:$0xff] }
 0x15d   : > { %2958 = vmatprep.subr.bf16.mxu1 %v2957_v56  ;;  %1500 = vmatprep.mubr.f32.mxu0 %v3416_v13  ;;  %v2973_v56 = vpack.c.bf16 %v1333_v47, %v1329_v45  ;;  %v1354_v38 = vld [vmem:[#allocation8 + $0x6e0] sm:$0xff]  ;;  %v1356_v41 = vld [vmem:[#allocation8 + $0x6f0] sm:$0xff]  ;;  %v1363_v43 = vld [vmem:[#allocation8 + $0x728] sm:$0xff] }
 0x15e   : > { %1750 = vmatprep.mubr.f32.mxu1 %v3416_v13  ;;  %1501 = vmatmul.mubr.f32.gmra.mrb[28].mxu0 %v3417_v17  ;;  %v3424_v13 = vld [vmem:[%s3885_s16 + $0x108] sm:$0xff]  ;;  %v1361_v45 = vld [vmem:[#allocation8 + $0x718] sm:$0xff] }
 0x15f   : > { %2832 = vmatpush1.bf16.msra.mxu0 %v2831_v1  ;;  %1751 = vmatmul.mubr.f32.gmra.mrb[28].mxu1 %v3417_v17  ;;  %v2847_v1 = vpack.c.bf16 %v1330_v54, %v1326_v52  ;;  %v3425_v17 = vld [vmem:[%s3885_s16 + $0x100] sm:$0xff]  ;;  %v1365_v47 = vld [vmem:[#allocation8 + $0x738] sm:$0xff]  ;;  %v1360_v54 = vld [vmem:[#allocation8 + $0x710] sm:$0xff] }
 0x160   : > { %2960 = vmatpush1.bf16.msra.mxu1 %v2959_v2  ;;  %2834 = vmatprep.subr.bf16.mxu0 %v2833_v4  ;;  %v2975_v2 = vpack.c.bf16 %v1332_v57, %v1328_v55  ;;  %v2849_v4 = vpack.c.bf16 %v1339_v59, %v1335_v58  ;;  %v1362_v52 = vld [vmem:[#allocation8 + $0x720] sm:$0xff]  ;;  %v2989_v55 = vpack.c.bf16 %v1365_v47, %v1361_v45  ;;  %v1367_v57 = vld [vmem:[#allocation8 + $0x748] sm:$0xff]  ;;  %v1369_v59 = vld [vmem:[#allocation8 + $0x758] sm:$0xff] }
 0x161   : > { %2962 = vmatprep.subr.bf16.mxu1 %v2961_v8  ;;  %1506 = vmatprep.mubr.f32.mxu0 %v3418_v29  ;;  %v2977_v8 = vpack.c.bf16 %v1341_v63, %v1337_v62  ;;  %v1371_v58 = vld [vmem:[#allocation8 + $0x768] sm:$0xff]  ;;  %v3437_v45 = vld [vmem:[%s3885_s16 + $0x90] sm:$0xff]  ;;  %v3438_v47 = vld [vmem:[%s3885_s16 + $0xb8] sm:$0xff] }
 0x162   : > { %1756 = vmatprep.mubr.f32.mxu1 %v3418_v29  ;;  %1507 = vmatmul.mubr.f32.gmra.mrb[30].mxu0 %v3419_v32  ;;  %v3426_v29 = vld [vmem:[%s3885_s16 + $0x128] sm:$0xff] }
 0x163   : > { %2836 = vmatpush1.bf16.msra.mxu0 %v2835_v18  ;;  %1757 = vmatmul.mubr.f32.gmra.mrb[30].mxu1 %v3419_v32  ;;  %v2851_v18 = vpack.c.bf16 %v1338_v6, %v1334_v5  ;;  %v3427_v32 = vld [vmem:[%s3885_s16 + $0x120] sm:$0xff]  ;;  %v1372_v6 = vld [vmem:[#allocation8 + $0x770] sm:$0xff] }
 0x164   : > { %2964 = vmatpush1.bf16.msra.mxu1 %v2963_v20  ;;  %2838 = vmatprep.subr.bf16.mxu0 %v2837_v21  ;;  %v2979_v20 = vpack.c.bf16 %v1340_v9, %v1336_v7  ;;  %v2853_v21 = vpack.c.bf16 %v1347_v12, %v1343_v11  ;;  %v1375_v7 = vld [vmem:[#allocation8 + $0x788] sm:$0xff]  ;;  %v1377_v9 = vld [vmem:[#allocation8 + $0x798] sm:$0xff] }
 0x165   : > { %2966 = vmatprep.subr.bf16.mxu1 %v2965_v25  ;;  %1512 = vmatprep.mubr.f32.mxu0 %v3420_v44  ;;  %v2981_v25 = vpack.c.bf16 %v1349_v16, %v1345_v15  ;;  %v1381_v11 = vld [vmem:[#allocation8 + $0x7b8] sm:$0xff]  ;;  %v1374_v16 = vld [vmem:[#allocation8 + $0x780] sm:$0xff] }
 0x166   : > { %1762 = vmatprep.mubr.f32.mxu1 %v3420_v44  ;;  %1513 = vmatmul.mubr.f32.gmra.mrb[32].mxu0 %v3421_v48  ;;  %v3428_v44 = vld [vmem:[%s3885_s16 + $0x18] sm:$0xff] }
 0x167   : > { %2840 = vmatpush1.bf16.msra.mxu0 %v2839_v34  ;;  %1763 = vmatmul.mubr.f32.gmra.mrb[32].mxu1 %v3421_v48  ;;  %v2855_v34 = vpack.c.bf16 %v1346_v23, %v1342_v22  ;;  %v2859_v48 = vpack.c.bf16 %v1354_v38, %v1350_v37  ;;  %v1383_v22 = vld [vmem:[#allocation8 + $0x7c8] sm:$0xff]  ;;  %v3429_v37 = vld [vmem:[%s3885_s16 + $0x10] sm:$0xff]  ;;  %v3430_v38 = vld [vmem:[%s3885_s16 + $0x38] sm:$0xff] }
 0x168   : > { %2968 = vmatpush1.bf16.msra.mxu1 %v2967_v35  ;;  %2842 = vmatprep.subr.bf16.mxu0 %v2841_v36  ;;  %v2983_v35 = vpack.c.bf16 %v1348_v26, %v1344_v24  ;;  %v2857_v36 = vpack.c.bf16 %v1355_v28, %v1351_v27  ;;  %v1387_v23 = vld [vmem:[#allocation8 + $0x7e8] sm:$0xff]  ;;  %v1385_v24 = vld [vmem:[#allocation8 + $0x7d8] sm:$0xff] }
 0x169   : > { %2970 = vmatprep.subr.bf16.mxu1 %v2969_v40  ;;  %1518 = vmatprep.mubr.f32.mxu0 %v3422_v61  ;;  %v2985_v40 = vpack.c.bf16 %v1357_v31, %v1353_v30  ;;  %v2873_v28 = vpack.c.bf16 %v1387_v23, %v1383_v22  ;;  %v1386_v30 = vld [vmem:[#allocation8 + $0x7e0] sm:$0xff]  ;;  %v614_v23 = vlaneseq }
 0x16a   : > { %1768 = vmatprep.mubr.f32.mxu1 %v3422_v61  ;;  %1519 = vmatmul.mubr.f32.gmra.mrb[34].mxu0 %v3423_v0  ;;  %v1373_v61 = vld [vmem:[#allocation8 + $0x778] sm:$0xff] }
 0x16b   : > { %2844 = vmatpush1.bf16.msra.mxu0 %v2843_v49  ;;  %1769 = vmatmul.mubr.f32.gmra.mrb[34].mxu1 %v3423_v0  ;;  %v2987_v49 = vpack.c.bf16 %v1356_v41, %v1352_v39  ;;  %v2865_v0 = vpack.c.bf16 %v1371_v58, %v1367_v57  ;;  %v2993_v5 = vpack.c.bf16 %v1373_v61, %v1369_v59  ;;  %v3431_v39 = vld [vmem:[%s3885_s16 + $0x30] sm:$0xff] }
 0x16c   : > { %2972 = vmatpush1.bf16.msra.mxu1 %v2971_v50  ;;  %2846 = vmatprep.subr.bf16.mxu0 %v2845_v51  ;;  %v2861_v50 = vpack.c.bf16 %v1363_v43, %v1359_v42  ;;  %v1358_v51 = vld [vmem:[#allocation8 + $0x700] sm:$0xff]  ;;  %v3433_v41 = vld [vmem:[%s3885_s16 + $0x50] sm:$0xff]  ;;  %v3434_v42 = vld [vmem:[%s3885_s16 + $0x78] sm:$0xff] }
 0x16d   : > { %2974 = vmatprep.subr.bf16.mxu1 %v2973_v56  ;;  %1524 = vmatprep.mubr.f32.mxu0 %v3424_v13  ;;  %v1364_v56 = vld [vmem:[#allocation8 + $0x730] sm:$0xff]  ;;  %v2863_v62 = vpack.c.bf16 %v1362_v52, %v1358_v51 }
 0x16e   : > { %1774 = vmatprep.mubr.f32.mxu1 %v3424_v13  ;;  %1525 = vmatmul.mubr.f32.gmra.mrb[36].mxu0 %v3425_v17  ;;  %v2991_v63 = vpack.c.bf16 %v1364_v56, %v1360_v54  ;;  %v3435_v43 = vld [vmem:[%s3885_s16 + $0x70] sm:$0xff] }
 0x16f   : > { %2848 = vmatpush1.bf16.msra.mxu0 %v2847_v1  ;;  %1775 = vmatmul.mubr.f32.gmra.mrb[36].mxu1 %v3425_v17  ;;  %v1366_v1 = vld [vmem:[#allocation8 + $0x740] sm:$0xff] }
 0x170   : > { %2976 = vmatpush1.bf16.msra.mxu1 %v2975_v2  ;;  %2850 = vmatprep.subr.bf16.mxu0 %v2849_v4  ;;  %v1370_v2 = vld [vmem:[#allocation8 + $0x760] sm:$0xff]  ;;  %v1368_v4 = vld [vmem:[#allocation8 + $0x750] sm:$0xff] }
 0x171   : > { %2978 = vmatprep.subr.bf16.mxu1 %v2977_v8  ;;  %1530 = vmatprep.mubr.f32.mxu0 %v3426_v29  ;;  %v1379_v8 = vld [vmem:[#allocation8 + $0x7a8] sm:$0xff]  ;;  %v2867_v12 = vpack.c.bf16 %v1370_v2, %v1366_v1  ;;  %v2995_v13 = vpack.c.bf16 %v1372_v6, %v1368_v4  ;;  %v1378_v17 = vld [vmem:[#allocation8 + $0x7a0] sm:$0xff] }
 0x172   : > { %1780 = vmatprep.mubr.f32.mxu1 %v3426_v29  ;;  %1531 = vmatmul.mubr.f32.gmra.mrb[38].mxu0 %v3427_v32  ;;  %v2869_v15 = vpack.c.bf16 %v1379_v8, %v1375_v7  ;;  %v2871_v26 = vpack.c.bf16 %v1378_v17, %v1374_v16  ;;  %v1382_v29 = vld [vmem:[#allocation8 + $0x7c0] sm:$0xff] }
 0x173   : > { %2852 = vmatpush1.bf16.msra.mxu0 %v2851_v18  ;;  %1781 = vmatmul.mubr.f32.gmra.mrb[38].mxu1 %v3427_v32  ;;  %v1376_v18 = vld [vmem:[#allocation8 + $0x790] sm:$0xff] }
 0x174   : > { %2980 = vmatpush1.bf16.msra.mxu1 %v2979_v20  ;;  %2854 = vmatprep.subr.bf16.mxu0 %v2853_v21  ;;  %v2997_v20 = vpack.c.bf16 %v1381_v11, %v1377_v9  ;;  %v1380_v21 = vld [vmem:[#allocation8 + $0x7b0] sm:$0xff] }
 0x175   : > { %2982 = vmatprep.subr.bf16.mxu1 %v2981_v25  ;;  %1601 = vmatprep.mubr.f32.mxu0 %v3428_v44  ;;  %v1389_v25 = vld [vmem:[#allocation8 + $0x7f8] sm:$0xff]  ;;  %v2999_v27 = vpack.c.bf16 %v1380_v21, %v1376_v18  ;;  %v1384_v32 = vld [vmem:[#allocation8 + $0x7d0] sm:$0xff] }
 0x176   : > { %1851 = vmatprep.mubr.f32.mxu1 %v3428_v44  ;;  %v3001_v31 = vpack.c.bf16 %v1389_v25, %v1385_v24  ;;  %v3436_v44 = vld [vmem:[%s3885_s16 + $0x98] sm:$0xff]  ;;  %v4079_v24 = vshrl.u32 %v614_v23, 7 }
 0x177   : > { %2856 = vmatpush1.bf16.msra.mxu0 %v2855_v34  ;;  %v1388_v34 = vld [vmem:[#allocation8 + $0x7f0] sm:$0xff] }
 0x178   : > { %2984 = vmatpush1.bf16.msra.mxu1 %v2983_v35  ;;  %2858 = vmatprep.subr.bf16.mxu0 %v2857_v36  ;;  %v2875_v35 = vpack.c.bf16 %v1386_v30, %v1382_v29  ;;  %v3003_v36 = vpack.c.bf16 %v1388_v34, %v1384_v32  ;;  %v4631_v25 = vsub.s32 0, %v4079_v24  ;;  %v4628_v29 = vsub.s32 3, %v4079_v24 }
 0x179   : > { %2986 = vmatprep.subr.bf16.mxu1 %v2985_v40  ;;  %v3432_v40 = vld [vmem:[%s3885_s16 + $0x58] sm:$0xff] }
 0x17b   : > { %2860 = vmatpush1.bf16.msra.mxu0 %v2859_v48  ;;  %v3439_v48 = vld [vmem:[%s3885_s16 + $0xb0] sm:$0xff] }
 0x17c   : > { %2988 = vmatpush1.bf16.msra.mxu1 %v2987_v49  ;;  %2862 = vmatprep.subr.bf16.mxu0 %v2861_v50 }
 0x17d   : > { %2990 = vmatprep.subr.bf16.mxu1 %v2989_v55 }
 0x17f   : > { %2864 = vmatpush1.bf16.msra.mxu0 %v2863_v62 }
 0x180   : > { %2992 = vmatpush1.bf16.msra.mxu1 %v2991_v63  ;;  %2866 = vmatprep.subr.bf16.mxu0 %v2865_v0 }
 0x181   : > { %2994 = vmatprep.subr.bf16.mxu1 %v2993_v5 }
 0x183   : > { %2868 = vmatpush1.bf16.msra.mxu0 %v2867_v12 }
 0x184   : > { %2996 = vmatpush1.bf16.msra.mxu1 %v2995_v13  ;;  %2870 = vmatprep.subr.bf16.mxu0 %v2869_v15 }
 0x185   : > { %2998 = vmatprep.subr.bf16.mxu1 %v2997_v20 }
 0x187   : > { %2872 = vmatpush1.bf16.msra.mxu0 %v2871_v26  ;;  %v612_v26 = vld [vmem:[%s4620_s3] sm:$0xf] }
 0x188   : > { %3000 = vmatpush1.bf16.msra.mxu1 %v2999_v27  ;;  %2874 = vmatprep.subr.bf16.mxu0 %v2873_v28  ;;  %v4630_v27 = vsub.s32 2, %v4079_v24  ;;  %v4629_v28 = vsub.s32 1, %v4079_v24  ;;  %v4090_v30 = vrot.slane %v612_v26, %v4631_v25  ;;  %v4102_v34 = vrot.slane %v612_v26, %v4628_v29 }
 0x189   : > { %3002 = vmatprep.subr.bf16.mxu1 %v3001_v31 }
 0x18a   : > { %v4094_v31 = vrot.slane %v612_v26, %v4630_v27  ;;  %v4098_v32 = vrot.slane %v612_v26, %v4629_v28 }
 0x18b   : > { %2876 = vmatpush1.bf16.msra.mxu0 %v2875_v35 }
 0x18c   : > { %3004 = vmatpush1.bf16.msra.mxu1 %v3003_v36  ;;  %v4107_v36 = vstv %s1912_s7 }
 0x18e   : > { %1602 = vmatmul.mubr.f32.vlgmr.msra.gmra.mrb[20].mxu0 %v3429_v37 }
 0x18f   : > { %1852 = vmatmul.mubr.f32.vlgmr.msra.gmra.mrb[20].mxu1 %v3429_v37  ;;  %1607 = vmatprep.mubr.f32.mxu0 %v3430_v38 }
 0x190   : > { %1857 = vmatprep.mubr.f32.mxu1 %v3430_v38 }
 0x192   : > { %1608 = vmatmul.mubr.f32.gmra.mrb[22].mxu0 %v3431_v39 }
 0x193   : > { %1858 = vmatmul.mubr.f32.gmra.mrb[22].mxu1 %v3431_v39  ;;  %1613 = vmatprep.mubr.f32.mxu0 %v3432_v40 }
 0x194   : > { %1863 = vmatprep.mubr.f32.mxu1 %v3432_v40 }
 0x196   : > { %1614 = vmatmul.mubr.f32.gmra.mrb[24].mxu0 %v3433_v41 }
 0x197   : > { %1864 = vmatmul.mubr.f32.gmra.mrb[24].mxu1 %v3433_v41  ;;  %1619 = vmatprep.mubr.f32.mxu0 %v3434_v42 }
 0x198   : > { %1869 = vmatprep.mubr.f32.mxu1 %v3434_v42 }
 0x19a   : > { %1620 = vmatmul.mubr.f32.gmra.mrb[26].mxu0 %v3435_v43 }
 0x19b   : > { %1870 = vmatmul.mubr.f32.gmra.mrb[26].mxu1 %v3435_v43  ;;  %1625 = vmatprep.mubr.f32.mxu0 %v3436_v44 }
 0x19c   : > { %1875 = vmatprep.mubr.f32.mxu1 %v3436_v44 }
 0x19e   : > { %1626 = vmatmul.mubr.f32.gmra.mrb[28].mxu0 %v3437_v45 }
 0x19f   : > { %1876 = vmatmul.mubr.f32.gmra.mrb[28].mxu1 %v3437_v45  ;;  %1631 = vmatprep.mubr.f32.mxu0 %v3438_v47 }
 0x1a0   : > { %1881 = vmatprep.mubr.f32.mxu1 %v3438_v47 }
 0x1a2   : > { %1632 = vmatmul.mubr.f32.gmra.mrb[30].mxu0 %v3439_v48 }
 0x1a3   : > { %1882 = vmatmul.mubr.f32.gmra.mrb[30].mxu1 %v3439_v48  ;;  %1637 = vmatprep.mubr.f32.mxu0 %v3932_v46 }
 0x1a4   : > { %1887 = vmatprep.mubr.f32.mxu1 %v3932_v46 }
 0x1a6   : > { %1638 = vmatmul.mubr.f32.gmra.mrb[32].mxu0 %v3935_v53 }
 0x1a7   : > { %1888 = vmatmul.mubr.f32.gmra.mrb[32].mxu1 %v3935_v53  ;;  %1643 = vmatprep.mubr.f32.mxu0 %v3940_v60 }
 0x1a8   : > { %1893 = vmatprep.mubr.f32.mxu1 %v3940_v60 }
 0x1aa   : > { %1644 = vmatmul.mubr.f32.gmra.mrb[34].mxu0 %v3945_v3 }
 0x1ab   : > { %1894 = vmatmul.mubr.f32.gmra.mrb[34].mxu1 %v3945_v3  ;;  %1649 = vmatprep.mubr.f32.mxu0 %v3950_v10 }
 0x1ac   : > { %1899 = vmatprep.mubr.f32.mxu1 %v3950_v10 }
 0x1ae   : > { %1650 = vmatmul.mubr.f32.gmra.mrb[36].mxu0 %v3954_v14 }
 0x1af   : > { %1900 = vmatmul.mubr.f32.gmra.mrb[36].mxu1 %v3954_v14  ;;  %1655 = vmatprep.mubr.f32.mxu0 %v3958_v19 }
 0x1b0   : > { %1905 = vmatprep.mubr.f32.mxu1 %v3958_v19 }
 0x1b2   : > { %1656 = vmatmul.mubr.f32.gmra.mrb[38].mxu0 %v3965_v33 }
 0x1b3   : > { %1906 = vmatmul.mubr.f32.gmra.mrb[38].mxu1 %v3965_v33 }
 0x1e1   : > { %v825_v46 = vpop.f32.mrb[0].mxu0 }
 0x1e2   : > { %v1075_v53 = vpop.f32.mrb[0].mxu1  ;;  %v827_v60 = vpop.f32.mrb[1].mxu0  ;;  %v4105_v35 = vadd.f32 %v825_v46, %v4090_v30 }
 0x1e3   : > { %v1077_v3 = vpop.f32.mrb[1].mxu1  ;;  %v4110_v37 = vadd.f32 %v1075_v53, %v4094_v31  ;;  %v4113_v38 = vadd.f32 %v827_v60, %v4098_v32 }
 0x1e4   : > { %v4116_v39 = vadd.f32 %v1077_v3, %v4102_v34  ;;  %v1914_v40 = vmul.f32 %v4105_v35, %v4107_v36 }
 0x1e5   : > { %v831_v49 = vpop.f32.mrb[2].mxu0  ;;  %v1916_v42 = vmul.f32 %v4110_v37, %v4107_v36  ;;  %v1915_v44 = vmul.f32 %v4113_v38, %v4107_v36 }
 0x1e6   : > { %v1081_v50 = vpop.f32.mrb[2].mxu1  ;;  %v833_v51 = vpop.f32.mrb[3].mxu0  ;;  %v4121_v41 = vadd.f32 %v831_v49, %v4090_v30  ;;  %v1917_v47 = vmul.f32 %v4116_v39, %v4107_v36  ;;  %v2443_v46 = vmul.f32 -1.442695, %v1914_v40 }
 0x1e7   : > { %v1083_v10 = vpop.f32.mrb[3].mxu1  ;;  %v4126_v43 = vadd.f32 %v1081_v50, %v4094_v31  ;;  %v4131_v45 = vadd.f32 %v833_v51, %v4098_v32  ;;  %v2445_v3 = vmul.f32 -1.442695, %v1916_v42  ;;  %v2444_v51 = vmul.f32 -1.442695, %v1915_v44 }
 0x1e8   : > { %v4136_v48 = vadd.f32 %v1083_v10, %v4102_v34  ;;  %v1918_v53 = vmul.f32 %v4121_v41, %v4107_v36  ;;  %v2446_v10 = vmul.f32 -1.442695, %v1917_v47  ;;  %3248 = vpow2.f32 %v2443_v46 }
 0x1e9   : > { %v837_v52 = vpop.f32.mrb[4].mxu0  ;;  %v1920_v49 = vmul.f32 %v4126_v43, %v4107_v36  ;;  %v1919_v23 = vmul.f32 %v4131_v45, %v4107_v36  ;;  %3250 = vpow2.f32 %v2445_v3 }
 0x1ea   : > { %v1087_v54 = vpop.f32.mrb[4].mxu1  ;;  %v4019_v55 = vpop.f32.mrb[5].mxu0  ;;  %v4141_v60 = vadd.f32 %v837_v52, %v4090_v30  ;;  %v1921_v26 = vmul.f32 %v4136_v48, %v4107_v36  ;;  %v2447_v40 = vmul.f32 -1.442695, %v1918_v53  ;;  %3252 = vpow2.f32 %v2444_v51 }
 0x1eb   : > { %v4021_v14 = vpop.f32.mrb[5].mxu1  ;;  %v4146_v50 = vadd.f32 %v1087_v54, %v4094_v31  ;;  %v2449_v42 = vmul.f32 -1.442695, %v1920_v49  ;;  %v2448_v54 = vmul.f32 -1.442695, %v1919_v23  ;;  %v4158_v44 = vadd.f32 %v4019_v55, %v4098_v32 }
 0x1ec   : > { %v1922_v52 = vmul.f32 %v4141_v60, %v4107_v36  ;;  %3254 = vpow2.f32 %v2446_v10  ;;  %v2450_v47 = vmul.f32 -1.442695, %v1921_v26  ;;  %v4162_v46 = vadd.f32 %v4021_v14, %v4102_v34 }
 0x1ed   : > { %v4023_v56 = vpop.f32.mrb[6].mxu0  ;;  %v1924_v29 = vmul.f32 %v4146_v50, %v4107_v36  ;;  %3256 = vpow2.f32 %v2447_v40  ;;  %v1923_v51 = vmul.f32 %v4158_v44, %v4107_v36 }
 0x1ee   : > { %v4025_v19 = vpop.f32.mrb[6].mxu1  ;;  %v4027_v57 = vpop.f32.mrb[7].mxu0  ;;  %v2451_v53 = vmul.f32 -1.442695, %v1922_v52  ;;  %v4166_v3 = vadd.f32 %v4023_v56, %v4090_v30  ;;  %3258 = vpow2.f32 %v2449_v42  ;;  %v1925_v55 = vmul.f32 %v4162_v46, %v4107_v36 }
 0x1ef   : > { %v4029_v33 = vpop.f32.mrb[7].mxu1  ;;  %v2453_v49 = vmul.f32 -1.442695, %v1924_v29  ;;  %3260 = vpow2.f32 %v2448_v54  ;;  %v2452_v10 = vmul.f32 -1.442695, %v1923_v51  ;;  %v4180_v51 = vadd.f32 %v4027_v57, %v4098_v32 }
 0x1f0   : > { %3262 = vpow2.f32 %v2450_v47  ;;  %v1926_v14 = vmul.f32 %v4166_v3, %v4107_v36  ;;  %v2454_v56 = vmul.f32 -1.442695, %v1925_v55 }
 0x1f1   : > { %v4031_v58 = vpop.f32.mrb[8].mxu0  ;;  %3264 = vpow2.f32 %v2451_v53  ;;  %v4176_v53 = vadd.f32 %v4025_v19, %v4094_v31  ;;  %4659 = vst [vmem:[#allocation16_spill] sm:$0xff] %v4180_v51 }
 0x1f2   : > { %v4033_v59 = vpop.f32.mrb[8].mxu1  ;;  %v4035_v61 = vpop.f32.mrb[9].mxu0  ;;  %3266 = vpow2.f32 %v2453_v49  ;;  %v2455_v52 = vmul.f32 -1.442695, %v1926_v14  ;;  %v4188_v19 = vadd.f32 %v4031_v58, %v4090_v30 }
 0x1f3   : > { %v4037_v62 = vpop.f32.mrb[9].mxu1  ;;  %v3249_v23 = vpop.eup %3248  ;;  %3268 = vpow2.f32 %v2452_v10  ;;  %v1928_v57 = vmul.f32 %v4176_v53, %v4107_v36 }
 0x1f4   : > { %v3251_v26 = vpop.eup %3250  ;;  %v2074_v42 = vadd.f32 1.0, %v3249_v23  ;;  %3270 = vpow2.f32 %v2454_v56  ;;  %v4184_v23 = vadd.f32 %v4029_v33, %v4102_v34  ;;  %4661 = vst [vmem:[#allocation18_spill] sm:$0xff] %v4188_v19 }
 0x1f5   : > { %v4039_v63 = vpop.f32.mrb[10].mxu0  ;;  %v3253_v40 = vpop.eup %3252  ;;  %v2076_v28 = vadd.f32 1.0, %v3251_v26  ;;  %3272 = vpow2.f32 %v2455_v52  ;;  %v4194_v52 = vadd.f32 %v4033_v59, %v4094_v31 }
 0x1f6   : > { %v4041_v0 = vpop.f32.mrb[10].mxu1  ;;  %v4043_v1 = vpop.f32.mrb[11].mxu0  ;;  %v2075_v27 = vadd.f32 1.0, %v3253_v40  ;;  %3274 = vrcp.f32 %v2074_v42  ;;  %4660 = vst [vmem:[#allocation17_spill] sm:$0xff] %v4184_v23  ;;  %v1930_v42 = vmul.f32 %v4188_v19, %v4107_v36 }
 0x1f7   : > { %v4045_v2 = vpop.f32.mrb[11].mxu1  ;;  %v3255_v29 = vpop.eup %3254  ;;  %3276 = vrcp.f32 %v2076_v28  ;;  %4662 = vst [vmem:[#allocation19_spill] sm:$0xff] %v4194_v52  ;;  %v1927_v28 = vmul.f32 %v4180_v51, %v4107_v36 }
 0x1f8   : > { %v3257_v54 = vpop.eup %3256  ;;  %v2077_v49 = vadd.f32 1.0, %v3255_v29  ;;  %3278 = vrcp.f32 %v2075_v27  ;;  %v4200_v29 = vadd.f32 %v4035_v61, %v4098_v32  ;;  %v4206_v27 = vadd.f32 %v4037_v62, %v4102_v34 }
 0x1f9   : > { %v4047_v4 = vpop.f32.mrb[12].mxu0  ;;  %v3259_v47 = vpop.eup %3258  ;;  %v2078_v14 = vadd.f32 1.0, %v3257_v54  ;;  %v4212_v54 = vadd.f32 %v4039_v63, %v4090_v30  ;;  %v2457_v61 = vmul.f32 -1.442695, %v1928_v57  ;;  %v2459_v57 = vmul.f32 -1.442695, %v1930_v42 }
 0x1fa   : > { %v4049_v5 = vpop.f32.mrb[12].mxu1  ;;  %v4051_v6 = vpop.f32.mrb[13].mxu0  ;;  %v2080_v26 = vadd.f32 1.0, %v3259_v47  ;;  %3280 = vrcp.f32 %v2077_v49  ;;  %4663 = vst [vmem:[#allocation20_spill] sm:$0xff] %v4200_v29  ;;  %4664 = vst [vmem:[#allocation21_spill] sm:$0xff] %v4206_v27  ;;  %v1932_v47 = vmul.f32 %v4194_v52, %v4107_v36  ;;  %v4218_v49 = vadd.f32 %v4041_v0, %v4094_v31 }
 0x1fb   : > { %v4053_v7 = vpop.f32.mrb[13].mxu1  ;;  %v3261_v25 = vpop.eup %3260  ;;  %3282 = vrcp.f32 %v2078_v14  ;;  %4665 = vst [vmem:[#allocation22_spill] sm:$0xff] %v4212_v54  ;;  %v1931_v14 = vmul.f32 %v4200_v29, %v4107_v36  ;;  %v4230_v0 = vadd.f32 %v4045_v2, %v4102_v34  ;;  %v4242_v2 = vadd.f32 %v4049_v5, %v4094_v31 }
 0x1fc   : > { %v3263_v55 = vpop.eup %3262  ;;  %v2079_v40 = vadd.f32 1.0, %v3261_v25  ;;  %v1929_v25 = vmul.f32 %v4184_v23, %v4107_v36  ;;  %3284 = vrcp.f32 %v2080_v26  ;;  %4666 = vst [vmem:[#allocation23_spill] sm:$0xff] %v4218_v49 }
 0x1fd   : > { %v4055_v8 = vpop.f32.mrb[14].mxu0  ;;  %v3265_v10 = vpop.eup %3264  ;;  %v2081_v33 = vadd.f32 1.0, %v3263_v55  ;;  %v2456_v55 = vmul.f32 -1.442695, %v1927_v28  ;;  %4668 = vst [vmem:[#allocation25_spill] sm:$0xff] %v4230_v0  ;;  %4670 = vst [vmem:[#allocation27_spill] sm:$0xff] %v4242_v2 }
 0x1fe   : > { %v4057_v9 = vpop.f32.mrb[14].mxu1  ;;  %v4059_v11 = vpop.f32.mrb[15].mxu0  ;;  %v2082_v58 = vadd.f32 1.0, %v3265_v10  ;;  %3286 = vrcp.f32 %v2079_v40  ;;  %v4224_v10 = vadd.f32 %v4043_v1, %v4098_v32  ;;  %v2458_v26 = vmul.f32 -1.442695, %v1929_v25 }
 0x1ff   : > { %v4061_v12 = vpop.f32.mrb[15].mxu1  ;;  %v3267_v56 = vpop.eup %3266  ;;  %3288 = vrcp.f32 %v2081_v33  ;;  %v1934_v33 = vmul.f32 %v4212_v54, %v4107_v36  ;;  %v4236_v1 = vadd.f32 %v4047_v4, %v4090_v30  ;;  %v1936_v25 = vmul.f32 %v4218_v49, %v4107_v36 }
 0x200   : > { %v2084_v59 = vadd.f32 1.0, %v3267_v56  ;;  %v3269_v62 = vpop.eup %3268  ;;  %4667 = vst [vmem:[#allocation24_spill] sm:$0xff] %v4224_v10  ;;  %3290 = vrcp.f32 %v2082_v58  ;;  %v1933_v56 = vmul.f32 %v4206_v27, %v4107_v36  ;;  %v2461_v58 = vmul.f32 -1.442695, %v1932_v47 }
 0x201   : > { %v4063_v13 = vpop.f32.mrb[16].mxu0  ;;  %v3271_v63 = vpop.eup %3270  ;;  %4669 = vst [vmem:[#allocation26_spill] sm:$0xff] %v4236_v1  ;;  %v1935_v42 = vmul.f32 %v4224_v10, %v4107_v36  ;;  %v2463_v29 = vmul.f32 -1.442695, %v1934_v33  ;;  %v1938_v49 = vmul.f32 %v4236_v1, %v4107_v36  ;;  %v2465_v52 = vmul.f32 -1.442695, %v1936_v25 }
 0x202   : > { %v4065_v15 = vpop.f32.mrb[16].mxu1  ;;  %v4067_v16 = vpop.f32.mrb[17].mxu0  ;;  %3292 = vrcp.f32 %v2084_v59  ;;  %v2460_v59 = vmul.f32 -1.442695, %v1931_v14  ;;  %v2462_v4 = vmul.f32 -1.442695, %v1933_v56 }
 0x203   : > { %v4069_v17 = vpop.f32.mrb[17].mxu1  ;;  %v3273_v40 = vpop.eup %3272  ;;  %3294 = vpow2.f32 %v2457_v61  ;;  %v1937_v61 = vmul.f32 %v4230_v0, %v4107_v36  ;;  %v2464_v10 = vmul.f32 -1.442695, %v1935_v42  ;;  %v2467_v0 = vmul.f32 -1.442695, %v1938_v49 }
 0x204   : > { %v3275_v28 = vpop.eup %3274  ;;  %3296 = vpow2.f32 %v2456_v55  ;;  %v1940_v55 = vmul.f32 %v4242_v2, %v4107_v36  ;;  %v2083_v1 = vadd.f32 1.0, %v3269_v62  ;;  %v2085_v51 = vadd.f32 1.0, %v3271_v63 }
 0x205   : > { %v4071_v18 = vpop.f32.mrb[18].mxu0  ;;  %v3277_v27 = vpop.eup %3276  ;;  %3298 = vpow2.f32 %v2458_v26  ;;  %v2466_v56 = vmul.f32 -1.442695, %v1937_v61  ;;  %v4672_v62 = vsub.s32 2, %v4079_v24 }
 0x206   : > { %v4073_v20 = vpop.f32.mrb[18].mxu1  ;;  %v4075_v21 = vpop.f32.mrb[19].mxu0  ;;  %3300 = vpow2.f32 %v2459_v57  ;;  %v2469_v33 = vmul.f32 -1.442695, %v1940_v55 }
 0x207   : > { %v4077_v22 = vpop.f32.mrb[19].mxu1  ;;  %v3279_v54 = vpop.eup %3278  ;;  %3302 = vpow2.f32 %v2461_v58  ;;  %v1390_v58 = vld [vmem:[#allocation9] sm:$0xf] }
 0x208   : > { %v3281_v47 = vpop.eup %3280  ;;  %3304 = vpow2.f32 %v2460_v59  ;;  %v2086_v59 = vadd.f32 1.0, %v3273_v40  ;;  %v4673_v40 = vsub.s32 1, %v4079_v24 }
 0x209   : > { %v3283_v5 = vpop.eup %3282  ;;  %3306 = vpow2.f32 %v2462_v4 }
 0x20a   : > { %v3285_v14 = vpop.eup %3284  ;;  %3308 = vpow2.f32 %v2463_v29  ;;  %v4256_v29 = vadd.f32 %v4051_v6, %v4098_v32  ;;  %v4272_v61 = vrot.slane %v1390_v58, %v4673_v40 }
 0x20b   : > { %v3287_v26 = vpop.eup %3286  ;;  %3310 = vpow2.f32 %v2465_v52  ;;  %v4671_v52 = vsub.s32 0, %v4079_v24 }
 0x20c   : > { %v3289_v19 = vpop.eup %3288  ;;  %3312 = vpow2.f32 %v2464_v10  ;;  %v4264_v10 = vrot.slane %v1390_v58, %v4672_v62 }
 0x20d   : > { %v3291_v57 = vpop.eup %3290  ;;  %3314 = vpow2.f32 %v2466_v56  ;;  %v4260_v49 = vrot.slane %v1390_v58, %v4671_v52  ;;  %v4276_v56 = vadd.f32 %v4055_v8, %v4090_v30  ;;  %v4292_v8 = vmul.f32 %v3281_v47, %v4116_v39 }
 0x20e   : > { %v4252_v23 = vpop.eup %3292  ;;  %3316 = vpow2.f32 %v2467_v0  ;;  %v4268_v0 = vadd.f32 %v4053_v7, %v4102_v34  ;;  %v4286_v7 = vmul.f32 %v3277_v27, %v4110_v37 }
 0x20f   : > { %v3295_v25 = vpop.eup %3294  ;;  %3318 = vpow2.f32 %v2469_v33  ;;  %v4674_v33 = vsub.s32 3, %v4079_v24  ;;  %v1939_v24 = vmul.f32 %v4256_v29, %v4107_v36 }
 0x210   : > { %v3297_v2 = vpop.eup %3296  ;;  %3320 = vrcp.f32 %v2083_v1  ;;  %v2088_v63 = vadd.f32 1.0, %v3295_v25  ;;  %v4283_v25 = vmul.f32 %v3275_v28, %v4105_v35  ;;  %v4297_v35 = vmul.f32 %v3283_v5, %v4121_v41 }
 0x211   : > { %v3299_v42 = vpop.eup %3298  ;;  %3322 = vrcp.f32 %v2085_v51  ;;  %v2087_v55 = vadd.f32 1.0, %v3297_v2  ;;  %v4280_v52 = vrot.slane %v1390_v58, %v4674_v33  ;;  %v4289_v51 = vmul.f32 %v3279_v54, %v4113_v38 }
 0x212   : > { %v3301_v4 = vpop.eup %3300  ;;  %3324 = vrcp.f32 %v2086_v59  ;;  %v2089_v62 = vadd.f32 1.0, %v3299_v42  ;;  %v1941_v27 = vmul.f32 %v4268_v0, %v4107_v36  ;;  %v4302_v38 = vmul.f32 %v3285_v14, %v4126_v43 }
 0x213   : > { %v3303_v6 = vpop.eup %3302  ;;  %v2090_v2 = vadd.f32 1.0, %v3301_v4  ;;  %3326 = vrcp.f32 %v2088_v63  ;;  %v1942_v54 = vmul.f32 %v4276_v56, %v4107_v36  ;;  %v4307_v59 = vmul.f32 %v3287_v26, %v4131_v45 }
 0x214   : > { %v3305_v1 = vpop.eup %3304  ;;  %v2092_v37 = vadd.f32 1.0, %v3303_v6  ;;  %3328 = vrcp.f32 %v2087_v55  ;;  %v4311_v5 = vadd.f32 %v4057_v9, %v4094_v31  ;;  %v4314_v4 = vmul.f32 %v3289_v19, %v4136_v48 }
 0x215   : > { %v3307_v40 = vpop.eup %3306  ;;  %v2091_v39 = vadd.f32 1.0, %v3305_v1  ;;  %3330 = vrcp.f32 %v2089_v62  ;;  %v2468_v14 = vmul.f32 -1.442695, %v1939_v24  ;;  %v4317_v6 = vmul.f32 %v3291_v57, %v4141_v60 }
 0x216   : > { %v3309_v58 = vpop.eup %3308  ;;  %v2093_v41 = vadd.f32 1.0, %v3307_v40  ;;  %3332 = vrcp.f32 %v2090_v2  ;;  %v2470_v26 = vmul.f32 -1.442695, %v1941_v27  ;;  %v2471_v1 = vmul.f32 -1.442695, %v1942_v54 }
 0x217   : > { %v3311_v28 = vpop.eup %3310  ;;  %v2094_v43 = vadd.f32 1.0, %v3309_v58  ;;  %3334 = vrcp.f32 %v2092_v37  ;;  %v4321_v9 = vadd.f32 %v4059_v11, %v4098_v32  ;;  %v1944_v62 = vmul.f32 %v4311_v5, %v4107_v36 }
 0x218   : > { %v3313_v47 = vpop.eup %3312  ;;  %v2096_v45 = vadd.f32 1.0, %v3311_v28  ;;  %3336 = vrcp.f32 %v2091_v39  ;;  %v4327_v60 = vadd.f32 %v4061_v12, %v4102_v34  ;;  %v4331_v2 = vadd.f32 %v4063_v13, %v4090_v30 }
 0x219   : > { %v3315_v42 = vpop.eup %3314  ;;  %v2095_v33 = vadd.f32 1.0, %v3313_v47  ;;  %3338 = vrcp.f32 %v2093_v41  ;;  %v4335_v11 = vadd.f32 %v4065_v15, %v4094_v31  ;;  %v4339_v37 = vadd.f32 %v4067_v16, %v4098_v32 }
 0x21a   : > { %v3317_v63 = vpop.eup %3316  ;;  %v2097_v19 = vadd.f32 1.0, %v3315_v42  ;;  %3340 = vrcp.f32 %v2094_v43  ;;  %v4343_v12 = vadd.f32 %v4069_v17, %v4102_v34  ;;  %v1943_v13 = vmul.f32 %v4321_v9, %v4107_v36 }
 0x21b   : > { %v3319_v55 = vpop.eup %3318  ;;  %v2098_v40 = vadd.f32 1.0, %v3317_v63  ;;  %3342 = vrcp.f32 %v2096_v45  ;;  %v4349_v27 = vadd.f32 %v4071_v18, %v4090_v30  ;;  %v4353_v15 = vadd.f32 %v4073_v20, %v4094_v31 }
 0x21c   : > { %v3321_v48 = vpop.eup %3320  ;;  %v2100_v58 = vadd.f32 1.0, %v3319_v55  ;;  %3344 = vrcp.f32 %v2095_v33  ;;  %v1945_v16 = vmul.f32 %v4327_v60, %v4107_v36  ;;  %v4359_v17 = vadd.f32 %v4075_v21, %v4098_v32 }
 0x21d   : > { %v3323_v57 = vpop.eup %3322  ;;  %3346 = vrcp.f32 %v2097_v19  ;;  %v4363_v39 = vadd.f32 %v4077_v22, %v4102_v34  ;;  %v4367_v18 = vmul.f32 %v4252_v23, %v4146_v50  ;;  %v2473_v20 = vmul.f32 -1.442695, %v1944_v62 }
 0x21e   : > { %v3325_v24 = vpop.eup %3324  ;;  %3348 = vrcp.f32 %v2098_v40  ;;  %v1946_v30 = vmul.f32 %v4331_v2, %v4107_v36  ;;  %v1948_v21 = vmul.f32 %v4335_v11, %v4107_v36  ;;  %v1947_v32 = vmul.f32 %v4339_v37, %v4107_v36 }
 0x21f   : > { %v3327_v28 = vpop.eup %3326  ;;  %3350 = vrcp.f32 %v2100_v58  ;;  %v1949_v22 = vmul.f32 %v4343_v12, %v4107_v36  ;;  %v2472_v50 = vmul.f32 -1.442695, %v1943_v13  ;;  %v1950_v23 = vmul.f32 %v4349_v27, %v4107_v36 }
 0x220   : > { %v3329_v54 = vpop.eup %3328  ;;  %3352 = vpow2.f32 %v2468_v14  ;;  %v1952_v47 = vmul.f32 %v4353_v15, %v4107_v36  ;;  %v2474_v42 = vmul.f32 -1.442695, %v1945_v16  ;;  %v1951_v43 = vmul.f32 %v4359_v17, %v4107_v36 }
 0x221   : > { %v3331_v31 = vpop.eup %3330  ;;  %3354 = vpow2.f32 %v2470_v26  ;;  %v1953_v63 = vmul.f32 %v4363_v39, %v4107_v36  ;;  %v4386_v55 = vmul.f32 %v3321_v48, %v4158_v44  ;;  %v4389_v14 = vmul.f32 %v3323_v57, %v4162_v46 }
 0x222   : > { %v3333_v34 = vpop.eup %3332  ;;  %3356 = vpow2.f32 %v2471_v1  ;;  %v2475_v33 = vmul.f32 -1.442695, %v1946_v30  ;;  %v2477_v62 = vmul.f32 -1.442695, %v1948_v21  ;;  %v2476_v26 = vmul.f32 -1.442695, %v1947_v32 }
 0x223   : > { %v3335_v41 = vpop.eup %3334  ;;  %3358 = vpow2.f32 %v2473_v20  ;;  %v2478_v40 = vmul.f32 -1.442695, %v1949_v22  ;;  %v4394_v13 = vmul.f32 %v3325_v24, %v4166_v3  ;;  %v2479_v36 = vmul.f32 -1.442695, %v1950_v23  ;;  %v4675_v23 = vld [vmem:[#allocation16_spill] sm:$0xff] }
 0x224   : > { %v3337_v45 = vpop.eup %3336  ;;  %3360 = vpow2.f32 %v2472_v50  ;;  %v2481_v16 = vmul.f32 -1.442695, %v1952_v47  ;;  %v2480_v46 = vmul.f32 -1.442695, %v1951_v43  ;;  %v2482_v1 = vmul.f32 -1.442695, %v1953_v63 }
 0x225   : > { %v3339_v19 = vpop.eup %3338  ;;  %3362 = vpow2.f32 %v2474_v42  ;;  %v4402_v32 = vmul.f32 %v3327_v28, %v4176_v53  ;;  %v4409_v47 = vmul.f32 %v3329_v54, %v4675_v23  ;;  %v4676_v53 = vld [vmem:[#allocation17_spill] sm:$0xff]  ;;  %v4677_v54 = vld [vmem:[#allocation18_spill] sm:$0xff] }
 0x226   : > { %v4391_v58 = vpop.eup %3340  ;;  %3364 = vpow2.f32 %v2475_v33  ;;  %v4416_v28 = vmul.f32 %v3331_v31, %v4676_v53  ;;  %v4423_v23 = vmul.f32 %v3333_v34, %v4677_v54 }
 0x227   : > { %v4396_v48 = vpop.eup %3342  ;;  %3366 = vpow2.f32 %v2477_v62 }
 0x228   : > { %v4399_v21 = vpop.eup %3344  ;;  %3368 = vpow2.f32 %v2476_v26  ;;  %v4678_v26 = vld [vmem:[#allocation19_spill] sm:$0xff] }
 0x229   : > { %v4406_v50 = vpop.eup %3346  ;;  %3370 = vpow2.f32 %v2478_v40 }
 0x22a   : > { %v4413_v63 = vpop.eup %3348  ;;  %3372 = vpow2.f32 %v2479_v36  ;;  %v4680_v36 = vld [vmem:[#allocation21_spill] sm:$0xff] }
 0x22b   : > { %3374 = vpow2.f32 %v2481_v16  ;;  %v4446_v53 = vmul.f32 %v3339_v19, %v4680_v36 }
 0x22c   : > { %3376 = vpow2.f32 %v2480_v46 }
 0x22d   : > { %3378 = vpow2.f32 %v2482_v1 }
 0x261   : > { %v1603_v44 = vpop.f32.mrb[20].mxu0 }
 0x262   : > { %v3045_v57 = vadd.f32 %v1603_v44, %v4260_v49  ;;  %v1853_v20 = vpop.f32.mrb[20].mxu1  ;;  %v1605_v30 = vpop.f32.mrb[21].mxu0 }
 0x263   : > { %v3065_v3 = vadd.f32 %v1853_v20, %v4264_v10  ;;  %v3046_v24 = vadd.f32 %v1605_v30, %v4272_v61  ;;  %v1855_v22 = vpop.f32.mrb[21].mxu1  ;;  %v4420_v30 = vpop.eup %3350 }
 0x264   : > { %v2234_v42 = vmul.f32 %v3045_v57, %v4283_v25  ;;  %v3066_v43 = vadd.f32 %v1855_v22, %v4280_v52  ;;  %v3353_v62 = vpop.eup %3352  ;;  %v4433_v57 = vmul.f32 %v3335_v41, %v4678_v26  ;;  %v4679_v22 = vld [vmem:[#allocation20_spill] sm:$0xff] }
 0x265   : > { %v2236_v33 = vmul.f32 %v3065_v3, %v4286_v7  ;;  %v2235_v44 = vmul.f32 %v3046_v24, %v4289_v51  ;;  %v1609_v20 = vpop.f32.mrb[22].mxu0  ;;  %v3355_v24 = vpop.eup %3354  ;;  %v2099_v54 = vadd.f32 1.0, %v3353_v62 }
 0x266   : > { %2274 = vst [vmem:[%s4427_s20] sm:$0xff] %v2234_v42  ;;  %v2237_v25 = vmul.f32 %v3066_v43, %v4292_v8  ;;  %v3047_v7 = vadd.f32 %v1609_v20, %v4260_v49  ;;  %v1859_v51 = vpop.f32.mrb[22].mxu1  ;;  %v1611_v31 = vpop.f32.mrb[23].mxu0  ;;  %v4440_v8 = vmul.f32 %v3337_v45, %v4679_v22 }
 0x267   : > { %2276 = vst [vmem:[%s4427_s20 + $0x10] sm:$0xff] %v2236_v33  ;;  %2275 = vst [vmem:[%s4427_s20 + $0x8] sm:$0xff] %v2235_v44  ;;  %v3067_v34 = vadd.f32 %v1859_v51, %v4264_v10  ;;  %v3048_v40 = vadd.f32 %v1611_v31, %v4272_v61  ;;  %v1861_v3 = vpop.f32.mrb[23].mxu1  ;;  %v3357_v43 = vpop.eup %3356  ;;  %v4681_v51 = vld [vmem:[#allocation22_spill] sm:$0xff]  ;;  %3380 = vrcp.f32 %v2099_v54 }
 0x268   : > { %2277 = vst [vmem:[%s4427_s20 + $0x18] sm:$0xff] %v2237_v25  ;;  %v2238_v42 = vmul.f32 %v3047_v7, %v4297_v35  ;;  %v3068_v41 = vadd.f32 %v1861_v3, %v4280_v52  ;;  %v3359_v45 = vpop.eup %3358  ;;  %v4455_v46 = vmul.f32 %v4391_v58, %v4681_v51 }
 0x269   : > { %v2240_v33 = vmul.f32 %v3067_v34, %v4302_v38  ;;  %v2239_v44 = vmul.f32 %v3048_v40, %v4307_v59  ;;  %v1615_v20 = vpop.f32.mrb[24].mxu0  ;;  %v3361_v7 = vpop.eup %3360  ;;  %v2101_v38 = vadd.f32 1.0, %v3355_v24  ;;  %v2102_v34 = vadd.f32 1.0, %v3357_v43  ;;  %v4683_v24 = vld [vmem:[#allocation24_spill] sm:$0xff] }
 0x26a   : > { %2278 = vst [vmem:[%s4427_s20 + $0x20] sm:$0xff] %v2238_v42  ;;  %v2241_v35 = vmul.f32 %v3068_v41, %v4314_v4  ;;  %v3049_v16 = vadd.f32 %v1615_v20, %v4260_v49  ;;  %v1865_v25 = vpop.f32.mrb[24].mxu1  ;;  %v1617_v19 = vpop.f32.mrb[25].mxu0  ;;  %v4682_v4 = vld [vmem:[#allocation23_spill] sm:$0xff]  ;;  %v4470_v22 = vmul.f32 %v4399_v21, %v4683_v24  ;;  %v2104_v42 = vadd.f32 1.0, %v3359_v45 }
 0x26b   : > { %2280 = vst [vmem:[%s4427_s20 + $0x30] sm:$0xff] %v2240_v33  ;;  %2279 = vst [vmem:[%s4427_s20 + $0x28] sm:$0xff] %v2239_v44  ;;  %v3069_v59 = vadd.f32 %v1865_v25, %v4264_v10  ;;  %v3050_v1 = vadd.f32 %v1617_v19, %v4272_v61  ;;  %v1867_v31 = vpop.f32.mrb[25].mxu1  ;;  %v3363_v62 = vpop.eup %3362  ;;  %v4463_v26 = vmul.f32 %v4396_v48, %v4682_v4  ;;  %v2103_v43 = vadd.f32 1.0, %v3361_v7 }
 0x26c   : > { %2281 = vst [vmem:[%s4427_s20 + $0x38] sm:$0xff] %v2241_v35  ;;  %v2242_v40 = vmul.f32 %v3049_v16, %v4317_v6  ;;  %v3070_v58 = vadd.f32 %v1867_v31, %v4280_v52  ;;  %v3365_v3 = vpop.eup %3364  ;;  %3382 = vrcp.f32 %v2101_v38  ;;  %v2105_v45 = vadd.f32 1.0, %v3363_v62 }
 0x26d   : > { %v2244_v41 = vmul.f32 %v3069_v59, %v4367_v18  ;;  %v2243_v36 = vmul.f32 %v3050_v1, %v4386_v55  ;;  %v1621_v48 = vpop.f32.mrb[26].mxu0  ;;  %v3367_v33 = vpop.eup %3366  ;;  %3384 = vrcp.f32 %v2102_v34  ;;  %v2106_v25 = vadd.f32 1.0, %v3365_v3 }
 0x26e   : > { %2282 = vst [vmem:[%s4427_s20 + $0x40] sm:$0xff] %v2242_v40  ;;  %v2245_v6 = vmul.f32 %v3070_v58, %v4389_v14  ;;  %v3051_v44 = vadd.f32 %v1621_v48, %v4260_v49  ;;  %v1871_v20 = vpop.f32.mrb[26].mxu1  ;;  %v1623_v21 = vpop.f32.mrb[27].mxu0  ;;  %3386 = vrcp.f32 %v2104_v42  ;;  %v2108_v51 = vadd.f32 1.0, %v3367_v33 }
 0x26f   : > { %v3369_v35 = vpop.eup %3368  ;;  %2284 = vst [vmem:[%s4427_s20 + $0x50] sm:$0xff] %v2244_v41  ;;  %2283 = vst [vmem:[%s4427_s20 + $0x48] sm:$0xff] %v2243_v36  ;;  %v3071_v18 = vadd.f32 %v1871_v20, %v4264_v10  ;;  %v3052_v55 = vadd.f32 %v1623_v21, %v4272_v61  ;;  %v1873_v16 = vpop.f32.mrb[27].mxu1  ;;  %3388 = vrcp.f32 %v2103_v43 }
 0x270   : > { %v3371_v54 = vpop.eup %3370  ;;  %2285 = vst [vmem:[%s4427_s20 + $0x58] sm:$0xff] %v2245_v6  ;;  %v2246_v14 = vmul.f32 %v3051_v44, %v4394_v13  ;;  %v3072_v19 = vadd.f32 %v1873_v16, %v4280_v52  ;;  %v2107_v62 = vadd.f32 1.0, %v3369_v35  ;;  %3390 = vrcp.f32 %v2105_v45  ;;  %v4684_v16 = vld [vmem:[#allocation25_spill] sm:$0xff] }
 0x271   : > { %v3373_v7 = vpop.eup %3372  ;;  %v2248_v38 = vmul.f32 %v3071_v18, %v4402_v32  ;;  %v2247_v59 = vmul.f32 %v3052_v55, %v4409_v47  ;;  %v1627_v1 = vpop.f32.mrb[28].mxu0  ;;  %v2109_v3 = vadd.f32 1.0, %v3371_v54  ;;  %3392 = vrcp.f32 %v2106_v25 }
 0x272   : > { %v3375_v31 = vpop.eup %3374  ;;  %2286 = vst [vmem:[%s4427_s20 + $0x60] sm:$0xff] %v2246_v14  ;;  %v2249_v4 = vmul.f32 %v3072_v19, %v4416_v28  ;;  %v3053_v13 = vadd.f32 %v1627_v1, %v4260_v49  ;;  %v1877_v34 = vpop.f32.mrb[28].mxu1  ;;  %v2110_v41 = vadd.f32 1.0, %v3373_v7  ;;  %3394 = vrcp.f32 %v2108_v51  ;;  %v4685_v19 = vld [vmem:[#allocation26_spill] sm:$0xff] }
 0x273   : > { %v1629_v40 = vpop.f32.mrb[29].mxu0  ;;  %v3377_v58 = vpop.eup %3376  ;;  %2288 = vst [vmem:[%s4427_s20 + $0x70] sm:$0xff] %v2248_v38  ;;  %2287 = vst [vmem:[%s4427_s20 + $0x68] sm:$0xff] %v2247_v59  ;;  %v3073_v32 = vadd.f32 %v1877_v34, %v4264_v10  ;;  %v2112_v48 = vadd.f32 1.0, %v3375_v31  ;;  %3396 = vrcp.f32 %v2107_v62  ;;  %v2217_v54 = vmul.f32 %v4406_v50, %v4684_v16  ;;  %v4686_v50 = vld [vmem:[#allocation27_spill] sm:$0xff] }
 0x274   : > { %v3054_v47 = vadd.f32 %v1629_v40, %v4272_v61  ;;  %v1879_v24 = vpop.f32.mrb[29].mxu1  ;;  %v3379_v42 = vpop.eup %3378  ;;  %2289 = vst [vmem:[%s4427_s20 + $0x78] sm:$0xff] %v2249_v4  ;;  %v2250_v28 = vmul.f32 %v3053_v13, %v4423_v23  ;;  %v2111_v44 = vadd.f32 1.0, %v3377_v58  ;;  %3398 = vrcp.f32 %v2109_v3 }
 0x275   : > { %v3074_v36 = vadd.f32 %v1879_v24, %v4280_v52  ;;  %v2252_v33 = vmul.f32 %v3073_v32, %v4433_v57  ;;  %v1633_v6 = vpop.f32.mrb[30].mxu0  ;;  %v2113_v45 = vadd.f32 1.0, %v3379_v42  ;;  %v3381_v55 = vpop.eup %3380  ;;  %3400 = vrcp.f32 %v2110_v41 }
 0x276   : > { %v2251_v43 = vmul.f32 %v3054_v47, %v4440_v8  ;;  %2290 = vst [vmem:[%s4427_s20 + $0x80] sm:$0xff] %v2250_v28  ;;  %v3055_v21 = vadd.f32 %v1633_v6, %v4260_v49  ;;  %v1883_v23 = vpop.f32.mrb[30].mxu1  ;;  %v1635_v35 = vpop.f32.mrb[31].mxu0  ;;  %v2218_v7 = vmul.f32 %v4413_v63, %v4685_v19  ;;  %3402 = vrcp.f32 %v2112_v48 }
 0x277   : > { %v2253_v20 = vmul.f32 %v3074_v36, %v4446_v53  ;;  %2292 = vst [vmem:[%s4427_s20 + $0x90] sm:$0xff] %v2252_v33  ;;  %v3075_v18 = vadd.f32 %v1883_v23, %v4264_v10  ;;  %v3056_v57 = vadd.f32 %v1635_v35, %v4272_v61  ;;  %v1885_v8 = vpop.f32.mrb[31].mxu1  ;;  %v3383_v14 = vpop.eup %3382  ;;  %v2220_v31 = vmul.f32 %v4420_v30, %v4686_v50 }
 0x278   : > { %2291 = vst [vmem:[%s4427_s20 + $0x88] sm:$0xff] %v2251_v43  ;;  %v2254_v53 = vmul.f32 %v3055_v21, %v4455_v46  ;;  %v3076_v25 = vadd.f32 %v1885_v8, %v4280_v52  ;;  %v3385_v1 = vpop.eup %3384  ;;  %3404 = vrcp.f32 %v2111_v44  ;;  %v2219_v34 = vmul.f32 %v3381_v55, %v4256_v29 }
 0x279   : > { %2293 = vst [vmem:[%s4427_s20 + $0x98] sm:$0xff] %v2253_v20  ;;  %v2256_v51 = vmul.f32 %v3075_v18, %v4463_v26  ;;  %v2255_v38 = vmul.f32 %v3056_v57, %v4470_v22  ;;  %v1639_v59 = vpop.f32.mrb[32].mxu0  ;;  %v3387_v13 = vpop.eup %3386  ;;  %3406 = vrcp.f32 %v2113_v45  ;;  %v2221_v58 = vmul.f32 %v3383_v14, %v4268_v0 }
 0x27a   : > { %2294 = vst [vmem:[%s4427_s20 + $0xa0] sm:$0xff] %v2254_v53  ;;  %v2257_v46 = vmul.f32 %v3076_v25, %v2217_v54  ;;  %v3057_v62 = vadd.f32 %v1639_v59, %v4260_v49  ;;  %v1889_v4 = vpop.f32.mrb[32].mxu1  ;;  %v1641_v63 = vpop.f32.mrb[33].mxu0  ;;  %v2222_v28 = vmul.f32 %v3385_v1, %v4276_v56  ;;  %v2224_v6 = vmul.f32 %v3387_v13, %v4311_v5 }
 0x27b   : > { %2296 = vst [vmem:[%s4427_s20 + $0xb0] sm:$0xff] %v2256_v51  ;;  %2295 = vst [vmem:[%s4427_s20 + $0xa8] sm:$0xff] %v2255_v38  ;;  %v3077_v26 = vadd.f32 %v1889_v4, %v4264_v10  ;;  %v3058_v22 = vadd.f32 %v1641_v63, %v4272_v61  ;;  %v1891_v30 = vpop.f32.mrb[33].mxu1  ;;  %v3389_v40 = vpop.eup %3388 }
 0x27c   : > { %2297 = vst [vmem:[%s4427_s20 + $0xb8] sm:$0xff] %v2257_v46  ;;  %v2258_v3 = vmul.f32 %v3057_v62, %v2218_v7  ;;  %v3078_v32 = vadd.f32 %v1891_v30, %v4280_v52  ;;  %v3391_v47 = vpop.eup %3390  ;;  %v2223_v44 = vmul.f32 %v3389_v40, %v4321_v9 }
 0x27d   : > { %v2260_v29 = vmul.f32 %v3077_v26, %v2220_v31  ;;  %v2259_v24 = vmul.f32 %v3058_v22, %v2219_v34  ;;  %v1645_v42 = vpop.f32.mrb[34].mxu0  ;;  %v3393_v41 = vpop.eup %3392  ;;  %v2225_v35 = vmul.f32 %v3391_v47, %v4327_v60 }
 0x27e   : > { %2298 = vst [vmem:[%s4427_s20 + $0xc0] sm:$0xff] %v2258_v3  ;;  %v2261_v36 = vmul.f32 %v3078_v32, %v2221_v58  ;;  %v3059_v48 = vadd.f32 %v1645_v42, %v4260_v49  ;;  %v1895_v33 = vpop.f32.mrb[34].mxu1  ;;  %v1647_v0 = vpop.f32.mrb[35].mxu0  ;;  %v2226_v16 = vmul.f32 %v3393_v41, %v4331_v2 }
 0x27f   : > { %v3395_v43 = vpop.eup %3394  ;;  %2300 = vst [vmem:[%s4427_s20 + $0xd0] sm:$0xff] %v2260_v29  ;;  %2299 = vst [vmem:[%s4427_s20 + $0xc8] sm:$0xff] %v2259_v24  ;;  %v3079_v20 = vadd.f32 %v1895_v33, %v4264_v10  ;;  %v3060_v21 = vadd.f32 %v1647_v0, %v4272_v61  ;;  %v1897_v56 = vpop.f32.mrb[35].mxu1 }
 0x280   : > { %v3397_v23 = vpop.eup %3396  ;;  %2301 = vst [vmem:[%s4427_s20 + $0xd8] sm:$0xff] %v2261_v36  ;;  %v2262_v45 = vmul.f32 %v3059_v48, %v2222_v28  ;;  %v3080_v18 = vadd.f32 %v1897_v56, %v4280_v52  ;;  %v2228_v19 = vmul.f32 %v3395_v43, %v4335_v11 }
 0x281   : > { %v3399_v5 = vpop.eup %3398  ;;  %v2264_v57 = vmul.f32 %v3079_v20, %v2224_v6  ;;  %v2263_v9 = vmul.f32 %v3060_v21, %v2223_v44  ;;  %v1651_v8 = vpop.f32.mrb[36].mxu0  ;;  %v2227_v7 = vmul.f32 %v3397_v23, %v4339_v37 }
 0x282   : > { %v3401_v55 = vpop.eup %3400  ;;  %2302 = vst [vmem:[%s4427_s20 + $0xe0] sm:$0xff] %v2262_v45  ;;  %v2265_v54 = vmul.f32 %v3080_v18, %v2225_v35  ;;  %v3061_v53 = vadd.f32 %v1651_v8, %v4260_v49  ;;  %v1901_v25 = vpop.f32.mrb[36].mxu1  ;;  %v2229_v1 = vmul.f32 %v3399_v5, %v4343_v12 }
 0x283   : > { %v1653_v60 = vpop.f32.mrb[37].mxu0  ;;  %v3403_v14 = vpop.eup %3402  ;;  %2304 = vst [vmem:[%s4427_s20 + $0xf0] sm:$0xff] %v2264_v57  ;;  %2303 = vst [vmem:[%s4427_s20 + $0xe8] sm:$0xff] %v2263_v9  ;;  %v3081_v51 = vadd.f32 %v1901_v25, %v4264_v10  ;;  %v2230_v4 = vmul.f32 %v3401_v55, %v4349_v27 }
 0x284   : > { %v3062_v2 = vadd.f32 %v1653_v60, %v4272_v61  ;;  %v1903_v38 = vpop.f32.mrb[37].mxu1  ;;  %v3405_v59 = vpop.eup %3404  ;;  %2305 = vst [vmem:[%s4427_s20 + $0xf8] sm:$0xff] %v2265_v54  ;;  %v2266_v50 = vmul.f32 %v3061_v53, %v2226_v16  ;;  %v2232_v26 = vmul.f32 %v3403_v14, %v4353_v15 }
 0x285   : > { %v3082_v11 = vadd.f32 %v1903_v38, %v4280_v52  ;;  %v3407_v31 = vpop.eup %3406  ;;  %v2268_v46 = vmul.f32 %v3081_v51, %v2228_v19  ;;  %v1657_v62 = vpop.f32.mrb[38].mxu0  ;;  %v2231_v22 = vmul.f32 %v3405_v59, %v4359_v17 }
 0x286   : > { %v2267_v37 = vmul.f32 %v3062_v2, %v2227_v7  ;;  %2306 = vst [vmem:[%s4427_s20 + $0x100] sm:$0xff] %v2266_v50  ;;  %v3063_v13 = vadd.f32 %v1657_v62, %v4260_v49  ;;  %v1907_v12 = vpop.f32.mrb[38].mxu1  ;;  %v1659_v34 = vpop.f32.mrb[39].mxu0  ;;  %v2233_v49 = vmul.f32 %v3407_v31, %v4363_v39 }
 0x287   : > { %v2269_v63 = vmul.f32 %v3082_v11, %v2229_v1  ;;  %2308 = vst [vmem:[%s4427_s20 + $0x110] sm:$0xff] %v2268_v46  ;;  %v3083_v30 = vadd.f32 %v1907_v12, %v4264_v10  ;;  %v3064_v27 = vadd.f32 %v1659_v34, %v4272_v61  ;;  %v1909_v40 = vpop.f32.mrb[39].mxu1 }
 0x288   : > { %2307 = vst [vmem:[%s4427_s20 + $0x108] sm:$0xff] %v2267_v37  ;;  %v2270_v58 = vmul.f32 %v3063_v13, %v2230_v4  ;;  %v3084_v15 = vadd.f32 %v1909_v40, %v4280_v52 }
 0x289   : > { %2309 = vst [vmem:[%s4427_s20 + $0x118] sm:$0xff] %v2269_v63  ;;  %v2272_v17 = vmul.f32 %v3083_v30, %v2232_v26  ;;  %v2271_v3 = vmul.f32 %v3064_v27, %v2231_v22 }
 0x28a   : > { %2310 = vst [vmem:[%s4427_s20 + $0x120] sm:$0xff] %v2270_v58  ;;  %v2273_v10 = vmul.f32 %v3084_v15, %v2233_v49 }
 0x28b   : > { %2312 = vst [vmem:[%s4427_s20 + $0x130] sm:$0xff] %v2272_v17  ;;  %2311 = vst [vmem:[%s4427_s20 + $0x128] sm:$0xff] %v2271_v3 }
 0x28c   : > { %2313 = vst [vmem:[%s4427_s20 + $0x138] sm:$0xff] %v2273_v10 }
 0x28d   : > { %3567 = shalt.err (!%p3564_p4)
}
 0x28e   : > { %s3568_s17 = scalar_lea.hbm %s4567_s14, 5120  ;;  %s3572_s30 = scalar_lea.hbm %s4623_s6, 10240 }
 0x28f   : > { %p3569_p9 = scmp.ne.s32.totalorder %s4567_s14, %s3568_s17  ;;  %p3573_p8 = scmp.lt.u32.totalorder %s4567_s14, %s4623_s6 }
 0x290   : > { %p3574_p13 = scmp.lt.u32.totalorder %s3572_s30, %s3568_s17  ;;  %p3576_p10 = scmp.lt.u32.totalorder %s3568_s17, %s4567_s14 }
 0x291   : > { %p3570_p0 = pnand %p3569_p9, %p3828_p5 }
 0x292   : > { %p3575_p6 = por %p3574_p13, %p3573_p8 }
 0x293   : > { %p3571_p11 = pneg %p3570_p0 }
 0x294   : > { %p3577_p3 = por %p3576_p10, %p3575_p6 }
 0x296   : > { %p3578_p7 = pnand %p3577_p3, %p3571_p11 }
 0x298   : > { %3581 = shalt.err (!%p3578_p7)
}
 0x299   : > { %s3637_s11 = smov 512   ;;  %s3638_s8 = smov 32  }
 0x29a   : > { %3181 = dma.vmem_to_hbm [thread:$0]  (%p3828_p5), %s4570_s5, 5120, %s4567_s14, %s2315_s13, %s3637_s11, %s3637_s11, %s3638_s8  }
 0x29b PF: > { %s2344_s18 = sand.u32 1, %s3616_s23   ;;  %p4687_p12 = scmp.ne.s32.totalorder %s4645_s29, 0 }
 0x29c   : > { %p4688_p1 = scmp.ge.s32.totalorder %s3628_s26, 2  ;;  %s2345_s21 = scalar_lea.sflag [#allocation5], %s2344_s18 }
 0x29e   : > { %p3198_p2 = pnand %p4688_p1, %p4687_p12 }
 0x2a0   : > { %3611 = dma.done.wait (!%p3198_p2), %s2345_s21, 5120  }
 0x2a1   : > { %3613 = vsyncadd (!%p3198_p2), %s2345_s21, 4294962176  ;;  %p22_p4 = scmp.ge.s32.totalorder %s3814_s19, 4   ;;  %s4689_s23 = smov %s3620_s24 }
 0x2a2   : > { %s4690_s24 = smov %s3624_s25  ;;  %s4691_s25 = smov %s3824_s10 }
 0x2a3   : > { %s4692_s26 = smov %s3814_s19  ;;  %24 = sbr.rel (!%p22_p4) target bundleno = 9 (0x9), region = 101 }
 0x2aa   :  { %2350 = vsyncpa [#allocation4], 1 }
 0x2ab   :  { %2352 = vsyncpa [#allocation4 + $0x1], 1 }
 0x2ac   :  { %2353 = vsyncpa [#allocation7], 1 }
 0x2ad   :  { %2354 = vsyncpa [#allocation10], 1 }
 0x2ae   :  { %2355 = vsyncpa [#allocation5], 1 }
 0x2af   :  { %2357 = vsyncpa [#allocation5 + $0x1], 1 }

</bundles_post_ra>
